<compile_context>
chip_gen: v6e
topology: v6e:2x2x1
jax: 0.10.0
libtpu: 0.0.40
codegen_flags: <defaults>
</compile_context>

<pallas_src>
import functools

import jax
import jax.numpy as jnp
from jax import lax
from jax.experimental import pallas as pl
from jax.experimental.pallas import tpu as pltpu

EPS = 1e-5
MARG = 128  # lane-aligned left margin of the flattened padded-frame buffers


# ----------------------------------------------------------------------------
# Fused ConvRes kernel
# ----------------------------------------------------------------------------
def convres_kernel(x_ref, mask_ref,
                   w0_ref, b0_ref,
                   w1_ref, g1_ref, be1_ref,
                   w2_ref, g2_ref, be2_ref,
                   o_ref,
                   xp1, xp2,
                   *, wp, n_valid):
    """Fused ch_conv -> (conv,bn,relu) -> (conv,bn,relu) -> +res, all in VMEM.

    Layouts (channel-major, flattened padded frames, lane dim last):
      x_ref  : (Cin,  LT)   input, valid data at lanes [MARG, MARG+L)
      mask_ref: (1,   LT)   1.0 at valid (non-halo) pixels, 0.0 elsewhere
      w*_ref : (9, Cout', Cin')  per-tap weight matrices, tap j = kh*3 + kw
      b0_ref : (Cout, 1)    ch_conv bias (block1/block2 biases cancelled by BN)
      g*/be* : (C, 1)       BN gamma / beta columns
      o_ref  : (Cout, L)    output over the flattened padded frames
      xp1/xp2: (C, LT)      staging buffers for the next conv's shifted reads
    """
    L = o_ref.shape[1]
    LT = x_ref.shape[1]
    inv_n = 1.0 / n_valid

    mask = mask_ref[:, MARG:MARG + L]                      # (1, L)

    def conv3x3(src_ref, w_ref):
        # 3x3 conv as 9 shifted tap matmuls, accumulated in f32 on the VPU.
        acc = None
        for kh in range(3):
            for kw in range(3):
                j = kh * 3 + kw
                start = MARG + (kh - 1) * wp + (kw - 1)     # static lane offset
                xs = src_ref[:, start:start + L]            # (C_in', L)
                t = jnp.dot(w_ref[j], xs, preferred_element_type=jnp.float32)
                acc = t if acc is None else acc + t
        return acc                                          # (C_out', L)

    def bn_relu(y, g_ref, be_ref):
        # Training-mode BatchNorm: biased batch stats over the N*H*W valid pixels,
        # computed in a single pass (sum and sum-of-squares), f32 throughout.
        ym = y * mask
        s1 = jnp.sum(ym, axis=1, keepdims=True)             # (C, 1)
        s2 = jnp.sum(ym * ym, axis=1, keepdims=True)         # (C, 1)
        mean = s1 * inv_n
        var = s2 * inv_n - mean * mean
        scale = g_ref[...] * lax.rsqrt(var + EPS)
        shift = be_ref[...] - mean * scale
        # Re-mask so halo lanes stay zero for the next conv's shifted reads.
        return jnp.maximum(ym * scale + shift, 0.0) * mask

    def stage(dst_ref, act):
        # Zero only the (tiny) margins once, then drop the data at the aligned offset.
        c = dst_ref.shape[0]
        dst_ref[:, :MARG] = jnp.zeros((c, MARG), jnp.float32)
        if LT - MARG - L > 0:
            dst_ref[:, MARG + L:] = jnp.zeros((c, LT - MARG - L), jnp.float32)
        dst_ref[:, MARG:MARG + L] = act

    # ch_conv (in_channels != out_channels branch); mask so halo lanes are zero.
    y_ch = (conv3x3(x_ref, w0_ref) + b0_ref[...]) * mask     # (Cout, L), residual
    stage(xp1, y_ch)

    # block1 -> bn1 -> relu   (conv bias dropped: cancelled by BN mean subtraction)
    o1 = bn_relu(conv3x3(xp1, w1_ref), g1_ref, be1_ref)       # (Cmid, L)
    stage(xp2, o1)

    # block2 -> bn2 -> relu -> + res
    o2 = bn_relu(conv3x3(xp2, w2_ref), g2_ref, be2_ref)       # (Cout, L)
    o_ref[...] = o2 + y_ch                                    # lane-dense store


# ----------------------------------------------------------------------------
# Wrapper: single pallas_call, everything resident in VMEM
# ----------------------------------------------------------------------------
@jax.jit
def convres_forward(x_nchw, params):
    N, Cin, H, W = x_nchw.shape
    Cout = params["w_ch"].shape[1]
    Cmid = params["w1"].shape[1]
    Hp, Wp = H + 2, W + 2
    L = N * Hp * Wp                       # flattened padded frames (lane dim)
    NHW = N * H * W
    # Right margin must cover the largest tap shift (Wp + 1); keep LT a lane-tile multiple.
    LT = MARG + ((L + Wp + 1 + 127) // 128) * 128

    # Layout plumbing (cheap XLA): NCHW -> channel-major flattened padded frames.
    x_pad = jnp.pad(x_nchw.astype(jnp.float32), ((0, 0), (0, 0), (1, 1), (1, 1)))
    x_flat = jnp.transpose(x_pad, (1, 0, 2, 3)).reshape(Cin, L)
    x_buf = jnp.pad(x_flat, ((0, 0), (MARG, LT - MARG - L)))

    mask_frame = jnp.pad(jnp.ones((H, W), jnp.float32), ((1, 1), (1, 1)))   # (Hp, Wp)
    mask = jnp.pad(jnp.tile(mask_frame[None], (N, 1, 1)).reshape(1, L),
                   ((0, 0), (MARG, LT - MARG - L)))

    kernel = functools.partial(convres_kernel, wp=Wp, n_valid=float(NHW))

    out2d = pl.pallas_call(
        kernel,
        out_shape=jax.ShapeDtypeStruct((Cout, L), jnp.float32),
        grid_spec=pltpu.PrefetchScalarGridSpec(
            num_scalar_prefetch=0,
            grid=(1,),
            in_specs=[
                pl.BlockSpec((Cin, LT), lambda i: (0, 0)),
                pl.BlockSpec((1, LT), lambda i: (0, 0)),
                pl.BlockSpec((9, Cout, Cin), lambda i: (0, 0, 0)),
                pl.BlockSpec((Cout, 1), lambda i: (0, 0)),
                pl.BlockSpec((9, Cmid, Cout), lambda i: (0, 0, 0)),
                pl.BlockSpec((Cmid, 1), lambda i: (0, 0)),
                pl.BlockSpec((Cmid, 1), lambda i: (0, 0)),
                pl.BlockSpec((9, Cout, Cmid), lambda i: (0, 0, 0)),
                pl.BlockSpec((Cout, 1), lambda i: (0, 0)),
                pl.BlockSpec((Cout, 1), lambda i: (0, 0)),
            ],
            out_specs=pl.BlockSpec((Cout, L), lambda i: (0, 0)),
            scratch_shapes=[
                pltpu.VMEM((Cout, LT), jnp.float32),   # staged y_ch (block1 input)
                pltpu.VMEM((Cmid, LT), jnp.float32),   # staged o1   (block2 input)
            ],
        ),
        compiler_params=pltpu.CompilerParams(dimension_semantics=("arbitrary",)),
    )(x_buf, mask,
      params["w_ch"], params["b_ch"],
      params["w1"], params["gamma1"], params["beta1"],
      params["w2"], params["gamma2"], params["beta2"])

    # (Cout, N*Hp*Wp) -> NCHW valid region.
    out = out2d.reshape(Cout, N, Hp, Wp)[:, :, 1:H + 1, 1:W + 1]
    return jnp.transpose(out, (1, 0, 2, 3))


# ----------------------------------------------------------------------------
# Pure-JAX reference (NCHW, like PyTorch) for correctness check
# ----------------------------------------------------------------------------
def conv_ref_nchw(x, w_oihw, b):
    y = lax.conv_general_dilated(
        x, w_oihw, window_strides=(1, 1), padding=((1, 1), (1, 1)),
        dimension_numbers=("NCHW", "OIHW", "NCHW"))
    return y + b[None, :, None, None]


def bn_relu_ref_nchw(y, gamma, beta):
    mean = jnp.mean(y, axis=(0, 2, 3), keepdims=True)
    var = jnp.mean(jnp.square(y - mean), axis=(0, 2, 3), keepdims=True)
    yhat = (y - mean) / jnp.sqrt(var + EPS)
    return jnp.maximum(yhat * gamma[None, :, None, None] + beta[None, :, None, None], 0.0)


def convres_ref(x, p):
    x = conv_ref_nchw(x, p["w_ch_oihw"], p["b_ch"])
    res = x
    o = bn_relu_ref_nchw(conv_ref_nchw(x, p["w1_oihw"], p["b1"]), p["gamma1"], p["beta1"])
    o = bn_relu_ref_nchw(conv_ref_nchw(o, p["w2_oihw"], p["b2"]), p["gamma2"], p["beta2"])
    return o + res


# ----------------------------------------------------------------------------
if __name__ == "__main__":
    # Module config: ConvRes(kernal_size=3, in_channels=4, out_channels=8,
    #                        window_size=8, stride=1, padding=None, spatial_dims=2)
    N, Cin, H, W = 2, 4, 16, 16
    Cout = 8
    Cmid = Cout // 2

    key = jax.random.PRNGKey(0)
    ks = jax.random.split(key, 12)

    def uinit(k, shape, fan_in):
        bound = 1.0 / jnp.sqrt(fan_in)
        return jax.random.uniform(k, shape, jnp.float32, -bound, bound)

    # Torch-layout (OIHW) weights, deterministically initialized.
    w_ch_oihw = uinit(ks[0], (Cout, Cin, 3, 3), Cin * 9)
    b_ch = uinit(ks[1], (Cout,), Cin * 9)
    w1_oihw = uinit(ks[2], (Cmid, Cout, 3, 3), Cout * 9)
    b1 = uinit(ks[3], (Cmid,), Cout * 9)
    w2_oihw = uinit(ks[4], (Cout, Cmid, 3, 3), Cmid * 9)
    b2 = uinit(ks[5], (Cout,), Cmid * 9)
    gamma1 = jax.random.uniform(ks[6], (Cmid,), jnp.float32, 0.5, 1.5)
    beta1 = jax.random.uniform(ks[7], (Cmid,), jnp.float32, -0.5, 0.5)
    gamma2 = jax.random.uniform(ks[8], (Cout,), jnp.float32, 0.5, 1.5)
    beta2 = jax.random.uniform(ks[9], (Cout,), jnp.float32, -0.5, 0.5)

    def to_taps(w_oihw):
        # OIHW -> (kh*3+kw, Cout, Cin): per-tap (Cout, Cin) matrices for the kernel.
        o, i = w_oihw.shape[0], w_oihw.shape[1]
        return jnp.transpose(w_oihw, (2, 3, 0, 1)).reshape(9, o, i)

    params = {
        "w_ch": to_taps(w_ch_oihw), "b_ch": b_ch.reshape(Cout, 1),
        # block1 / block2 biases are intentionally NOT passed: exactly cancelled by BN.
        "w1": to_taps(w1_oihw),
        "w2": to_taps(w2_oihw),
        "gamma1": gamma1.reshape(Cmid, 1), "beta1": beta1.reshape(Cmid, 1),
        "gamma2": gamma2.reshape(Cout, 1), "beta2": beta2.reshape(Cout, 1),
    }
    ref_params = {
        "w_ch_oihw": w_ch_oihw, "b_ch": b_ch,
        "w1_oihw": w1_oihw, "b1": b1,
        "w2_oihw": w2_oihw, "b2": b2,
        "gamma1": gamma1, "beta1": beta1,
        "gamma2": gamma2, "beta2": beta2,
    }

    x = jax.random.normal(ks[10], (N, Cin, H, W), jnp.float32)  # NCHW like PyTorch

    out = convres_forward(x, params)
    out = jax.block_until_ready(out)

    ref = convres_ref(x, ref_params)
    assert out.shape == (N, Cout, H, W)
    assert jnp.allclose(out, ref, rtol=1e-3, atol=1e-3), float(jnp.max(jnp.abs(out - ref)))

    print("KERNEL_OK")
</pallas_src>

<mosaic_0001>
module attributes {stable_mosaic.version = 11 : i64} {
  func.func @convres_kernel(%arg0: i32, %arg1: memref<4x896xf32, #tpu.memory_space<vmem>>, %arg2: memref<1x896xf32, #tpu.memory_space<vmem>>, %arg3: memref<9x8x4xf32, #tpu.memory_space<vmem>>, %arg4: memref<8x1xf32, #tpu.memory_space<vmem>>, %arg5: memref<9x4x8xf32, #tpu.memory_space<vmem>>, %arg6: memref<4x1xf32, #tpu.memory_space<vmem>>, %arg7: memref<4x1xf32, #tpu.memory_space<vmem>>, %arg8: memref<9x8x4xf32, #tpu.memory_space<vmem>>, %arg9: memref<8x1xf32, #tpu.memory_space<vmem>>, %arg10: memref<8x1xf32, #tpu.memory_space<vmem>>, %arg11: memref<8x648xf32, #tpu.memory_space<vmem>>, %arg12: memref<8x896xf32, #tpu.memory_space<vmem>>, %arg13: memref<4x896xf32, #tpu.memory_space<vmem>>) attributes {dimension_semantics = [#tpu.dimension_semantics<arbitrary>], iteration_bounds = array<i64: 1>, scalar_prefetch = 0 : i64, scratch_operands = 2 : i64, tpu.core_type = #tpu.core_type<tc>, window_params = [{pipeline_mode = #tpu.pipeline_mode<synchronous>, transform_indices = @transform_0, window_bounds = array<i64: 4, 896>}, {pipeline_mode = #tpu.pipeline_mode<synchronous>, transform_indices = @transform_1, window_bounds = array<i64: 1, 896>}, {pipeline_mode = #tpu.pipeline_mode<synchronous>, transform_indices = @transform_2, window_bounds = array<i64: 9, 8, 4>}, {pipeline_mode = #tpu.pipeline_mode<synchronous>, transform_indices = @transform_3, window_bounds = array<i64: 8, 1>}, {pipeline_mode = #tpu.pipeline_mode<synchronous>, transform_indices = @transform_4, window_bounds = array<i64: 9, 4, 8>}, {pipeline_mode = #tpu.pipeline_mode<synchronous>, transform_indices = @transform_5, window_bounds = array<i64: 4, 1>}, {pipeline_mode = #tpu.pipeline_mode<synchronous>, transform_indices = @transform_6, window_bounds = array<i64: 4, 1>}, {pipeline_mode = #tpu.pipeline_mode<synchronous>, transform_indices = @transform_7, window_bounds = array<i64: 9, 8, 4>}, {pipeline_mode = #tpu.pipeline_mode<synchronous>, transform_indices = @transform_8, window_bounds = array<i64: 8, 1>}, {pipeline_mode = #tpu.pipeline_mode<synchronous>, transform_indices = @transform_9, window_bounds = array<i64: 8, 1>}, {pipeline_mode = #tpu.pipeline_mode<synchronous>, transform_indices = @transform_10, window_bounds = array<i64: 8, 648>}]} {
    %c0 = arith.constant 0 : index
    %c128 = arith.constant 128 : index
    %0 = vector.load %arg2[%c0, %c128] : memref<1x896xf32, #tpu.memory_space<vmem>>, vector<1x648xf32>
    %c0_0 = arith.constant 0 : index
    %c109 = arith.constant 109 : index
    %1 = vector.load %arg1[%c0_0, %c109] : memref<4x896xf32, #tpu.memory_space<vmem>>, vector<4x648xf32>
    %c0_1 = arith.constant 0 : index
    %c0_2 = arith.constant 0 : index
    %c0_3 = arith.constant 0 : index
    %2 = vector.load %arg3[%c0_1, %c0_2, %c0_3] : memref<9x8x4xf32, #tpu.memory_space<vmem>>, vector<1x8x4xf32>
    %3 = vector.shape_cast %2 : vector<1x8x4xf32> to vector<8x4xf32>
    %cst = arith.constant dense<0.000000e+00> : vector<8x648xf32>
    %4 = tpu.matmul %3, %1, %cst {dimension_numbers = #tpu.dot_dimension_numbers<[1], [0], [0], [1], [0, 0, 1, 1], [], []>} : vector<8x4xf32>, vector<4x648xf32>, vector<8x648xf32> -> vector<8x648xf32>
    %c0_4 = arith.constant 0 : index
    %c110 = arith.constant 110 : index
    %5 = vector.load %arg1[%c0_4, %c110] : memref<4x896xf32, #tpu.memory_space<vmem>>, vector<4x648xf32>
    %c1 = arith.constant 1 : index
    %c0_5 = arith.constant 0 : index
    %c0_6 = arith.constant 0 : index
    %6 = vector.load %arg3[%c1, %c0_5, %c0_6] : memref<9x8x4xf32, #tpu.memory_space<vmem>>, vector<1x8x4xf32>
    %7 = vector.shape_cast %6 : vector<1x8x4xf32> to vector<8x4xf32>
    %cst_7 = arith.constant dense<0.000000e+00> : vector<8x648xf32>
    %8 = tpu.matmul %7, %5, %cst_7 {dimension_numbers = #tpu.dot_dimension_numbers<[1], [0], [0], [1], [0, 0, 1, 1], [], []>} : vector<8x4xf32>, vector<4x648xf32>, vector<8x648xf32> -> vector<8x648xf32>
    %9 = arith.addf %4, %8 : vector<8x648xf32>
    %c0_8 = arith.constant 0 : index
    %c111 = arith.constant 111 : index
    %10 = vector.load %arg1[%c0_8, %c111] : memref<4x896xf32, #tpu.memory_space<vmem>>, vector<4x648xf32>
    %c2 = arith.constant 2 : index
    %c0_9 = arith.constant 0 : index
    %c0_10 = arith.constant 0 : index
    %11 = vector.load %arg3[%c2, %c0_9, %c0_10] : memref<9x8x4xf32, #tpu.memory_space<vmem>>, vector<1x8x4xf32>
    %12 = vector.shape_cast %11 : vector<1x8x4xf32> to vector<8x4xf32>
    %cst_11 = arith.constant dense<0.000000e+00> : vector<8x648xf32>
    %13 = tpu.matmul %12, %10, %cst_11 {dimension_numbers = #tpu.dot_dimension_numbers<[1], [0], [0], [1], [0, 0, 1, 1], [], []>} : vector<8x4xf32>, vector<4x648xf32>, vector<8x648xf32> -> vector<8x648xf32>
    %14 = arith.addf %9, %13 : vector<8x648xf32>
    %c0_12 = arith.constant 0 : index
    %c127 = arith.constant 127 : index
    %15 = vector.load %arg1[%c0_12, %c127] : memref<4x896xf32, #tpu.memory_space<vmem>>, vector<4x648xf32>
    %c3 = arith.constant 3 : index
    %c0_13 = arith.constant 0 : index
    %c0_14 = arith.constant 0 : index
    %16 = vector.load %arg3[%c3, %c0_13, %c0_14] : memref<9x8x4xf32, #tpu.memory_space<vmem>>, vector<1x8x4xf32>
    %17 = vector.shape_cast %16 : vector<1x8x4xf32> to vector<8x4xf32>
    %cst_15 = arith.constant dense<0.000000e+00> : vector<8x648xf32>
    %18 = tpu.matmul %17, %15, %cst_15 {dimension_numbers = #tpu.dot_dimension_numbers<[1], [0], [0], [1], [0, 0, 1, 1], [], []>} : vector<8x4xf32>, vector<4x648xf32>, vector<8x648xf32> -> vector<8x648xf32>
    %19 = arith.addf %14, %18 : vector<8x648xf32>
    %c0_16 = arith.constant 0 : index
    %c128_17 = arith.constant 128 : index
    %20 = vector.load %arg1[%c0_16, %c128_17] : memref<4x896xf32, #tpu.memory_space<vmem>>, vector<4x648xf32>
    %c4 = arith.constant 4 : index
    %c0_18 = arith.constant 0 : index
    %c0_19 = arith.constant 0 : index
    %21 = vector.load %arg3[%c4, %c0_18, %c0_19] : memref<9x8x4xf32, #tpu.memory_space<vmem>>, vector<1x8x4xf32>
    %22 = vector.shape_cast %21 : vector<1x8x4xf32> to vector<8x4xf32>
    %cst_20 = arith.constant dense<0.000000e+00> : vector<8x648xf32>
    %23 = tpu.matmul %22, %20, %cst_20 {dimension_numbers = #tpu.dot_dimension_numbers<[1], [0], [0], [1], [0, 0, 1, 1], [], []>} : vector<8x4xf32>, vector<4x648xf32>, vector<8x648xf32> -> vector<8x648xf32>
    %24 = arith.addf %19, %23 : vector<8x648xf32>
    %c0_21 = arith.constant 0 : index
    %c129 = arith.constant 129 : index
    %25 = vector.load %arg1[%c0_21, %c129] : memref<4x896xf32, #tpu.memory_space<vmem>>, vector<4x648xf32>
    %c5 = arith.constant 5 : index
    %c0_22 = arith.constant 0 : index
    %c0_23 = arith.constant 0 : index
    %26 = vector.load %arg3[%c5, %c0_22, %c0_23] : memref<9x8x4xf32, #tpu.memory_space<vmem>>, vector<1x8x4xf32>
    %27 = vector.shape_cast %26 : vector<1x8x4xf32> to vector<8x4xf32>
    %cst_24 = arith.constant dense<0.000000e+00> : vector<8x648xf32>
    %28 = tpu.matmul %27, %25, %cst_24 {dimension_numbers = #tpu.dot_dimension_numbers<[1], [0], [0], [1], [0, 0, 1, 1], [], []>} : vector<8x4xf32>, vector<4x648xf32>, vector<8x648xf32> -> vector<8x648xf32>
    %29 = arith.addf %24, %28 : vector<8x648xf32>
    %c0_25 = arith.constant 0 : index
    %c145 = arith.constant 145 : index
    %30 = vector.load %arg1[%c0_25, %c145] : memref<4x896xf32, #tpu.memory_space<vmem>>, vector<4x648xf32>
    %c6 = arith.constant 6 : index
    %c0_26 = arith.constant 0 : index
    %c0_27 = arith.constant 0 : index
    %31 = vector.load %arg3[%c6, %c0_26, %c0_27] : memref<9x8x4xf32, #tpu.memory_space<vmem>>, vector<1x8x4xf32>
    %32 = vector.shape_cast %31 : vector<1x8x4xf32> to vector<8x4xf32>
    %cst_28 = arith.constant dense<0.000000e+00> : vector<8x648xf32>
    %33 = tpu.matmul %32, %30, %cst_28 {dimension_numbers = #tpu.dot_dimension_numbers<[1], [0], [0], [1], [0, 0, 1, 1], [], []>} : vector<8x4xf32>, vector<4x648xf32>, vector<8x648xf32> -> vector<8x648xf32>
    %34 = arith.addf %29, %33 : vector<8x648xf32>
    %c0_29 = arith.constant 0 : index
    %c146 = arith.constant 146 : index
    %35 = vector.load %arg1[%c0_29, %c146] : memref<4x896xf32, #tpu.memory_space<vmem>>, vector<4x648xf32>
    %c7 = arith.constant 7 : index
    %c0_30 = arith.constant 0 : index
    %c0_31 = arith.constant 0 : index
    %36 = vector.load %arg3[%c7, %c0_30, %c0_31] : memref<9x8x4xf32, #tpu.memory_space<vmem>>, vector<1x8x4xf32>
    %37 = vector.shape_cast %36 : vector<1x8x4xf32> to vector<8x4xf32>
    %cst_32 = arith.constant dense<0.000000e+00> : vector<8x648xf32>
    %38 = tpu.matmul %37, %35, %cst_32 {dimension_numbers = #tpu.dot_dimension_numbers<[1], [0], [0], [1], [0, 0, 1, 1], [], []>} : vector<8x4xf32>, vector<4x648xf32>, vector<8x648xf32> -> vector<8x648xf32>
    %39 = arith.addf %34, %38 : vector<8x648xf32>
    %c0_33 = arith.constant 0 : index
    %c147 = arith.constant 147 : index
    %40 = vector.load %arg1[%c0_33, %c147] : memref<4x896xf32, #tpu.memory_space<vmem>>, vector<4x648xf32>
    %c8 = arith.constant 8 : index
    %c0_34 = arith.constant 0 : index
    %c0_35 = arith.constant 0 : index
    %41 = vector.load %arg3[%c8, %c0_34, %c0_35] : memref<9x8x4xf32, #tpu.memory_space<vmem>>, vector<1x8x4xf32>
    %42 = vector.shape_cast %41 : vector<1x8x4xf32> to vector<8x4xf32>
    %cst_36 = arith.constant dense<0.000000e+00> : vector<8x648xf32>
    %43 = tpu.matmul %42, %40, %cst_36 {dimension_numbers = #tpu.dot_dimension_numbers<[1], [0], [0], [1], [0, 0, 1, 1], [], []>} : vector<8x4xf32>, vector<4x648xf32>, vector<8x648xf32> -> vector<8x648xf32>
    %44 = arith.addf %39, %43 : vector<8x648xf32>
    %c0_37 = arith.constant 0 : index
    %c0_38 = arith.constant 0 : index
    %45 = vector.load %arg4[%c0_37, %c0_38] : memref<8x1xf32, #tpu.memory_space<vmem>>, vector<8x1xf32>
    %46 = vector.broadcast %45 : vector<8x1xf32> to vector<8x648xf32>
    %47 = arith.addf %44, %46 : vector<8x648xf32>
    %48 = vector.broadcast %0 : vector<1x648xf32> to vector<8x648xf32>
    %49 = arith.mulf %47, %48 : vector<8x648xf32>
    %cst_39 = arith.constant 0.000000e+00 : f32
    %50 = vector.broadcast %cst_39 : f32 to vector<8x128xf32>
    %c0_40 = arith.constant 0 : index
    %c0_41 = arith.constant 0 : index
    %51 = vector.load %arg12[%c0_40, %c0_41] : memref<8x896xf32, #tpu.memory_space<vmem>>, vector<8x128xf32>
    tpu.vector_store %arg12[%c0_40, %c0_41], %50 {strides = array<i32>} : memref<8x896xf32, #tpu.memory_space<vmem>>, vector<8x128xf32>,
    %cst_42 = arith.constant 0.000000e+00 : f32
    %52 = vector.broadcast %cst_42 : f32 to vector<8x120xf32>
    %c0_43 = arith.constant 0 : index
    %c776 = arith.constant 776 : index
    %53 = vector.load %arg12[%c0_43, %c776] : memref<8x896xf32, #tpu.memory_space<vmem>>, vector<8x120xf32>
    tpu.vector_store %arg12[%c0_43, %c776], %52 {strides = array<i32>} : memref<8x896xf32, #tpu.memory_space<vmem>>, vector<8x120xf32>,
    %c0_44 = arith.constant 0 : index
    %c128_45 = arith.constant 128 : index
    %54 = vector.load %arg12[%c0_44, %c128_45] : memref<8x896xf32, #tpu.memory_space<vmem>>, vector<8x648xf32>
    tpu.vector_store %arg12[%c0_44, %c128_45], %49 {strides = array<i32>} : memref<8x896xf32, #tpu.memory_space<vmem>>, vector<8x648xf32>,
    %c0_46 = arith.constant 0 : index
    %c109_47 = arith.constant 109 : index
    %55 = vector.load %arg12[%c0_46, %c109_47] : memref<8x896xf32, #tpu.memory_space<vmem>>, vector<8x648xf32>
    %c0_48 = arith.constant 0 : index
    %c0_49 = arith.constant 0 : index
    %c0_50 = arith.constant 0 : index
    %56 = vector.load %arg5[%c0_48, %c0_49, %c0_50] : memref<9x4x8xf32, #tpu.memory_space<vmem>>, vector<1x4x8xf32>
    %57 = vector.shape_cast %56 : vector<1x4x8xf32> to vector<4x8xf32>
    %cst_51 = arith.constant dense<0.000000e+00> : vector<4x648xf32>
    %58 = tpu.matmul %57, %55, %cst_51 {dimension_numbers = #tpu.dot_dimension_numbers<[1], [0], [0], [1], [0, 0, 1, 1], [], []>} : vector<4x8xf32>, vector<8x648xf32>, vector<4x648xf32> -> vector<4x648xf32>
    %c0_52 = arith.constant 0 : index
    %c110_53 = arith.constant 110 : index
    %59 = vector.load %arg12[%c0_52, %c110_53] : memref<8x896xf32, #tpu.memory_space<vmem>>, vector<8x648xf32>
    %c1_54 = arith.constant 1 : index
    %c0_55 = arith.constant 0 : index
    %c0_56 = arith.constant 0 : index
    %60 = vector.load %arg5[%c1_54, %c0_55, %c0_56] : memref<9x4x8xf32, #tpu.memory_space<vmem>>, vector<1x4x8xf32>
    %61 = vector.shape_cast %60 : vector<1x4x8xf32> to vector<4x8xf32>
    %cst_57 = arith.constant dense<0.000000e+00> : vector<4x648xf32>
    %62 = tpu.matmul %61, %59, %cst_57 {dimension_numbers = #tpu.dot_dimension_numbers<[1], [0], [0], [1], [0, 0, 1, 1], [], []>} : vector<4x8xf32>, vector<8x648xf32>, vector<4x648xf32> -> vector<4x648xf32>
    %63 = arith.addf %58, %62 : vector<4x648xf32>
    %c0_58 = arith.constant 0 : index
    %c111_59 = arith.constant 111 : index
    %64 = vector.load %arg12[%c0_58, %c111_59] : memref<8x896xf32, #tpu.memory_space<vmem>>, vector<8x648xf32>
    %c2_60 = arith.constant 2 : index
    %c0_61 = arith.constant 0 : index
    %c0_62 = arith.constant 0 : index
    %65 = vector.load %arg5[%c2_60, %c0_61, %c0_62] : memref<9x4x8xf32, #tpu.memory_space<vmem>>, vector<1x4x8xf32>
    %66 = vector.shape_cast %65 : vector<1x4x8xf32> to vector<4x8xf32>
    %cst_63 = arith.constant dense<0.000000e+00> : vector<4x648xf32>
    %67 = tpu.matmul %66, %64, %cst_63 {dimension_numbers = #tpu.dot_dimension_numbers<[1], [0], [0], [1], [0, 0, 1, 1], [], []>} : vector<4x8xf32>, vector<8x648xf32>, vector<4x648xf32> -> vector<4x648xf32>
    %68 = arith.addf %63, %67 : vector<4x648xf32>
    %c0_64 = arith.constant 0 : index
    %c127_65 = arith.constant 127 : index
    %69 = vector.load %arg12[%c0_64, %c127_65] : memref<8x896xf32, #tpu.memory_space<vmem>>, vector<8x648xf32>
    %c3_66 = arith.constant 3 : index
    %c0_67 = arith.constant 0 : index
    %c0_68 = arith.constant 0 : index
    %70 = vector.load %arg5[%c3_66, %c0_67, %c0_68] : memref<9x4x8xf32, #tpu.memory_space<vmem>>, vector<1x4x8xf32>
    %71 = vector.shape_cast %70 : vector<1x4x8xf32> to vector<4x8xf32>
    %cst_69 = arith.constant dense<0.000000e+00> : vector<4x648xf32>
    %72 = tpu.matmul %71, %69, %cst_69 {dimension_numbers = #tpu.dot_dimension_numbers<[1], [0], [0], [1], [0, 0, 1, 1], [], []>} : vector<4x8xf32>, vector<8x648xf32>, vector<4x648xf32> -> vector<4x648xf32>
    %73 = arith.addf %68, %72 : vector<4x648xf32>
    %c0_70 = arith.constant 0 : index
    %c128_71 = arith.constant 128 : index
    %74 = vector.load %arg12[%c0_70, %c128_71] : memref<8x896xf32, #tpu.memory_space<vmem>>, vector<8x648xf32>
    %c4_72 = arith.constant 4 : index
    %c0_73 = arith.constant 0 : index
    %c0_74 = arith.constant 0 : index
    %75 = vector.load %arg5[%c4_72, %c0_73, %c0_74] : memref<9x4x8xf32, #tpu.memory_space<vmem>>, vector<1x4x8xf32>
    %76 = vector.shape_cast %75 : vector<1x4x8xf32> to vector<4x8xf32>
    %cst_75 = arith.constant dense<0.000000e+00> : vector<4x648xf32>
    %77 = tpu.matmul %76, %74, %cst_75 {dimension_numbers = #tpu.dot_dimension_numbers<[1], [0], [0], [1], [0, 0, 1, 1], [], []>} : vector<4x8xf32>, vector<8x648xf32>, vector<4x648xf32> -> vector<4x648xf32>
    %78 = arith.addf %73, %77 : vector<4x648xf32>
    %c0_76 = arith.constant 0 : index
    %c129_77 = arith.constant 129 : index
    %79 = vector.load %arg12[%c0_76, %c129_77] : memref<8x896xf32, #tpu.memory_space<vmem>>, vector<8x648xf32>
    %c5_78 = arith.constant 5 : index
    %c0_79 = arith.constant 0 : index
    %c0_80 = arith.constant 0 : index
    %80 = vector.load %arg5[%c5_78, %c0_79, %c0_80] : memref<9x4x8xf32, #tpu.memory_space<vmem>>, vector<1x4x8xf32>
    %81 = vector.shape_cast %80 : vector<1x4x8xf32> to vector<4x8xf32>
    %cst_81 = arith.constant dense<0.000000e+00> : vector<4x648xf32>
    %82 = tpu.matmul %81, %79, %cst_81 {dimension_numbers = #tpu.dot_dimension_numbers<[1], [0], [0], [1], [0, 0, 1, 1], [], []>} : vector<4x8xf32>, vector<8x648xf32>, vector<4x648xf32> -> vector<4x648xf32>
    %83 = arith.addf %78, %82 : vector<4x648xf32>
    %c0_82 = arith.constant 0 : index
    %c145_83 = arith.constant 145 : index
    %84 = vector.load %arg12[%c0_82, %c145_83] : memref<8x896xf32, #tpu.memory_space<vmem>>, vector<8x648xf32>
    %c6_84 = arith.constant 6 : index
    %c0_85 = arith.constant 0 : index
    %c0_86 = arith.constant 0 : index
    %85 = vector.load %arg5[%c6_84, %c0_85, %c0_86] : memref<9x4x8xf32, #tpu.memory_space<vmem>>, vector<1x4x8xf32>
    %86 = vector.shape_cast %85 : vector<1x4x8xf32> to vector<4x8xf32>
    %cst_87 = arith.constant dense<0.000000e+00> : vector<4x648xf32>
    %87 = tpu.matmul %86, %84, %cst_87 {dimension_numbers = #tpu.dot_dimension_numbers<[1], [0], [0], [1], [0, 0, 1, 1], [], []>} : vector<4x8xf32>, vector<8x648xf32>, vector<4x648xf32> -> vector<4x648xf32>
    %88 = arith.addf %83, %87 : vector<4x648xf32>
    %c0_88 = arith.constant 0 : index
    %c146_89 = arith.constant 146 : index
    %89 = vector.load %arg12[%c0_88, %c146_89] : memref<8x896xf32, #tpu.memory_space<vmem>>, vector<8x648xf32>
    %c7_90 = arith.constant 7 : index
    %c0_91 = arith.constant 0 : index
    %c0_92 = arith.constant 0 : index
    %90 = vector.load %arg5[%c7_90, %c0_91, %c0_92] : memref<9x4x8xf32, #tpu.memory_space<vmem>>, vector<1x4x8xf32>
    %91 = vector.shape_cast %90 : vector<1x4x8xf32> to vector<4x8xf32>
    %cst_93 = arith.constant dense<0.000000e+00> : vector<4x648xf32>
    %92 = tpu.matmul %91, %89, %cst_93 {dimension_numbers = #tpu.dot_dimension_numbers<[1], [0], [0], [1], [0, 0, 1, 1], [], []>} : vector<4x8xf32>, vector<8x648xf32>, vector<4x648xf32> -> vector<4x648xf32>
    %93 = arith.addf %88, %92 : vector<4x648xf32>
    %c0_94 = arith.constant 0 : index
    %c147_95 = arith.constant 147 : index
    %94 = vector.load %arg12[%c0_94, %c147_95] : memref<8x896xf32, #tpu.memory_space<vmem>>, vector<8x648xf32>
    %c8_96 = arith.constant 8 : index
    %c0_97 = arith.constant 0 : index
    %c0_98 = arith.constant 0 : index
    %95 = vector.load %arg5[%c8_96, %c0_97, %c0_98] : memref<9x4x8xf32, #tpu.memory_space<vmem>>, vector<1x4x8xf32>
    %96 = vector.shape_cast %95 : vector<1x4x8xf32> to vector<4x8xf32>
    %cst_99 = arith.constant dense<0.000000e+00> : vector<4x648xf32>
    %97 = tpu.matmul %96, %94, %cst_99 {dimension_numbers = #tpu.dot_dimension_numbers<[1], [0], [0], [1], [0, 0, 1, 1], [], []>} : vector<4x8xf32>, vector<8x648xf32>, vector<4x648xf32> -> vector<4x648xf32>
    %98 = arith.addf %93, %97 : vector<4x648xf32>
    %99 = vector.broadcast %0 : vector<1x648xf32> to vector<4x648xf32>
    %100 = arith.mulf %98, %99 : vector<4x648xf32>
    %cst_100 = arith.constant dense<0.000000e+00> : vector<4xf32>
    %101 = vector.multi_reduction <add>, %100, %cst_100 [1] : vector<4x648xf32> to vector<4xf32>
    %102 = vector.shape_cast %101 : vector<4xf32> to vector<4x1xf32>
    %103 = arith.mulf %100, %100 : vector<4x648xf32>
    %cst_101 = arith.constant dense<0.000000e+00> : vector<4xf32>
    %104 = vector.multi_reduction <add>, %103, %cst_101 [1] : vector<4x648xf32> to vector<4xf32>
    %105 = vector.shape_cast %104 : vector<4xf32> to vector<4x1xf32>
    %cst_102 = arith.constant 0.001953125 : f32
    %106 = vector.broadcast %cst_102 : f32 to vector<4x1xf32>
    %107 = arith.mulf %102, %106 : vector<4x1xf32>
    %cst_103 = arith.constant 0.001953125 : f32
    %108 = vector.broadcast %cst_103 : f32 to vector<4x1xf32>
    %109 = arith.mulf %105, %108 : vector<4x1xf32>
    %110 = arith.mulf %107, %107 : vector<4x1xf32>
    %111 = arith.subf %109, %110 : vector<4x1xf32>
    %c0_104 = arith.constant 0 : index
    %c0_105 = arith.constant 0 : index
    %112 = vector.load %arg6[%c0_104, %c0_105] : memref<4x1xf32, #tpu.memory_space<vmem>>, vector<4x1xf32>
    %cst_106 = arith.constant 9.99999974E-6 : f32
    %113 = vector.broadcast %cst_106 : f32 to vector<4x1xf32>
    %114 = arith.addf %111, %113 : vector<4x1xf32>
    %115 = math.rsqrt %114 : vector<4x1xf32>
    %116 = arith.mulf %112, %115 : vector<4x1xf32>
    %c0_107 = arith.constant 0 : index
    %c0_108 = arith.constant 0 : index
    %117 = vector.load %arg7[%c0_107, %c0_108] : memref<4x1xf32, #tpu.memory_space<vmem>>, vector<4x1xf32>
    %118 = arith.mulf %107, %116 : vector<4x1xf32>
    %119 = arith.subf %117, %118 : vector<4x1xf32>
    %120 = vector.broadcast %116 : vector<4x1xf32> to vector<4x648xf32>
    %121 = arith.mulf %100, %120 : vector<4x648xf32>
    %122 = vector.broadcast %119 : vector<4x1xf32> to vector<4x648xf32>
    %123 = arith.addf %121, %122 : vector<4x648xf32>
    %cst_109 = arith.constant 0.000000e+00 : f32
    %124 = vector.broadcast %cst_109 : f32 to vector<4x648xf32>
    %125 = arith.maximumf %123, %124 : vector<4x648xf32>
    %126 = vector.broadcast %0 : vector<1x648xf32> to vector<4x648xf32>
    %127 = arith.mulf %125, %126 : vector<4x648xf32>
    %cst_110 = arith.constant 0.000000e+00 : f32
    %128 = vector.broadcast %cst_110 : f32 to vector<4x128xf32>
    %c0_111 = arith.constant 0 : index
    %c0_112 = arith.constant 0 : index
    %129 = vector.load %arg13[%c0_111, %c0_112] : memref<4x896xf32, #tpu.memory_space<vmem>>, vector<4x128xf32>
    tpu.vector_store %arg13[%c0_111, %c0_112], %128 {strides = array<i32>} : memref<4x896xf32, #tpu.memory_space<vmem>>, vector<4x128xf32>,
    %cst_113 = arith.constant 0.000000e+00 : f32
    %130 = vector.broadcast %cst_113 : f32 to vector<4x120xf32>
    %c0_114 = arith.constant 0 : index
    %c776_115 = arith.constant 776 : index
    %131 = vector.load %arg13[%c0_114, %c776_115] : memref<4x896xf32, #tpu.memory_space<vmem>>, vector<4x120xf32>
    tpu.vector_store %arg13[%c0_114, %c776_115], %130 {strides = array<i32>} : memref<4x896xf32, #tpu.memory_space<vmem>>, vector<4x120xf32>,
    %c0_116 = arith.constant 0 : index
    %c128_117 = arith.constant 128 : index
    %132 = vector.load %arg13[%c0_116, %c128_117] : memref<4x896xf32, #tpu.memory_space<vmem>>, vector<4x648xf32>
    tpu.vector_store %arg13[%c0_116, %c128_117], %127 {strides = array<i32>} : memref<4x896xf32, #tpu.memory_space<vmem>>, vector<4x648xf32>,
    %c0_118 = arith.constant 0 : index
    %c109_119 = arith.constant 109 : index
    %133 = vector.load %arg13[%c0_118, %c109_119] : memref<4x896xf32, #tpu.memory_space<vmem>>, vector<4x648xf32>
    %c0_120 = arith.constant 0 : index
    %c0_121 = arith.constant 0 : index
    %c0_122 = arith.constant 0 : index
    %134 = vector.load %arg8[%c0_120, %c0_121, %c0_122] : memref<9x8x4xf32, #tpu.memory_space<vmem>>, vector<1x8x4xf32>
    %135 = vector.shape_cast %134 : vector<1x8x4xf32> to vector<8x4xf32>
    %cst_123 = arith.constant dense<0.000000e+00> : vector<8x648xf32>
    %136 = tpu.matmul %135, %133, %cst_123 {dimension_numbers = #tpu.dot_dimension_numbers<[1], [0], [0], [1], [0, 0, 1, 1], [], []>} : vector<8x4xf32>, vector<4x648xf32>, vector<8x648xf32> -> vector<8x648xf32>
    %c0_124 = arith.constant 0 : index
    %c110_125 = arith.constant 110 : index
    %137 = vector.load %arg13[%c0_124, %c110_125] : memref<4x896xf32, #tpu.memory_space<vmem>>, vector<4x648xf32>
    %c1_126 = arith.constant 1 : index
    %c0_127 = arith.constant 0 : index
    %c0_128 = arith.constant 0 : index
    %138 = vector.load %arg8[%c1_126, %c0_127, %c0_128] : memref<9x8x4xf32, #tpu.memory_space<vmem>>, vector<1x8x4xf32>
    %139 = vector.shape_cast %138 : vector<1x8x4xf32> to vector<8x4xf32>
    %cst_129 = arith.constant dense<0.000000e+00> : vector<8x648xf32>
    %140 = tpu.matmul %139, %137, %cst_129 {dimension_numbers = #tpu.dot_dimension_numbers<[1], [0], [0], [1], [0, 0, 1, 1], [], []>} : vector<8x4xf32>, vector<4x648xf32>, vector<8x648xf32> -> vector<8x648xf32>
    %141 = arith.addf %136, %140 : vector<8x648xf32>
    %c0_130 = arith.constant 0 : index
    %c111_131 = arith.constant 111 : index
    %142 = vector.load %arg13[%c0_130, %c111_131] : memref<4x896xf32, #tpu.memory_space<vmem>>, vector<4x648xf32>
    %c2_132 = arith.constant 2 : index
    %c0_133 = arith.constant 0 : index
    %c0_134 = arith.constant 0 : index
    %143 = vector.load %arg8[%c2_132, %c0_133, %c0_134] : memref<9x8x4xf32, #tpu.memory_space<vmem>>, vector<1x8x4xf32>
    %144 = vector.shape_cast %143 : vector<1x8x4xf32> to vector<8x4xf32>
    %cst_135 = arith.constant dense<0.000000e+00> : vector<8x648xf32>
    %145 = tpu.matmul %144, %142, %cst_135 {dimension_numbers = #tpu.dot_dimension_numbers<[1], [0], [0], [1], [0, 0, 1, 1], [], []>} : vector<8x4xf32>, vector<4x648xf32>, vector<8x648xf32> -> vector<8x648xf32>
    %146 = arith.addf %141, %145 : vector<8x648xf32>
    %c0_136 = arith.constant 0 : index
    %c127_137 = arith.constant 127 : index
    %147 = vector.load %arg13[%c0_136, %c127_137] : memref<4x896xf32, #tpu.memory_space<vmem>>, vector<4x648xf32>
    %c3_138 = arith.constant 3 : index
    %c0_139 = arith.constant 0 : index
    %c0_140 = arith.constant 0 : index
    %148 = vector.load %arg8[%c3_138, %c0_139, %c0_140] : memref<9x8x4xf32, #tpu.memory_space<vmem>>, vector<1x8x4xf32>
    %149 = vector.shape_cast %148 : vector<1x8x4xf32> to vector<8x4xf32>
    %cst_141 = arith.constant dense<0.000000e+00> : vector<8x648xf32>
    %150 = tpu.matmul %149, %147, %cst_141 {dimension_numbers = #tpu.dot_dimension_numbers<[1], [0], [0], [1], [0, 0, 1, 1], [], []>} : vector<8x4xf32>, vector<4x648xf32>, vector<8x648xf32> -> vector<8x648xf32>
    %151 = arith.addf %146, %150 : vector<8x648xf32>
    %c0_142 = arith.constant 0 : index
    %c128_143 = arith.constant 128 : index
    %152 = vector.load %arg13[%c0_142, %c128_143] : memref<4x896xf32, #tpu.memory_space<vmem>>, vector<4x648xf32>
    %c4_144 = arith.constant 4 : index
    %c0_145 = arith.constant 0 : index
    %c0_146 = arith.constant 0 : index
    %153 = vector.load %arg8[%c4_144, %c0_145, %c0_146] : memref<9x8x4xf32, #tpu.memory_space<vmem>>, vector<1x8x4xf32>
    %154 = vector.shape_cast %153 : vector<1x8x4xf32> to vector<8x4xf32>
    %cst_147 = arith.constant dense<0.000000e+00> : vector<8x648xf32>
    %155 = tpu.matmul %154, %152, %cst_147 {dimension_numbers = #tpu.dot_dimension_numbers<[1], [0], [0], [1], [0, 0, 1, 1], [], []>} : vector<8x4xf32>, vector<4x648xf32>, vector<8x648xf32> -> vector<8x648xf32>
    %156 = arith.addf %151, %155 : vector<8x648xf32>
    %c0_148 = arith.constant 0 : index
    %c129_149 = arith.constant 129 : index
    %157 = vector.load %arg13[%c0_148, %c129_149] : memref<4x896xf32, #tpu.memory_space<vmem>>, vector<4x648xf32>
    %c5_150 = arith.constant 5 : index
    %c0_151 = arith.constant 0 : index
    %c0_152 = arith.constant 0 : index
    %158 = vector.load %arg8[%c5_150, %c0_151, %c0_152] : memref<9x8x4xf32, #tpu.memory_space<vmem>>, vector<1x8x4xf32>
    %159 = vector.shape_cast %158 : vector<1x8x4xf32> to vector<8x4xf32>
    %cst_153 = arith.constant dense<0.000000e+00> : vector<8x648xf32>
    %160 = tpu.matmul %159, %157, %cst_153 {dimension_numbers = #tpu.dot_dimension_numbers<[1], [0], [0], [1], [0, 0, 1, 1], [], []>} : vector<8x4xf32>, vector<4x648xf32>, vector<8x648xf32> -> vector<8x648xf32>
    %161 = arith.addf %156, %160 : vector<8x648xf32>
    %c0_154 = arith.constant 0 : index
    %c145_155 = arith.constant 145 : index
    %162 = vector.load %arg13[%c0_154, %c145_155] : memref<4x896xf32, #tpu.memory_space<vmem>>, vector<4x648xf32>
    %c6_156 = arith.constant 6 : index
    %c0_157 = arith.constant 0 : index
    %c0_158 = arith.constant 0 : index
    %163 = vector.load %arg8[%c6_156, %c0_157, %c0_158] : memref<9x8x4xf32, #tpu.memory_space<vmem>>, vector<1x8x4xf32>
    %164 = vector.shape_cast %163 : vector<1x8x4xf32> to vector<8x4xf32>
    %cst_159 = arith.constant dense<0.000000e+00> : vector<8x648xf32>
    %165 = tpu.matmul %164, %162, %cst_159 {dimension_numbers = #tpu.dot_dimension_numbers<[1], [0], [0], [1], [0, 0, 1, 1], [], []>} : vector<8x4xf32>, vector<4x648xf32>, vector<8x648xf32> -> vector<8x648xf32>
    %166 = arith.addf %161, %165 : vector<8x648xf32>
    %c0_160 = arith.constant 0 : index
    %c146_161 = arith.constant 146 : index
    %167 = vector.load %arg13[%c0_160, %c146_161] : memref<4x896xf32, #tpu.memory_space<vmem>>, vector<4x648xf32>
    %c7_162 = arith.constant 7 : index
    %c0_163 = arith.constant 0 : index
    %c0_164 = arith.constant 0 : index
    %168 = vector.load %arg8[%c7_162, %c0_163, %c0_164] : memref<9x8x4xf32, #tpu.memory_space<vmem>>, vector<1x8x4xf32>
    %169 = vector.shape_cast %168 : vector<1x8x4xf32> to vector<8x4xf32>
    %cst_165 = arith.constant dense<0.000000e+00> : vector<8x648xf32>
    %170 = tpu.matmul %169, %167, %cst_165 {dimension_numbers = #tpu.dot_dimension_numbers<[1], [0], [0], [1], [0, 0, 1, 1], [], []>} : vector<8x4xf32>, vector<4x648xf32>, vector<8x648xf32> -> vector<8x648xf32>
    %171 = arith.addf %166, %170 : vector<8x648xf32>
    %c0_166 = arith.constant 0 : index
    %c147_167 = arith.constant 147 : index
    %172 = vector.load %arg13[%c0_166, %c147_167] : memref<4x896xf32, #tpu.memory_space<vmem>>, vector<4x648xf32>
    %c8_168 = arith.constant 8 : index
    %c0_169 = arith.constant 0 : index
    %c0_170 = arith.constant 0 : index
    %173 = vector.load %arg8[%c8_168, %c0_169, %c0_170] : memref<9x8x4xf32, #tpu.memory_space<vmem>>, vector<1x8x4xf32>
    %174 = vector.shape_cast %173 : vector<1x8x4xf32> to vector<8x4xf32>
    %cst_171 = arith.constant dense<0.000000e+00> : vector<8x648xf32>
    %175 = tpu.matmul %174, %172, %cst_171 {dimension_numbers = #tpu.dot_dimension_numbers<[1], [0], [0], [1], [0, 0, 1, 1], [], []>} : vector<8x4xf32>, vector<4x648xf32>, vector<8x648xf32> -> vector<8x648xf32>
    %176 = arith.addf %171, %175 : vector<8x648xf32>
    %177 = vector.broadcast %0 : vector<1x648xf32> to vector<8x648xf32>
    %178 = arith.mulf %176, %177 : vector<8x648xf32>
    %cst_172 = arith.constant dense<0.000000e+00> : vector<8xf32>
    %179 = vector.multi_reduction <add>, %178, %cst_172 [1] : vector<8x648xf32> to vector<8xf32>
    %180 = vector.shape_cast %179 : vector<8xf32> to vector<8x1xf32>
    %181 = arith.mulf %178, %178 : vector<8x648xf32>
    %cst_173 = arith.constant dense<0.000000e+00> : vector<8xf32>
    %182 = vector.multi_reduction <add>, %181, %cst_173 [1] : vector<8x648xf32> to vector<8xf32>
    %183 = vector.shape_cast %182 : vector<8xf32> to vector<8x1xf32>
    %cst_174 = arith.constant 0.001953125 : f32
    %184 = vector.broadcast %cst_174 : f32 to vector<8x1xf32>
    %185 = arith.mulf %180, %184 : vector<8x1xf32>
    %cst_175 = arith.constant 0.001953125 : f32
    %186 = vector.broadcast %cst_175 : f32 to vector<8x1xf32>
    %187 = arith.mulf %183, %186 : vector<8x1xf32>
    %188 = arith.mulf %185, %185 : vector<8x1xf32>
    %189 = arith.subf %187, %188 : vector<8x1xf32>
    %c0_176 = arith.constant 0 : index
    %c0_177 = arith.constant 0 : index
    %190 = vector.load %arg9[%c0_176, %c0_177] : memref<8x1xf32, #tpu.memory_space<vmem>>, vector<8x1xf32>
    %cst_178 = arith.constant 9.99999974E-6 : f32
    %191 = vector.broadcast %cst_178 : f32 to vector<8x1xf32>
    %192 = arith.addf %189, %191 : vector<8x1xf32>
    %193 = math.rsqrt %192 : vector<8x1xf32>
    %194 = arith.mulf %190, %193 : vector<8x1xf32>
    %c0_179 = arith.constant 0 : index
    %c0_180 = arith.constant 0 : index
    %195 = vector.load %arg10[%c0_179, %c0_180] : memref<8x1xf32, #tpu.memory_space<vmem>>, vector<8x1xf32>
    %196 = arith.mulf %185, %194 : vector<8x1xf32>
    %197 = arith.subf %195, %196 : vector<8x1xf32>
    %198 = vector.broadcast %194 : vector<8x1xf32> to vector<8x648xf32>
    %199 = arith.mulf %178, %198 : vector<8x648xf32>
    %200 = vector.broadcast %197 : vector<8x1xf32> to vector<8x648xf32>
    %201 = arith.addf %199, %200 : vector<8x648xf32>
    %cst_181 = arith.constant 0.000000e+00 : f32
    %202 = vector.broadcast %cst_181 : f32 to vector<8x648xf32>
    %203 = arith.maximumf %201, %202 : vector<8x648xf32>
    %204 = vector.broadcast %0 : vector<1x648xf32> to vector<8x648xf32>
    %205 = arith.mulf %203, %204 : vector<8x648xf32>
    %206 = arith.addf %205, %49 : vector<8x648xf32>
    %c0_182 = arith.constant 0 : index
    %c0_183 = arith.constant 0 : index
    %207 = vector.load %arg11[%c0_182, %c0_183] : memref<8x648xf32, #tpu.memory_space<vmem>>, vector<8x648xf32>
    tpu.vector_store %arg11[%c0_182, %c0_183], %206 {strides = array<i32>} : memref<8x648xf32, #tpu.memory_space<vmem>>, vector<8x648xf32>,
    return
  }
  func.func @transform_0(%arg0: i32) -> (i32, i32) {
    %c0_i32 = arith.constant 0 : i32
    %c0_i32_0 = arith.constant 0 : i32
    %c0_i32_1 = arith.constant 0 : i32
    return %c0_i32, %c0_i32_0 : i32, i32
  }
  func.func @transform_1(%arg0: i32) -> (i32, i32) {
    %c0_i32 = arith.constant 0 : i32
    %c0_i32_0 = arith.constant 0 : i32
    %c0_i32_1 = arith.constant 0 : i32
    return %c0_i32, %c0_i32_0 : i32, i32
  }
  func.func @transform_2(%arg0: i32) -> (i32, i32, i32) {
    %c0_i32 = arith.constant 0 : i32
    %c0_i32_0 = arith.constant 0 : i32
    %c0_i32_1 = arith.constant 0 : i32
    %c0_i32_2 = arith.constant 0 : i32
    return %c0_i32, %c0_i32_0, %c0_i32_1 : i32, i32, i32
  }
  func.func @transform_3(%arg0: i32) -> (i32, i32) {
    %c0_i32 = arith.constant 0 : i32
    %c0_i32_0 = arith.constant 0 : i32
    %c0_i32_1 = arith.constant 0 : i32
    return %c0_i32, %c0_i32_0 : i32, i32
  }
  func.func @transform_4(%arg0: i32) -> (i32, i32, i32) {
    %c0_i32 = arith.constant 0 : i32
    %c0_i32_0 = arith.constant 0 : i32
    %c0_i32_1 = arith.constant 0 : i32
    %c0_i32_2 = arith.constant 0 : i32
    return %c0_i32, %c0_i32_0, %c0_i32_1 : i32, i32, i32
  }
  func.func @transform_5(%arg0: i32) -> (i32, i32) {
    %c0_i32 = arith.constant 0 : i32
    %c0_i32_0 = arith.constant 0 : i32
    %c0_i32_1 = arith.constant 0 : i32
    return %c0_i32, %c0_i32_0 : i32, i32
  }
  func.func @transform_6(%arg0: i32) -> (i32, i32) {
    %c0_i32 = arith.constant 0 : i32
    %c0_i32_0 = arith.constant 0 : i32
    %c0_i32_1 = arith.constant 0 : i32
    return %c0_i32, %c0_i32_0 : i32, i32
  }
  func.func @transform_7(%arg0: i32) -> (i32, i32, i32) {
    %c0_i32 = arith.constant 0 : i32
    %c0_i32_0 = arith.constant 0 : i32
    %c0_i32_1 = arith.constant 0 : i32
    %c0_i32_2 = arith.constant 0 : i32
    return %c0_i32, %c0_i32_0, %c0_i32_1 : i32, i32, i32
  }
  func.func @transform_8(%arg0: i32) -> (i32, i32) {
    %c0_i32 = arith.constant 0 : i32
    %c0_i32_0 = arith.constant 0 : i32
    %c0_i32_1 = arith.constant 0 : i32
    return %c0_i32, %c0_i32_0 : i32, i32
  }
  func.func @transform_9(%arg0: i32) -> (i32, i32) {
    %c0_i32 = arith.constant 0 : i32
    %c0_i32_0 = arith.constant 0 : i32
    %c0_i32_1 = arith.constant 0 : i32
    return %c0_i32, %c0_i32_0 : i32, i32
  }
  func.func @transform_10(%arg0: i32) -> (i32, i32) {
    %c0_i32 = arith.constant 0 : i32
    %c0_i32_0 = arith.constant 0 : i32
    %c0_i32_1 = arith.constant 0 : i32
    return %c0_i32, %c0_i32_0 : i32, i32
  }
}

</mosaic_0001>

<bundles_post_ra>
// kernel: tile.6
= control target key start
LH: loop header
LB: loop body
LE: loop exit
PB: predicated region body
PF: predicated region fallthrough
CT: control target
= control target key end

     0   :  { %s64_s0 = inlined_call_operand.vmem [shape: f32[18,18], index: 0, kind: input, shape index: {}]   ;;  %s65_s1 = inlined_call_operand.vmem [shape: f32[2,1,1,18,1,18], index: 1, kind: output, shape index: {}]  }
   0x1   :  { %v4_v0 = vld [vmem:[%s64_s0] sm:$0xff]  ;;  %v21_v1 = vld [vmem:[%s64_s0 + $0x8] sm:$0xff]  ;;  %v24_v2 = vld [vmem:[%s64_s0 + $0x10] sm:$0xff] }
   0x2   :  { %5 = vst [vmem:[%s65_s1] sm:$0xff] %v4_v0  ;;  %20 = vst [vmem:[%s65_s1 + $0x18] sm:$0xff] %v4_v0 }
   0x3   :  { %22 = vst [vmem:[%s65_s1 + $0x8] sm:$0xff] %v21_v1  ;;  %23 = vst [vmem:[%s65_s1 + $0x20] sm:$0xff] %v21_v1 }
   0x4   :  { %25 = vst [vmem:[%s65_s1 + $0x10] sm:$0xff] %v24_v2  ;;  %26 = vst [vmem:[%s65_s1 + $0x28] sm:$0xff] %v24_v2 }

// kernel: tile.7
= control target key start
LH: loop header
LB: loop body
LE: loop exit
PB: predicated region body
PF: predicated region fallthrough
CT: control target
= control target key end

     0   :  { %vm9_vm0 = vcmask 15360   ;;  %vm36_vm1 = vcmask 48128   ;;  %s404_s14 = smov 126   ;;  %vm22_vm2 = vcmask 31744   ;;  %s405_s19 = smov 122   ;;  %vm50_vm3 = vcmask 64512   ;;  %s594_s0 = inlined_call_operand.vmem [shape: f32[2,1,1,18,1,18], index: 0, kind: input, shape index: {}]   ;;  %s595_s1 = inlined_call_operand.vmem [shape: f32[1,648], index: 1, kind: output, shape index: {}]  }
   0x1   :  { %v324_v0 = vld [vmem:[%s594_s0 + $0x7] sm:$0x1]   ;;  %v328_v3 = vld [vmem:[%s594_s0 + $0x1b] sm:$0x1]   ;;  %v326_v6 = vld [vmem:[%s594_s0 + $0xe] sm:$0x1]  }
   0x2   :  { %v325_v1 = vld [vmem:[%s594_s0 + $0x7] sm:$0x1]   ;;  %v329_v4 = vld [vmem:[%s594_s0 + $0x1b] sm:$0x1]   ;;  %v327_v7 = vld [vmem:[%s594_s0 + $0xe] sm:$0x1]  }
   0x3   :  { %v10_v2 = vsel %vm9_vm0, %v325_v1, %v324_v0  ;;  %v37_v5 = vsel %vm36_vm1, %v329_v4, %v328_v3  ;;  %v23_v8 = vsel %vm22_vm2, %v327_v7, %v326_v6  ;;  %v330_v9 = vld [vmem:[%s594_s0 + $0x22] sm:$0x1]   ;;  %vm54_vm4 = vcmask 80896   ;;  %v332_v12 = vld [vmem:[%s594_s0 + $0x29] sm:$0x1]   ;;  %s406_s28 = smov 124  }
   0x4   :  { %11 = vrot.lane.b32.xlu0 %v10_v2, %s404_s14  ;;  %38 = vrot.lane.b32.xlu1 %v37_v5, %s405_s19  ;;  %v331_v10 = vld [vmem:[%s594_s0 + $0x22] sm:$0x1]   ;;  %v333_v13 = vld [vmem:[%s594_s0 + $0x29] sm:$0x1]   ;;  %s407_s29 = smov 120   ;;  %s408_s3 = smov 118  }
   0x5   :  { %v51_v11 = vsel %vm50_vm3, %v331_v10, %v330_v9  ;;  %v65_v14 = vsel %vm54_vm4, %v333_v13, %v332_v12  ;;  %v334_v15 = vld [vmem:[%s594_s0 + $0x6] sm:$0x1]   ;;  %s409_s4 = smov 108   ;;  %v335_v16 = vld [vmem:[%s594_s0 + $0xd] sm:$0x1]   ;;  %s410_s9 = smov 106  }
   0x6   :  { %v336_v17 = vld [vmem:[%s594_s0 + $0x1a] sm:$0x1]   ;;  %s411_s10 = smov 104   ;;  %v337_v18 = vld [vmem:[%s594_s0 + $0x21] sm:$0x1]   ;;  %s412_s15 = smov 102  }
   0x7   :  { %v338_v19 = vld [vmem:[%s594_s0 + $0x28] sm:$0x1]   ;;  %s413_s16 = smov 100   ;;  %v339_v20 = vld [vmem:[%s594_s0 + $0x5] sm:$0x1]   ;;  %vm3_vm5 = vcmask 146432  }
   0x8   :  { %24 = vrot.lane.b32.xlu0 %v23_v8, %s406_s28  ;;  %52 = vrot.lane.b32.xlu1 %v51_v11, %s407_s29  ;;  %v340_v21 = vld [vmem:[%s594_s0 + $0xc] sm:$0x1]   ;;  %v2_v22 = vld [vmem:[%s594_s0] sm:$0x1]   ;;  %s414_s23 = smov 90   ;;  %s415_s24 = smov 88  }
   0x9   :  { %4 = vst.msk [vmem:[#allocation0] sm:$0x1] %vm3_vm5, %v2_v22   ;;  %v341_v23 = vld [vmem:[%s594_s0 + $0x19] sm:$0x1]   ;;  %v342_v24 = vld [vmem:[%s594_s0 + $0x20] sm:$0x1]  }
   0xa   :  { %s416_s29 = smov 86   ;;  %s417_s30 = smov 84   ;;  %v343_v25 = vld [vmem:[%s594_s0 + $0x27] sm:$0x1]   ;;  %v344_v26 = vld [vmem:[%s594_s0 + $0x4] sm:$0x1]  }
   0xb   :  { %s418_s6 = smov 82   ;;  %s419_s7 = smov 72   ;;  %v345_v27 = vld [vmem:[%s594_s0 + $0xb] sm:$0x1]   ;;  %v346_v28 = vld [vmem:[%s594_s0 + $0x18] sm:$0x1]  }
   0xc   :  { %66 = vrot.lane.b32.xlu0 %v65_v14, %s408_s3  ;;  %76 = vrot.lane.b32.xlu1 %v334_v15, %s409_s4  ;;  %s420_s12 = smov 70   ;;  %s421_s13 = smov 68   ;;  %v347_v29 = vld [vmem:[%s594_s0 + $0x1f] sm:$0x1]   ;;  %v348_v30 = vld [vmem:[%s594_s0 + $0x26] sm:$0x1]  }
   0xd   :  { %s422_s18 = smov 66   ;;  %s423_s19 = smov 64   ;;  %v349_v31 = vld [vmem:[%s594_s0 + $0x3] sm:$0x1]   ;;  %v350_v32 = vld [vmem:[%s594_s0 + $0xa] sm:$0x1]  }
   0xe   :  { %s425_s25 = smov 52   ;;  %v351_v33 = vld [vmem:[%s594_s0 + $0x11] sm:$0x1]   ;;  %v352_v34 = vld [vmem:[%s594_s0 + $0x1e] sm:$0x1]   ;;  %s427_s2 = smov 48  }
   0xf   :  { %v353_v35 = vld [vmem:[%s594_s0 + $0x25] sm:$0x1]   ;;  %v354_v36 = vld [vmem:[%s594_s0 + $0x2] sm:$0x1]   ;;  %s429_s8 = smov 36   ;;  %s431_s14 = smov 32  }
  0x10   :  { %82 = vrot.lane.b32.xlu0 %v335_v16, %s410_s9  ;;  %89 = vrot.lane.b32.xlu1 %v336_v17, %s411_s10  ;;  %v355_v37 = vld [vmem:[%s594_s0 + $0x9] sm:$0x1]   ;;  %v356_v38 = vld [vmem:[%s594_s0 + $0x10] sm:$0x1]   ;;  %s433_s20 = smov 28   ;;  %s435_s26 = smov 16  }
  0x11   :  { %v357_v39 = vld [vmem:[%s594_s0 + $0x1d] sm:$0x1]   ;;  %v358_v40 = vld [vmem:[%s594_s0 + $0x24] sm:$0x1]   ;;  %v359_v41 = vld [vmem:[%s594_s0 + $0x1] sm:$0x1]  }
  0x12   :  { %v360_v42 = vld [vmem:[%s594_s0 + $0x8] sm:$0x1]   ;;  %v361_v43 = vld [vmem:[%s594_s0 + $0xf] sm:$0x1]   ;;  %v362_v44 = vld [vmem:[%s594_s0 + $0x1c] sm:$0x1]  }
  0x13   :  { %s437_s3 = smov 12   ;;  %v363_v45 = vld [vmem:[%s594_s0 + $0x23] sm:$0x1]   ;;  %s438_s0 = smov 10   ;;  %vm13_vm6 = vcmask 130048   ;;  %vm16_vm7 = vcmask 1048560  }
  0x14   :  { %96 = vrot.lane.b32.xlu0 %v337_v18, %s412_s15  ;;  %103 = vrot.lane.b32.xlu1 %v338_v19, %s413_s16  ;;  %vm40_vm8 = vcmask 97280   ;;  %vm26_vm9 = vcmask 113664   ;;  %vm29_vm10 = vcmask 1048544   ;;  %vm43_vm11 = vcmask 1048528  }
  0x15   :  { %vm57_vm12 = vcmask 1048512   ;;  %vm71_vm13 = vcmask 1048496   ;;  %vm78_vm14 = vcmask 1032032   ;;  %vm84_vm15 = vcmask 1015632  }
  0x16   :  { %vm91_vm0 = vcmask 999232   ;;  %vm98_vm1 = vcmask 982832   ;;  %vm105_vm2 = vcmask 966432   ;;  %vm125_vm5 = vcmask 851632  }
  0x18   :  { %110 = vrot.lane.b32.xlu0 %v339_v20, %s414_s23  ;;  %116 = vrot.lane.b32.xlu1 %v340_v21, %s415_s24  ;;  %s424_s24 = smov 54  }
  0x1c   :  { %123 = vrot.lane.b32.xlu0 %v341_v23, %s416_s29  ;;  %130 = vrot.lane.b32.xlu1 %v342_v24, %s417_s30  ;;  %s426_s30 = smov 50  }
  0x20   :  { %137 = vrot.lane.b32.xlu0 %v343_v25, %s418_s6  ;;  %144 = vrot.lane.b32.xlu1 %v344_v26, %s419_s7  ;;  %s428_s7 = smov 46  }
  0x24   :  { %150 = vrot.lane.b32.xlu0 %v345_v27, %s420_s12  ;;  %157 = vrot.lane.b32.xlu1 %v346_v28, %s421_s13  ;;  %s430_s13 = smov 34  }
  0x28   :  { %164 = vrot.lane.b32.xlu0 %v347_v29, %s422_s18  ;;  %171 = vrot.lane.b32.xlu1 %v348_v30, %s423_s19  ;;  %s432_s19 = smov 30  }
  0x2c   :  { %178 = vrot.lane.b32.xlu0 %v349_v31, %s424_s24  ;;  %184 = vrot.lane.b32.xlu1 %v350_v32, %s425_s25  ;;  %s434_s25 = smov 18  }
  0x30   :  { %191 = vrot.lane.b32.xlu0 %v351_v33, %s426_s30  ;;  %198 = vrot.lane.b32.xlu1 %v352_v34, %s427_s2  ;;  %s436_s2 = smov 14  }
  0x34   :  { %205 = vrot.lane.b32.xlu0 %v353_v35, %s428_s7  ;;  %212 = vrot.lane.b32.xlu1 %v354_v36, %s429_s8 }
  0x38   :  { %218 = vrot.lane.b32.xlu0 %v355_v37, %s430_s13  ;;  %225 = vrot.lane.b32.xlu1 %v356_v38, %s431_s14 }
  0x3c   :  { %232 = vrot.lane.b32.xlu0 %v357_v39, %s432_s19  ;;  %239 = vrot.lane.b32.xlu1 %v358_v40, %s433_s20 }
  0x40   :  { %246 = vrot.lane.b32.xlu0 %v359_v41, %s434_s25  ;;  %252 = vrot.lane.b32.xlu1 %v360_v42, %s435_s26 }
  0x44   :  { %259 = vrot.lane.b32.xlu0 %v361_v43, %s436_s2  ;;  %266 = vrot.lane.b32.xlu1 %v362_v44, %s437_s3 }
  0x48   :  { %273 = vrot.lane.b32.xlu0 %v363_v45, %s438_s0 }
  0x76   :  { %v12_v46 = vpop.permute.xlu0 %11   ;;  %v39_v47 = vpop.permute.xlu1 %38  }
  0x77   :  { %15 = vst.msk [vmem:[#allocation0 + $0x8] sm:$0x1] %vm13_vm6, %v12_v46   ;;  %vm132_vm6 = vcmask 835232  }
  0x78   :  { %17 = vst.msk [vmem:[#allocation0] sm:$0x1] %vm16_vm7, %v12_v46   ;;  %vm139_vm7 = vcmask 818832  }
  0x79   :  { %42 = vst.msk [vmem:[#allocation0 + $0x18] sm:$0x1] %vm40_vm8, %v39_v47   ;;  %vm146_vm8 = vcmask 736832  }
  0x7a   :  { %v25_v48 = vpop.permute.xlu0 %24   ;;  %v53_v49 = vpop.permute.xlu1 %52  }
  0x7b   :  { %28 = vst.msk [vmem:[#allocation0 + $0x10] sm:$0x1] %vm26_vm9, %v25_v48   ;;  %vm152_vm9 = vcmask 720432  }
  0x7c   :  { %31 = vst.msk [vmem:[#allocation0 + $0x8] sm:$0x1] %vm29_vm10, %v25_v48   ;;  %vm159_vm10 = vcmask 704032  }
  0x7d   :  { %45 = vst.msk [vmem:[#allocation0 + $0x10] sm:$0x1] %vm43_vm11, %v39_v47   ;;  %vm166_vm11 = vcmask 687632  }
  0x7e   :  { %56 = vst.msk [vmem:[#allocation0 + $0x20] sm:$0x1] %vm54_vm4, %v53_v49   ;;  %v67_v50 = vpop.permute.xlu0 %66   ;;  %v77_v51 = vpop.permute.xlu1 %76   ;;  %vm118_vm4 = vcmask 868032  }
  0x7f   :  { %59 = vst.msk [vmem:[#allocation0 + $0x18] sm:$0x1] %vm57_vm12, %v53_v49   ;;  %vm173_vm12 = vcmask 671232  }
  0x80   :  { %70 = vst.msk [vmem:[#allocation0 + $0x28] sm:$0x1] %vm50_vm3, %v67_v50   ;;  %vm112_vm3 = vcmask 884432  }
  0x81   :  { %73 = vst.msk [vmem:[#allocation0 + $0x20] sm:$0x1] %vm71_vm13, %v67_v50   ;;  %vm180_vm13 = vcmask 589232  }
  0x82   :  { %79 = vst.msk [vmem:[#allocation0] sm:$0x1] %vm78_vm14, %v77_v51   ;;  %v83_v52 = vpop.permute.xlu0 %82   ;;  %v90_v53 = vpop.permute.xlu1 %89   ;;  %vm186_vm14 = vcmask 572832  }
  0x83   :  { %86 = vst.msk [vmem:[#allocation0 + $0x8] sm:$0x1] %vm84_vm15, %v83_v52   ;;  %vm193_vm15 = vcmask 556432  }
  0x84   :  { %93 = vst.msk [vmem:[#allocation0 + $0x10] sm:$0x1] %vm91_vm0, %v90_v53   ;;  %vm200_vm0 = vcmask 540032  }
  0x86   :  { %v97_v55 = vpop.permute.xlu0 %96   ;;  %v104_v56 = vpop.permute.xlu1 %103  }
  0x87   :  { %v314_v54 = vld [vmem:[#allocation0 + $0x28] sm:$0x1]  ;;  %100 = vst.msk [vmem:[#allocation0 + $0x18] sm:$0x1] %vm98_vm1, %v97_v55   ;;  %vm207_vm1 = vcmask 523632  }
  0x88   :  { %368 = vst [vmem:[%s595_s1 + $0x5] sm:$0x1] %v314_v54  ;;  %107 = vst.msk [vmem:[#allocation0 + $0x20] sm:$0x1] %vm105_vm2, %v104_v56   ;;  %vm214_vm2 = vcmask 441632  }
  0x8a   :  { %v111_v57 = vpop.permute.xlu0 %110   ;;  %v117_v58 = vpop.permute.xlu1 %116  }
  0x8b   :  { %113 = vst.msk [vmem:[#allocation0] sm:$0x1] %vm112_vm3, %v111_v57   ;;  %vm220_vm3 = vcmask 425232  }
  0x8c   :  { %120 = vst.msk [vmem:[#allocation0 + $0x8] sm:$0x1] %vm118_vm4, %v117_v58   ;;  %vm227_vm4 = vcmask 408832  }
  0x8e   :  { %v124_v59 = vpop.permute.xlu0 %123   ;;  %v131_v60 = vpop.permute.xlu1 %130  }
  0x8f   :  { %127 = vst.msk [vmem:[#allocation0 + $0x10] sm:$0x1] %vm125_vm5, %v124_v59   ;;  %vm234_vm5 = vcmask 392432  }
  0x90   :  { %134 = vst.msk [vmem:[#allocation0 + $0x18] sm:$0x1] %vm132_vm6, %v131_v60   ;;  %vm241_vm6 = vcmask 376032  }
  0x92   :  { %v138_v61 = vpop.permute.xlu0 %137   ;;  %v145_v62 = vpop.permute.xlu1 %144  }
  0x93   :  { %141 = vst.msk [vmem:[#allocation0 + $0x20] sm:$0x1] %vm139_vm7, %v138_v61   ;;  %vm248_vm7 = vcmask 294032  }
  0x94   :  { %147 = vst.msk [vmem:[#allocation0] sm:$0x1] %vm146_vm8, %v145_v62   ;;  %vm254_vm8 = vcmask 277632  }
  0x96   :  { %v151_v63 = vpop.permute.xlu0 %150   ;;  %v158_v0 = vpop.permute.xlu1 %157  }
  0x97   :  { %154 = vst.msk [vmem:[#allocation0 + $0x8] sm:$0x1] %vm152_vm9, %v151_v63   ;;  %vm261_vm9 = vcmask 261232  }
  0x98   :  { %161 = vst.msk [vmem:[#allocation0 + $0x10] sm:$0x1] %vm159_vm10, %v158_v0   ;;  %vm268_vm10 = vcmask 244832  }
  0x9a   :  { %v165_v1 = vpop.permute.xlu0 %164   ;;  %v172_v2 = vpop.permute.xlu1 %171  }
  0x9b   :  { %168 = vst.msk [vmem:[#allocation0 + $0x18] sm:$0x1] %vm166_vm11, %v165_v1   ;;  %vm275_vm11 = vcmask 228432  }
  0x9c   :  { %175 = vst.msk [vmem:[#allocation0 + $0x20] sm:$0x1] %vm173_vm12, %v172_v2  }
  0x9e   :  { %v179_v3 = vpop.permute.xlu0 %178   ;;  %v185_v4 = vpop.permute.xlu1 %184  }
  0x9f   :  { %181 = vst.msk [vmem:[#allocation0] sm:$0x1] %vm180_vm13, %v179_v3  }
  0xa0   :  { %188 = vst.msk [vmem:[#allocation0 + $0x8] sm:$0x1] %vm186_vm14, %v185_v4  }
  0xa2   :  { %v192_v5 = vpop.permute.xlu0 %191   ;;  %v199_v6 = vpop.permute.xlu1 %198  }
  0xa3   :  { %195 = vst.msk [vmem:[#allocation0 + $0x10] sm:$0x1] %vm193_vm15, %v192_v5  }
  0xa4   :  { %202 = vst.msk [vmem:[#allocation0 + $0x18] sm:$0x1] %vm200_vm0, %v199_v6  }
  0xa6   :  { %v206_v7 = vpop.permute.xlu0 %205   ;;  %v213_v8 = vpop.permute.xlu1 %212  }
  0xa7   :  { %209 = vst.msk [vmem:[#allocation0 + $0x20] sm:$0x1] %vm207_vm1, %v206_v7  }
  0xa8   :  { %215 = vst.msk [vmem:[#allocation0] sm:$0x1] %vm214_vm2, %v213_v8  }
  0xaa   :  { %v219_v9 = vpop.permute.xlu0 %218   ;;  %v226_v10 = vpop.permute.xlu1 %225  }
  0xab   :  { %222 = vst.msk [vmem:[#allocation0 + $0x8] sm:$0x1] %vm220_vm3, %v219_v9  }
  0xac   :  { %229 = vst.msk [vmem:[#allocation0 + $0x10] sm:$0x1] %vm227_vm4, %v226_v10  }
  0xae   :  { %v233_v11 = vpop.permute.xlu0 %232   ;;  %v240_v12 = vpop.permute.xlu1 %239  }
  0xaf   :  { %236 = vst.msk [vmem:[#allocation0 + $0x18] sm:$0x1] %vm234_vm5, %v233_v11  }
  0xb0   :  { %243 = vst.msk [vmem:[#allocation0 + $0x20] sm:$0x1] %vm241_vm6, %v240_v12  }
  0xb2   :  { %v247_v13 = vpop.permute.xlu0 %246   ;;  %v253_v14 = vpop.permute.xlu1 %252  }
  0xb3   :  { %249 = vst.msk [vmem:[#allocation0] sm:$0x1] %vm248_vm7, %v247_v13  }
  0xb4   :  { %256 = vst.msk [vmem:[#allocation0 + $0x8] sm:$0x1] %vm254_vm8, %v253_v14  }
  0xb6   :  { %v260_v15 = vpop.permute.xlu0 %259   ;;  %v267_v16 = vpop.permute.xlu1 %266  }
  0xb7   :  { %263 = vst.msk [vmem:[#allocation0 + $0x10] sm:$0x1] %vm261_vm9, %v260_v15  }
  0xb8   :  { %270 = vst.msk [vmem:[#allocation0 + $0x18] sm:$0x1] %vm268_vm10, %v267_v16  }
  0xba   :  { %v282_v17 = vld [vmem:[#allocation0] sm:$0x1]  ;;  %v274_v18 = vpop.permute.xlu0 %273  }
  0xbb   :  { %285 = vst [vmem:[%s595_s1] sm:$0x1] %v282_v17  ;;  %v287_v19 = vld [vmem:[#allocation0 + $0x8] sm:$0x1]  ;;  %277 = vst.msk [vmem:[#allocation0 + $0x20] sm:$0x1] %vm275_vm11, %v274_v18  }
  0xbc   :  { %364 = vst [vmem:[%s595_s1 + $0x1] sm:$0x1] %v287_v19 }
  0xbe   :  { %v293_v20 = vld [vmem:[#allocation0 + $0x10] sm:$0x1] }
  0xbf   :  { %365 = vst [vmem:[%s595_s1 + $0x2] sm:$0x1] %v293_v20  ;;  %v300_v21 = vld [vmem:[#allocation0 + $0x18] sm:$0x1] }
  0xc0   :  { %366 = vst [vmem:[%s595_s1 + $0x3] sm:$0x1] %v300_v21 }
  0xc2   :  { %v307_v22 = vld [vmem:[#allocation0 + $0x20] sm:$0x1] }
  0xc3   :  { %367 = vst [vmem:[%s595_s1 + $0x4] sm:$0x1] %v307_v22 }

// kernel: convres_forward.1
= control target key start
LH: loop header
LB: loop body
LE: loop exit
PB: predicated region body
PF: predicated region fallthrough
CT: control target
= control target key end

     0   :  { %v7410_v2 = vmov 0.0   ;;  %s7411_s17 = smov 18   ;;  %s7412_s20 = smov 19   ;;  %v7419_v14 = vmov 0   ;;  %vm60_vm0 = vcmask 146432   ;;  %vm70_vm1 = vcmask 1043456   ;;  %s8530_s0 = inlined_call_operand.vmem [shape: f32[4,896], index: 0, kind: input, shape index: {}]   ;;  %s8531_s3 = inlined_call_operand.vmem [shape: f32[8,1], index: 3, kind: input, shape index: {}]   ;;  %s8532_s2 = inlined_call_operand.vmem [shape: f32[9,8,4], index: 2, kind: input, shape index: {}]   ;;  %s8533_s1 = inlined_call_operand.vmem [shape: f32[1,896], index: 1, kind: input, shape index: {}]   ;;  %s8534_s4 = inlined_call_operand.vmem [shape: f32[9,4,8], index: 4, kind: input, shape index: {}]   ;;  %s8535_s5 = inlined_call_operand.vmem [shape: f32[4,1], index: 5, kind: input, shape index: {}]   ;;  %s8536_s6 = inlined_call_operand.vmem [shape: f32[4,1], index: 6, kind: input, shape index: {}]   ;;  %s8537_s7 = inlined_call_operand.vmem [shape: f32[9,8,4], index: 7, kind: input, shape index: {}]   ;;  %s8538_s8 = inlined_call_operand.vmem [shape: f32[8,1], index: 8, kind: input, shape index: {}]   ;;  %s8539_s9 = inlined_call_operand.vmem [shape: f32[8,1], index: 9, kind: input, shape index: {}]   ;;  %s8540_s10 = inlined_call_operand.vmem [shape: f32[8,648], index: 10, kind: output, shape index: {}]  }
   0x1   :  { %v37_v0 = vld [vmem:[%s8530_s0 + $0x8] sm:$0xff]  ;;  %v36_v1 = vld [vmem:[%s8530_s0] sm:$0xff]  ;;  %147 = vmatprep.mubr.f32.mxu0 %v7410_v2  ;;  %2419 = vst [vmem:[#allocation2] sm:$0xff] %v7410_v2  ;;  %4729 = vst [vmem:[#allocation3] sm:$0xf] %v7410_v2  ;;  %218 = vmatprep.mubr.f32.mxu1 %v7410_v2  ;;  %s7413_s21 = smov 17  }
   0x2   :  { %52 = vrot.lane.b32.xlu0 %v37_v0, %s7411_s17  ;;  %48 = vrot.lane.b32.xlu1 %v36_v1, %s7411_s17  ;;  %v46_v3 = vcombine.high %v37_v0, %v37_v0  ;;  %v45_v4 = vcombine.high %v36_v1, %v36_v1  ;;  %v38_v5 = vld [vmem:[%s8530_s0 + $0x10] sm:$0xff]  ;;  %s7414_s22 = smov 1   ;;  %v7513_v7 = vld [vmem:[%s8530_s0 + $0x4] sm:$0xff]  ;;  %s7415_s29 = smov 127   ;;  %vm66_vm2 = vcmask 31744   ;;  %vm308_vm3 = vcmask 154624  }
   0x3   :  { %v47_v6 = vcombine.high %v38_v5, %v38_v5  ;;  %v7519_v8 = vcombine.high %v7513_v7, %v7513_v7  ;;  %v808_v9 = vld [vmem:[%s8530_s0 + $0x18] sm:$0xf]  ;;  %v7527_v10 = vld [vmem:[%s8530_s0 + $0xc] sm:$0xff]  ;;  %s7416_s12 = smov 111   ;;  %s7418_s13 = smov 109   ;;  %7385 = vset.pattern.permute.xlu1 %v7419_v14  ;;  %7386 = vset.pattern.permute.xlu0 %v7419_v14  ;;  %v2370_v15 = vld [vmem:[%s8531_s3] sm:$0xff] }
   0x4   :  { %v7534_v11 = vcombine.high %v7527_v10, %v7527_v10  ;;  %v7543_v12 = vld [vmem:[%s8530_s0 + $0x14] sm:$0xff]  ;;  %s7417_s0 = smov 110   ;;  %v7162_v22 = vld [vmem:[%s8532_s2 + $0x8] sm:$0xff]  ;;  %v39_v35 = vld [vmem:[%s8532_s2] sm:$0xff]  ;;  %vm565_vm4 = vcmask 138240   ;;  %vm832_vm5 = vcmask 7168  }
   0x5   :  { %v7551_v13 = vcombine.high %v7543_v12, %v7543_v12  ;;  %v7181_v45 = vld [vmem:[%s8532_s2 + $0x10] sm:$0xff]  ;;  %v7191_v59 = vld [vmem:[%s8532_s2 + $0x18] sm:$0xff]  ;;  %v7201_v63 = vld [vmem:[%s8532_s2 + $0x20] sm:$0xff]  ;;  %vm1341_vm6 = vcmask 1039360   ;;  %vm1604_vm7 = vcmask 908288   ;;  %vm1867_vm8 = vcmask 900096  }
   0x6   :  { %54 = vrot.lane.b32.xlu1 %v46_v3, %s7411_s17  ;;  %50 = vrot.lane.b32.xlu0 %v45_v4, %s7411_s17  ;;  %vm2130_vm9 = vcmask 891904   ;;  %vm2420_vm10 = vcmask 1047616   ;;  %vm2427_vm11 = vcmask 64512   ;;  %vm4660_vm12 = vcmask 60416  }
   0x7   :  { %2421 = vst.msk [vmem:[#allocation2 + $0x30] sm:$0xff] %vm2420_vm10, %v7410_v2  ;;  %vm4730_vm13 = vcmask 1043520   ;;  %vm4746_vm14 = vcmask 64516  }
   0x8   :  { %vm4747_vm15 = vmor %vm4746_vm14, %vm70_vm1 }
   0xa   :  { %58 = vrot.lane.b32.xlu1 %v47_v6, %s7411_s17  ;;  %56 = vrot.lane.b32.xlu0 %v38_v5, %s7411_s17 }
   0xe   :  { %300 = vrot.lane.b32.xlu1 %v37_v0, %s7412_s20  ;;  %298 = vrot.lane.b32.xlu0 %v45_v4, %s7412_s20 }
  0x12   :  { %304 = vrot.lane.b32.xlu1 %v38_v5, %s7412_s20  ;;  %302 = vrot.lane.b32.xlu0 %v46_v3, %s7412_s20 }
  0x16   :  { %555 = vrot.lane.b32.xlu1 %v45_v4, %s7413_s21  ;;  %296 = vrot.lane.b32.xlu0 %v36_v1, %s7412_s20 }
  0x1a   :  { %306 = vrot.lane.b32.xlu1 %v47_v6, %s7412_s20  ;;  %557 = vrot.lane.b32.xlu0 %v37_v0, %s7413_s21 }
  0x1e   :  { %559 = vrot.lane.b32.xlu1 %v46_v3, %s7413_s21  ;;  %553 = vrot.lane.b32.xlu0 %v36_v1, %s7413_s21 }
  0x22   :  { %563 = vrot.lane.b32.xlu1 %v47_v6, %s7413_s21  ;;  %561 = vrot.lane.b32.xlu0 %v38_v5, %s7413_s21 }
  0x26   :  { %822 = vrot.lane.b32.xlu1 %v37_v0, %s7414_s22  ;;  %820 = vrot.lane.b32.xlu0 %v45_v4, %s7414_s22 }
  0x2a   :  { %826 = vrot.lane.b32.xlu1 %v38_v5, %s7414_s22  ;;  %824 = vrot.lane.b32.xlu0 %v46_v3, %s7414_s22 }
  0x2e   :  { %828 = vrot.lane.b32.xlu1 %v47_v6, %s7414_s22  ;;  %818 = vrot.lane.b32.xlu0 %v36_v1, %s7414_s22 }
  0x32   :  { %1331 = vrot.lane.b32.xlu1 %v7519_v8, %s7415_s29  ;;  %830 = vrot.lane.b32.xlu0 %v808_v9, %s7414_s22 }
  0x36   :  { %1335 = vrot.lane.b32.xlu1 %v7534_v11, %s7415_s29  ;;  %1333 = vrot.lane.b32.xlu0 %v7527_v10, %s7415_s29 }
  0x3a   :  { %1329 = vrot.lane.b32.xlu1 %v7513_v7, %s7415_s29  ;;  %1337 = vrot.lane.b32.xlu0 %v7543_v12, %s7415_s29 }
  0x3e   :  { %1596 = vrot.lane.b32.xlu1 %v7527_v10, %s7416_s12  ;;  %1594 = vrot.lane.b32.xlu0 %v7519_v8, %s7416_s12 }
  0x42   :  { %1592 = vrot.lane.b32.xlu1 %v7513_v7, %s7416_s12  ;;  %1339 = vrot.lane.b32.xlu0 %v7551_v13, %s7415_s29 }
  0x46   :  { %1600 = vrot.lane.b32.xlu1 %v7543_v12, %s7416_s12  ;;  %1598 = vrot.lane.b32.xlu0 %v7534_v11, %s7416_s12 }
  0x4a   :  { %1857 = vrot.lane.b32.xlu1 %v7519_v8, %s7417_s0  ;;  %1602 = vrot.lane.b32.xlu0 %v7551_v13, %s7416_s12 }
  0x4e   :  { %1861 = vrot.lane.b32.xlu1 %v7534_v11, %s7417_s0  ;;  %1859 = vrot.lane.b32.xlu0 %v7527_v10, %s7417_s0 }
  0x52   :  { %1855 = vrot.lane.b32.xlu1 %v7513_v7, %s7417_s0  ;;  %1863 = vrot.lane.b32.xlu0 %v7543_v12, %s7417_s0 }
  0x56   :  { %2122 = vrot.lane.b32.xlu1 %v7527_v10, %s7418_s13  ;;  %2120 = vrot.lane.b32.xlu0 %v7519_v8, %s7418_s13 }
  0x5a   :  { %2118 = vrot.lane.b32.xlu1 %v7513_v7, %s7418_s13  ;;  %1865 = vrot.lane.b32.xlu0 %v7551_v13, %s7417_s0 }
  0x5e   :  { %2126 = vrot.lane.b32.xlu1 %v7543_v12, %s7418_s13  ;;  %2124 = vrot.lane.b32.xlu0 %v7534_v11, %s7418_s13 }
  0x62   :  { %2128 = vrot.lane.b32.xlu0 %v7551_v13, %s7418_s13  ;;  %2373 = vperm.xlu1 %7385, %v2370_v15  }
  0x66   :  { %2444 = vrot.lane.b32.xlu0 %v7410_v2, %s7411_s17 }
  0x6a   :  { %2683 = vrot.lane.b32.xlu0 %v7410_v2, %s7412_s20 }
  0x6e   :  { %2924 = vrot.lane.b32.xlu0 %v7410_v2, %s7413_s21 }
  0x72   :  { %3185 = vrot.lane.b32.xlu0 %v7410_v2, %s7414_s22 }
  0x74   :  { %v53_v16 = vpop.permute.xlu0 %52  ;;  %v49_v17 = vpop.permute.xlu1 %48 }
  0x78   :  { %v55_v18 = vpop.permute.xlu1 %54  ;;  %v51_v19 = vpop.permute.xlu0 %50 }
  0x79   :  { %v62_v20 = vsel %vm60_vm0, %v51_v19, %v53_v16  ;;  %v61_v21 = vsel %vm60_vm0, %v49_v17, %v51_v19  ;;  %v63_v27 = vsel %vm60_vm0, %v53_v16, %v55_v18  ;;  %v7221_v19 = vld [vmem:[%s8532_s2 + $0x30] sm:$0xff] }
  0x7a   :  { %7163 = vmatprep.subr.msk.mxu0 %vm70_vm1, %v62_v20 }
  0x7b   :  { %7164 = vmatpush1.msk.msra.mxu0 %vm70_vm1, %v61_v21 }
  0x7c   :  { %v59_v23 = vpop.permute.xlu1 %58  ;;  %v57_v24 = vpop.permute.xlu0 %56  ;;  %7165 = vmatmul.mubr.msk.f32.vlgmr.msra.gmra.mxu0 %vm66_vm2, %v7162_v22 }
  0x7d   :  { %v65_v25 = vsel %vm60_vm0, %v57_v24, %v59_v23  ;;  %7169 = vmatprep.subr.msk.mxu0 %vm70_vm1, %v59_v23  ;;  %v64_v26 = vsel %vm60_vm0, %v55_v18, %v57_v24  ;;  %289 = vmatprep.mubr.f32.mxu0 %v7410_v2 }
  0x7e   :  { %7166 = vmatprep.subr.msk.mxu1 %vm70_vm1, %v64_v26  ;;  %7170 = vmatpush1.msk.msra.mxu0 %vm70_vm1, %v65_v25 }
  0x7f   :  { %7167 = vmatpush1.msk.msra.mxu1 %vm70_vm1, %v63_v27 }
  0x80   :  { %v301_v28 = vpop.permute.xlu1 %300  ;;  %v299_v29 = vpop.permute.xlu0 %298  ;;  %7171 = vmatmul.mubr.msk.f32.vlgmr.msra.gmra.mxu0 %vm66_vm2, %v7162_v22  ;;  %7168 = vmatmul.mubr.msk.f32.vlgmr.msra.gmra.mxu1 %vm66_vm2, %v7162_v22 }
  0x81   :  { %v310_v30 = vsel %vm308_vm3, %v299_v29, %v301_v28  ;;  %393 = vmatprep.mubr.f32.mxu1 %v7410_v2  ;;  %464 = vmatprep.mubr.f32.mxu0 %v7410_v2 }
  0x82   :  { %7172 = vmatprep.subr.msk.mxu1 %vm70_vm1, %v310_v30 }
  0x84   :  { %v305_v31 = vpop.permute.xlu1 %304  ;;  %v303_v32 = vpop.permute.xlu0 %302 }
  0x85   :  { %v311_v33 = vsel %vm308_vm3, %v301_v28, %v303_v32  ;;  %v312_v34 = vsel %vm308_vm3, %v303_v32, %v305_v31 }
  0x86   :  { %7175 = vmatprep.subr.msk.mxu0 %vm70_vm1, %v312_v34  ;;  %v7231_v34 = vld [vmem:[%s8532_s2 + $0x38] sm:$0xff] }
  0x87   :  { %7176 = vmatpush1.msk.msra.mxu0 %vm70_vm1, %v311_v33 }
  0x88   :  { %v556_v36 = vpop.permute.xlu1 %555  ;;  %v297_v37 = vpop.permute.xlu0 %296  ;;  %7177 = vmatmul.mubr.msk.f32.vlgmr.msra.gmra.mxu0 %vm66_vm2, %v39_v35 }
  0x89   :  { %v309_v38 = vsel %vm308_vm3, %v297_v37, %v299_v29  ;;  %650 = vmatprep.mubr.f32.mxu0 %v7410_v2 }
  0x8a   :  { %7173 = vmatpush1.msk.msra.mxu1 %vm70_vm1, %v309_v38 }
  0x8b   :  { %7174 = vmatmul.mubr.msk.f32.vlgmr.msra.gmra.mxu1 %vm66_vm2, %v39_v35 }
  0x8c   :  { %v307_v39 = vpop.permute.xlu1 %306  ;;  %v558_v40 = vpop.permute.xlu0 %557  ;;  %535 = vmatprep.mubr.f32.mxu1 %v7410_v2 }
  0x8d   :  { %v313_v41 = vsel %vm308_vm3, %v305_v31, %v307_v39  ;;  %7178 = vmatprep.subr.msk.mxu1 %vm70_vm1, %v307_v39  ;;  %v567_v42 = vsel %vm565_vm4, %v556_v36, %v558_v40 }
  0x8e   :  { %7179 = vmatpush1.msk.msra.mxu1 %vm70_vm1, %v313_v41  ;;  %7182 = vmatprep.subr.msk.mxu0 %vm70_vm1, %v567_v42 }
  0x8f   :  { %7180 = vmatmul.mubr.msk.f32.vlgmr.msra.gmra.mxu1 %vm66_vm2, %v39_v35 }
  0x90   :  { %v560_v43 = vpop.permute.xlu1 %559  ;;  %v554_v44 = vpop.permute.xlu0 %553  ;;  %721 = vmatprep.mubr.f32.mxu1 %v7410_v2 }
  0x91   :  { %v566_v46 = vsel %vm565_vm4, %v554_v44, %v556_v36  ;;  %v568_v51 = vsel %vm565_vm4, %v558_v40, %v560_v43 }
  0x92   :  { %7183 = vmatpush1.msk.msra.mxu0 %vm70_vm1, %v566_v46 }
  0x93   :  { %7184 = vmatmul.mubr.msk.f32.vlgmr.msra.gmra.mxu0 %vm66_vm2, %v7181_v45 }
  0x94   :  { %v564_v47 = vpop.permute.xlu1 %563  ;;  %v562_v48 = vpop.permute.xlu0 %561  ;;  %792 = vmatprep.mubr.f32.mxu0 %v7410_v2 }
  0x95   :  { %v570_v49 = vsel %vm565_vm4, %v562_v48, %v564_v47  ;;  %7188 = vmatprep.subr.msk.mxu0 %vm70_vm1, %v564_v47  ;;  %v569_v50 = vsel %vm565_vm4, %v560_v43, %v562_v48  ;;  %v7241_v43 = vld [vmem:[%s8532_s2 + $0x40] sm:$0xff] }
  0x96   :  { %7185 = vmatprep.subr.msk.mxu1 %vm70_vm1, %v569_v50  ;;  %7189 = vmatpush1.msk.msra.mxu0 %vm70_vm1, %v570_v49 }
  0x97   :  { %7186 = vmatpush1.msk.msra.mxu1 %vm70_vm1, %v568_v51  ;;  %7190 = vmatmul.mubr.msk.f32.vlgmr.msra.gmra.mxu0 %vm66_vm2, %v7181_v45 }
  0x98   :  { %v823_v52 = vpop.permute.xlu1 %822  ;;  %v821_v53 = vpop.permute.xlu0 %820  ;;  %7187 = vmatmul.mubr.msk.f32.vlgmr.msra.gmra.mxu1 %vm66_vm2, %v7181_v45  ;;  %989 = vmatprep.mubr.f32.mxu0 %v7410_v2 }
  0x99   :  { %v834_v54 = vsel %vm832_vm5, %v821_v53, %v823_v52  ;;  %918 = vmatprep.mubr.f32.mxu1 %v7410_v2 }
  0x9a   :  { %7192 = vmatprep.subr.msk.mxu1 %vm70_vm1, %v834_v54 }
  0x9c   :  { %v827_v55 = vpop.permute.xlu1 %826  ;;  %v825_v56 = vpop.permute.xlu0 %824 }
  0x9d   :  { %v835_v57 = vsel %vm832_vm5, %v823_v52, %v825_v56  ;;  %v836_v58 = vsel %vm832_vm5, %v825_v56, %v827_v55 }
  0x9e   :  { %7195 = vmatprep.subr.msk.mxu0 %vm70_vm1, %v836_v58 }
  0x9f   :  { %7196 = vmatpush1.msk.msra.mxu0 %vm70_vm1, %v835_v57 }
  0xa0   :  { %v829_v60 = vpop.permute.xlu1 %828  ;;  %v819_v61 = vpop.permute.xlu0 %818  ;;  %7197 = vmatmul.mubr.msk.f32.vlgmr.msra.gmra.mxu0 %vm66_vm2, %v7191_v59  ;;  %7202 = vmatprep.subr.msk.mxu0 %vm70_vm1, %v7519_v8 }
  0xa1   :  { %v833_v62 = vsel %vm832_vm5, %v819_v61, %v821_v53  ;;  %7203 = vmatpush1.msk.msra.mxu0 %vm70_vm1, %v7513_v7  ;;  %1163 = vmatprep.mubr.f32.mxu0 %v7410_v2  ;;  %v837_v4 = vsel %vm832_vm5, %v827_v55, %v829_v60 }
  0xa2   :  { %7193 = vmatpush1.msk.msra.mxu1 %vm70_vm1, %v833_v62  ;;  %7208 = vmatprep.subr.msk.mxu0 %vm70_vm1, %v7551_v13 }
  0xa3   :  { %7194 = vmatmul.mubr.msk.f32.vlgmr.msra.gmra.mxu1 %vm66_vm2, %v7191_v59 }
  0xa4   :  { %v1332_v0 = vpop.permute.xlu1 %1331  ;;  %v831_v1 = vpop.permute.xlu0 %830  ;;  %1060 = vmatprep.mubr.f32.mxu1 %v7410_v2  ;;  %7204 = vmatmul.mubr.msk.f32.vlgmr.msra.gmra.mxu0 %vm66_vm2, %v7201_v63 }
  0xa5   :  { %v838_v3 = vsel %vm832_vm5, %v829_v60, %v831_v1  ;;  %7209 = vmatpush1.msk.msra.mxu0 %vm70_vm1, %v7543_v12  ;;  %1305 = vmatprep.mubr.f32.mxu0 %v7410_v2 }
  0xa6   :  { %7198 = vmatprep.subr.msk.mxu1 %vm70_vm1, %v838_v3 }
  0xa7   :  { %7199 = vmatpush1.msk.msra.mxu1 %vm70_vm1, %v837_v4 }
  0xa8   :  { %v1336_v5 = vpop.permute.xlu1 %1335  ;;  %7200 = vmatmul.mubr.msk.f32.vlgmr.msra.gmra.mxu1 %vm66_vm2, %v7191_v59  ;;  %7205 = vmatprep.subr.msk.mxu1 %vm70_vm1, %v7534_v11  ;;  %v1334_v6 = vpop.permute.xlu0 %1333 }
  0xa9   :  { %7206 = vmatpush1.msk.msra.mxu1 %vm70_vm1, %v7527_v10  ;;  %v1343_v7 = vsel %vm1341_vm6, %v1332_v0, %v1334_v6  ;;  %1234 = vmatprep.mubr.f32.mxu1 %v7410_v2  ;;  %v7211_v10 = vld [vmem:[%s8532_s2 + $0x28] sm:$0xff]  ;;  %v1344_v13 = vsel %vm1341_vm6, %v1334_v6, %v1336_v5 }
  0xaa   :  { %7212 = vmatprep.subr.msk.mxu1 %vm70_vm1, %v1343_v7  ;;  %7210 = vmatmul.mubr.msk.f32.vlgmr.msra.gmra.mxu0 %vm66_vm2, %v7201_v63 }
  0xab   :  { %1497 = vmatprep.mubr.f32.mxu0 %v7410_v2 }
  0xac   :  { %v1330_v8 = vpop.permute.xlu1 %1329  ;;  %7207 = vmatmul.mubr.msk.f32.vlgmr.msra.gmra.mxu1 %vm66_vm2, %v7201_v63  ;;  %v1338_v9 = vpop.permute.xlu0 %1337 }
  0xad   :  { %v1342_v11 = vsel %vm1341_vm6, %v1330_v8, %v1332_v0  ;;  %v1345_v12 = vsel %vm1341_vm6, %v1336_v5, %v1338_v9  ;;  %1426 = vmatprep.mubr.f32.mxu1 %v7410_v2 }
  0xae   :  { %7213 = vmatpush1.msk.msra.mxu1 %vm70_vm1, %v1342_v11  ;;  %7215 = vmatprep.subr.msk.mxu0 %vm70_vm1, %v1345_v12 }
  0xaf   :  { %7216 = vmatpush1.msk.msra.mxu0 %vm70_vm1, %v1344_v13 }
  0xb0   :  { %v1597_v14 = vpop.permute.xlu1 %1596  ;;  %7214 = vmatmul.mubr.msk.f32.vlgmr.msra.gmra.mxu1 %vm66_vm2, %v7211_v10  ;;  %7217 = vmatmul.mubr.msk.f32.vlgmr.msra.gmra.mxu0 %vm66_vm2, %v7211_v10  ;;  %v1595_v15 = vpop.permute.xlu0 %1594 }
  0xb1   :  { %v1606_v16 = vsel %vm1604_vm7, %v1595_v15, %v1597_v14  ;;  %1568 = vmatprep.mubr.f32.mxu1 %v7410_v2  ;;  %1689 = vmatprep.mubr.f32.mxu0 %v7410_v2 }
  0xb2   :  { %7222 = vmatprep.subr.msk.mxu0 %vm70_vm1, %v1606_v16 }
  0xb4   :  { %v1593_v17 = vpop.permute.xlu1 %1592  ;;  %v1340_v18 = vpop.permute.xlu0 %1339 }
  0xb5   :  { %v1605_v20 = vsel %vm1604_vm7, %v1593_v17, %v1595_v15  ;;  %v1346_v21 = vsel %vm1341_vm6, %v1338_v9, %v1340_v18  ;;  %7218 = vmatprep.subr.msk.mxu1 %vm70_vm1, %v1340_v18 }
  0xb6   :  { %7219 = vmatpush1.msk.msra.mxu1 %vm70_vm1, %v1346_v21  ;;  %7223 = vmatpush1.msk.msra.mxu0 %vm70_vm1, %v1605_v20 }
  0xb7   :  { %7220 = vmatmul.mubr.msk.f32.vlgmr.msra.gmra.mxu1 %vm66_vm2, %v7211_v10  ;;  %7224 = vmatmul.mubr.msk.f32.vlgmr.msra.gmra.mxu0 %vm66_vm2, %v7221_v19 }
  0xb8   :  { %v1601_v22 = vpop.permute.xlu1 %1600  ;;  %v1599_v23 = vpop.permute.xlu0 %1598  ;;  %1760 = vmatprep.mubr.f32.mxu1 %v7410_v2  ;;  %1831 = vmatprep.mubr.f32.mxu0 %v7410_v2 }
  0xb9   :  { %v1607_v24 = vsel %vm1604_vm7, %v1597_v14, %v1599_v23  ;;  %v1608_v25 = vsel %vm1604_vm7, %v1599_v23, %v1601_v22 }
  0xba   :  { %7225 = vmatprep.subr.msk.mxu1 %vm70_vm1, %v1608_v25 }
  0xbb   :  { %7226 = vmatpush1.msk.msra.mxu1 %vm70_vm1, %v1607_v24 }
  0xbc   :  { %v1858_v26 = vpop.permute.xlu1 %1857  ;;  %7227 = vmatmul.mubr.msk.f32.vlgmr.msra.gmra.mxu1 %vm66_vm2, %v7221_v19  ;;  %v1603_v27 = vpop.permute.xlu0 %1602 }
  0xbd   :  { %v1609_v28 = vsel %vm1604_vm7, %v1601_v22, %v1603_v27  ;;  %7228 = vmatprep.subr.msk.mxu0 %vm70_vm1, %v1603_v27  ;;  %1952 = vmatprep.mubr.f32.mxu1 %v7410_v2 }
  0xbe   :  { %7229 = vmatpush1.msk.msra.mxu0 %vm70_vm1, %v1609_v28 }
  0xbf   :  { %7230 = vmatmul.mubr.msk.f32.vlgmr.msra.gmra.mxu0 %vm66_vm2, %v7221_v19 }
  0xc0   :  { %v1862_v29 = vpop.permute.xlu1 %1861  ;;  %v1860_v30 = vpop.permute.xlu0 %1859  ;;  %2023 = vmatprep.mubr.f32.mxu0 %v7410_v2 }
  0xc1   :  { %v1869_v31 = vsel %vm1867_vm8, %v1858_v26, %v1860_v30  ;;  %v1870_v37 = vsel %vm1867_vm8, %v1860_v30, %v1862_v29 }
  0xc2   :  { %7232 = vmatprep.subr.msk.mxu1 %vm70_vm1, %v1869_v31 }
  0xc4   :  { %v1856_v32 = vpop.permute.xlu1 %1855  ;;  %v1864_v33 = vpop.permute.xlu0 %1863 }
  0xc5   :  { %v1868_v35 = vsel %vm1867_vm8, %v1856_v32, %v1858_v26  ;;  %v1871_v36 = vsel %vm1867_vm8, %v1862_v29, %v1864_v33 }
  0xc6   :  { %7233 = vmatpush1.msk.msra.mxu1 %vm70_vm1, %v1868_v35  ;;  %7235 = vmatprep.subr.msk.mxu0 %vm70_vm1, %v1871_v36  ;;  %v2383_v35 = vlaneseq }
  0xc7   :  { %7234 = vmatmul.mubr.msk.f32.vlgmr.msra.gmra.mxu1 %vm66_vm2, %v7231_v34  ;;  %7236 = vmatpush1.msk.msra.mxu0 %vm70_vm1, %v1870_v37 }
  0xc8   :  { %v2123_v38 = vpop.permute.xlu1 %2122  ;;  %7237 = vmatmul.mubr.msk.f32.vlgmr.msra.gmra.mxu0 %vm66_vm2, %v7231_v34  ;;  %v2121_v39 = vpop.permute.xlu0 %2120  ;;  %2094 = vmatprep.mubr.f32.mxu1 %v7410_v2 }
  0xc9   :  { %v2132_v40 = vsel %vm2130_vm9, %v2121_v39, %v2123_v38  ;;  %2215 = vmatprep.mubr.f32.mxu0 %v7410_v2 }
  0xca   :  { %7242 = vmatprep.subr.msk.mxu0 %vm70_vm1, %v2132_v40 }
  0xcc   :  { %v2119_v41 = vpop.permute.xlu1 %2118  ;;  %v1866_v42 = vpop.permute.xlu0 %1865 }
  0xcd   :  { %v2131_v44 = vsel %vm2130_vm9, %v2119_v41, %v2121_v39  ;;  %v1872_v45 = vsel %vm1867_vm8, %v1864_v33, %v1866_v42  ;;  %7238 = vmatprep.subr.msk.mxu1 %vm70_vm1, %v1866_v42 }
  0xce   :  { %7239 = vmatpush1.msk.msra.mxu1 %vm70_vm1, %v1872_v45  ;;  %7243 = vmatpush1.msk.msra.mxu0 %vm70_vm1, %v2131_v44  ;;  %v7789_v44 = vshrl.u32 %v2383_v35, 7 }
  0xcf   :  { %7240 = vmatmul.mubr.msk.f32.vlgmr.msra.gmra.mxu1 %vm66_vm2, %v7231_v34  ;;  %7244 = vmatmul.mubr.msk.f32.vlgmr.msra.gmra.mxu0 %vm66_vm2, %v7241_v43 }
  0xd0   :  { %v2127_v46 = vpop.permute.xlu1 %2126  ;;  %v2125_v47 = vpop.permute.xlu0 %2124  ;;  %2286 = vmatprep.mubr.f32.mxu1 %v7410_v2  ;;  %2357 = vmatprep.mubr.f32.mxu0 %v7410_v2 }
  0xd1   :  { %v2133_v48 = vsel %vm2130_vm9, %v2123_v38, %v2125_v47  ;;  %v2134_v49 = vsel %vm2130_vm9, %v2125_v47, %v2127_v46 }
  0xd2   :  { %7245 = vmatprep.subr.msk.mxu1 %vm70_vm1, %v2134_v49 }
  0xd3   :  { %7246 = vmatpush1.msk.msra.mxu1 %vm70_vm1, %v2133_v48 }
  0xd4   :  { %7247 = vmatmul.mubr.msk.f32.vlgmr.msra.gmra.mxu1 %vm66_vm2, %v7241_v43  ;;  %v2129_v50 = vpop.permute.xlu0 %2128 }
  0xd5   :  { %v2135_v51 = vsel %vm2130_vm9, %v2127_v46, %v2129_v50  ;;  %7248 = vmatprep.subr.msk.mxu0 %vm70_vm1, %v2129_v50  ;;  %2534 = vmatprep.mubr.f32.mxu1 %v7410_v2 }
  0xd6   :  { %7249 = vmatpush1.msk.msra.mxu0 %vm70_vm1, %v2135_v51 }
  0xd7   :  { %7250 = vmatmul.mubr.msk.f32.vlgmr.msra.gmra.mxu0 %vm66_vm2, %v7241_v43 }
  0xd8   :  { %2605 = vmatprep.mubr.f32.mxu0 %v7410_v2 }
 0x13c   :  { %v149_v52 = vpop.f32.mrf.mxu0 }
 0x13e   :  { %v151_v53 = vpop.f32.mrf.mxu0 }
 0x140   :  { %v220_v54 = vpop.f32.mrf.mxu1  ;;  %v291_v55 = vpop.f32.mrf.mxu0 }
 0x142   :  { %v222_v56 = vpop.f32.mrf.mxu1  ;;  %v293_v57 = vpop.f32.mrf.mxu0 }
 0x148   :  { %v466_v59 = vpop.f32.mrf.mxu0 }
 0x149   :  { %v467_v30 = vadd.f32 %v466_v59, %v220_v54 }
 0x14a   :  { %v468_v61 = vpop.f32.mrf.mxu0 }
 0x14b   :  { %v395_v58 = vpop.f32.mrf.mxu1  ;;  %v469_v36 = vadd.f32 %v468_v61, %v222_v56  ;;  %v2389_v61 = vsub.s32 1, %v7789_v44 }
 0x14c   :  { %v396_v23 = vadd.f32 %v395_v58, %v149_v52 }
 0x14d   :  { %v397_v60 = vpop.f32.mrf.mxu1 }
 0x14e   :  { %v398_v25 = vadd.f32 %v397_v60, %v151_v53  ;;  %v35_v60 = vld [vmem:[%s8533_s1 + $0x1] sm:$0x3f] }
 0x14f   :  { %v537_v62 = vpop.f32.mrf.mxu1 }
 0x150   :  { %v538_v33 = vadd.f32 %v537_v62, %v291_v55  ;;  %v2385_v55 = vsub.s32 0, %v7789_v44 }
 0x151   :  { %v539_v1 = vpop.f32.mrf.mxu1 }
 0x152   :  { %v540_v37 = vadd.f32 %v539_v1, %v293_v57  ;;  %v2374_v1 = vpop.permute.xlu1 %2373 }
 0x153   :  { %v652_v63 = vpop.f32.mrf.mxu0 }
 0x154   :  { %v799_v27 = vadd.f32 %v652_v63, %v396_v23 }
 0x155   :  { %v654_v0 = vpop.f32.mrf.mxu0 }
 0x156   :  { %v800_v29 = vadd.f32 %v654_v0, %v398_v25 }
 0x157   :  { %v794_v3 = vpop.f32.mrf.mxu0 }
 0x158   :  { %v723_v4 = vpop.f32.mrf.mxu1  ;;  %v803_v42 = vadd.f32 %v794_v3, %v538_v33 }
 0x159   :  { %v796_v5 = vpop.f32.mrf.mxu0  ;;  %v801_v39 = vadd.f32 %v723_v4, %v467_v30 }
 0x15a   :  { %v725_v6 = vpop.f32.mrf.mxu1  ;;  %v804_v48 = vadd.f32 %v796_v5, %v540_v37 }
 0x15b   :  { %v802_v45 = vadd.f32 %v725_v6, %v469_v36 }
 0x160   :  { %v991_v7 = vpop.f32.mrf.mxu0 }
 0x161   :  { %v1069_v51 = vadd.f32 %v991_v7, %v801_v39 }
 0x162   :  { %v993_v8 = vpop.f32.mrf.mxu0 }
 0x163   :  { %v920_v2 = vpop.f32.mrf.mxu1  ;;  %v1070_v56 = vadd.f32 %v993_v8, %v802_v45 }
 0x164   :  { %v1165_v11 = vpop.f32.mrf.mxu0  ;;  %v1067_v34 = vadd.f32 %v920_v2, %v799_v27  ;;  %v2401_v27 = vsub.s32 4, %v7789_v44 }
 0x165   :  { %v922_v9 = vpop.f32.mrf.mxu1 }
 0x166   :  { %v1167_v13 = vpop.f32.mrf.mxu0  ;;  %v1068_v38 = vadd.f32 %v922_v9, %v800_v29  ;;  %v1312_v43 = vadd.f32 %v1165_v11, %v1067_v34  ;;  %v7796_v9 = vrot.slane %v35_v60, %v2385_v55  ;;  %v2445_v55 = vpop.permute.xlu0 %2444 }
 0x168   :  { %v1062_v12 = vpop.f32.mrf.mxu1  ;;  %v1313_v49 = vadd.f32 %v1167_v13, %v1068_v38 }
 0x169   :  { %v1071_v52 = vadd.f32 %v1062_v12, %v803_v42 }
 0x16a   :  { %v1064_v10 = vpop.f32.mrf.mxu1  ;;  %v1307_v15 = vpop.f32.mrf.mxu0 }
 0x16b   :  { %v1072_v62 = vadd.f32 %v1064_v10, %v804_v48  ;;  %v1316_v7 = vadd.f32 %v1307_v15, %v1071_v52  ;;  %v2393_v10 = vsub.s32 2, %v7789_v44  ;;  %v2397_v15 = vsub.s32 3, %v7789_v44 }
 0x16c   :  { %v1236_v14 = vpop.f32.mrf.mxu1  ;;  %v7785_v17 = vpop.f32.mrf.mxu0 }
 0x16d   :  { %v1314_v57 = vadd.f32 %v1236_v14, %v1069_v51  ;;  %v7817_v39 = vrot.slane %v35_v60, %v2397_v15 }
 0x16e   :  { %v1238_v16 = vpop.f32.mrf.mxu1 }
 0x16f   :  { %v1315_v3 = vadd.f32 %v1238_v16, %v1070_v56  ;;  %v2684_v56 = vpop.permute.xlu0 %2683 }
 0x170   :  { %v1428_v18 = vpop.f32.mrf.mxu1  ;;  %v1499_v19 = vpop.f32.mrf.mxu0 }
 0x171   :  { %v1575_v50 = vadd.f32 %v1428_v18, %v1312_v43  ;;  %v1577_v4 = vadd.f32 %v1499_v19, %v1314_v57  ;;  %v7798_v18 = vrot.slane %v35_v60, %v2389_v61  ;;  %v7820_v43 = vrot.slane %v35_v60, %v2401_v27 }
 0x172   :  { %v1430_v20 = vpop.f32.mrf.mxu1  ;;  %v1501_v21 = vpop.f32.mrf.mxu0 }
 0x173   :  { %v1576_v53 = vadd.f32 %v1430_v20, %v1313_v49  ;;  %v1578_v11 = vadd.f32 %v1501_v21, %v1315_v3  ;;  %v1317_v20 = vadd.f32 %v7785_v17, %v1072_v62  ;;  %v7808_v17 = vrot.slane %v35_v60, %v2393_v10  ;;  %v7931_v57 = vpop.permute.xlu0 %2924 }
 0x177   :  { %v1570_v22 = vpop.f32.mrf.mxu1  ;;  %v1691_v24 = vpop.f32.mrf.mxu0 }
 0x178   :  { %v1838_v54 = vadd.f32 %v1691_v24, %v1575_v50  ;;  %v1579_v23 = vadd.f32 %v1570_v22, %v1316_v7 }
 0x179   :  { %v7787_v26 = vpop.f32.mrf.mxu1  ;;  %v1693_v28 = vpop.f32.mrf.mxu0 }
 0x17a   :  { %v1839_v63 = vadd.f32 %v1693_v28, %v1576_v53  ;;  %v1580_v21 = vadd.f32 %v7787_v26, %v1317_v20  ;;  %v2405_v26 = vsub.s32 5, %v7789_v44  ;;  %v7954_v20 = vld [vmem:[#allocation2] sm:$0xff] }
 0x17b   :  { %4731 = vst.msk [vmem:[#allocation3 + $0x18] sm:$0xf] %vm4730_vm13, %v7954_v20 }
 0x17c   :  { %v1762_v31 = vpop.f32.mrf.mxu1  ;;  %v7825_v49 = vrot.slane %v35_v60, %v2405_v26 }
 0x17d   :  { %v1840_v12 = vadd.f32 %v1762_v31, %v1577_v4 }
 0x17e   :  { %v1764_v40 = vpop.f32.mrf.mxu1 }
 0x17f   :  { %v1833_v32 = vpop.f32.mrf.mxu0  ;;  %v1841_v24 = vadd.f32 %v1764_v40, %v1578_v11  ;;  %v7251_v11 = vld [vmem:[%s8534_s4 + $0x4] sm:$0xf] }
 0x180   :  { %v1842_v28 = vadd.f32 %v1833_v32, %v1579_v23 }
 0x181   :  { %v1835_v41 = vpop.f32.mrf.mxu0 }
 0x182   :  { %v1843_v22 = vadd.f32 %v1835_v41, %v1580_v21 }
 0x187   :  { %v1954_v46 = vpop.f32.mrf.mxu1 }
 0x188   :  { %v2025_v47 = vpop.f32.mrf.mxu0  ;;  %v2101_v0 = vadd.f32 %v1954_v46, %v1838_v54 }
 0x189   :  { %v1956_v58 = vpop.f32.mrf.mxu1  ;;  %v2103_v25 = vadd.f32 %v2025_v47, %v1840_v12 }
 0x18a   :  { %v2027_v59 = vpop.f32.mrf.mxu0  ;;  %v2102_v2 = vadd.f32 %v1956_v58, %v1839_v63  ;;  %v7933_v58 = vpop.permute.xlu0 %3185 }
 0x18b   :  { %v2104_v33 = vadd.f32 %v2027_v59, %v1841_v24  ;;  %v2435_v24 = vld [vmem:[%s8534_s4] sm:$0xf] }
 0x18f   :  { %v2096_v5 = vpop.f32.mrf.mxu1  ;;  %v2217_v6 = vpop.f32.mrf.mxu0 }
 0x190   :  { %v2364_v8 = vadd.f32 %v2217_v6, %v2101_v0  ;;  %v2105_v35 = vadd.f32 %v2096_v5, %v1842_v28 }
 0x191   :  { %v2098_v13 = vpop.f32.mrf.mxu1  ;;  %v2219_v14 = vpop.f32.mrf.mxu0 }
 0x192   :  { %v2376_v16 = vadd.f32 %v2374_v1, %v2364_v8  ;;  %v2365_v19 = vadd.f32 %v2219_v14, %v2102_v2  ;;  %v2106_v42 = vadd.f32 %v2098_v13, %v1843_v22 }
 0x194   :  { %v7806_v29 = vmul.f32 %v7796_v9, %v2376_v16  ;;  %v2377_v30 = vadd.f32 %v2374_v1, %v2365_v19  ;;  %v2288_v31 = vpop.f32.mrf.mxu1 }
 0x195   :  { %v2366_v34 = vadd.f32 %v2288_v31, %v2103_v25 }
 0x196   :  { %2422 = vst [vmem:[#allocation2 + $0x8] sm:$0xff] %v7806_v29  ;;  %v7812_v36 = vmul.f32 %v7798_v18, %v2377_v30  ;;  %v2290_v37 = vpop.f32.mrf.mxu1  ;;  %2446 = vrot.lane.b32.xlu0 %v7806_v29, %s7411_s17 }
 0x197   :  { %v2378_v32 = vadd.f32 %v2374_v1, %v2366_v34  ;;  %v2367_v38 = vadd.f32 %v2290_v37, %v2104_v33  ;;  %v2359_v40 = vpop.f32.mrf.mxu0 }
 0x198   :  { %2423 = vst [vmem:[#allocation2 + $0x10] sm:$0xff] %v7812_v36  ;;  %v2368_v41 = vadd.f32 %v2359_v40, %v2105_v35 }
 0x199   :  { %v7823_v45 = vmul.f32 %v7808_v17, %v2378_v32  ;;  %v2379_v46 = vadd.f32 %v2374_v1, %v2367_v38  ;;  %v2361_v47 = vpop.f32.mrf.mxu0 }
 0x19a   :  { %v2380_v44 = vadd.f32 %v2374_v1, %v2368_v41  ;;  %v2369_v48 = vadd.f32 %v2361_v47, %v2106_v42  ;;  %2685 = vrot.lane.b32.xlu0 %v7806_v29, %s7412_s20 }
 0x19b   :  { %2424 = vst [vmem:[#allocation2 + $0x18] sm:$0xff] %v7823_v45  ;;  %v7831_v50 = vmul.f32 %v7817_v39, %v2379_v46  ;;  %2450 = vrot.lane.b32.xlu1 %v7823_v45, %s7411_s17  ;;  %v7258_v46 = vld [vmem:[%s8534_s4 + $0x8] sm:$0xf] }
 0x19c   :  { %v7836_v51 = vmul.f32 %v7820_v43, %v2380_v44  ;;  %v2381_v52 = vadd.f32 %v2374_v1, %v2369_v48 }
 0x19d   :  { %2425 = vst [vmem:[#allocation2 + $0x20] sm:$0xff] %v7831_v50 }
 0x19e   :  { %2426 = vst [vmem:[#allocation2 + $0x28] sm:$0xff] %v7836_v51  ;;  %v7841_v53 = vmul.f32 %v7825_v49, %v2381_v52  ;;  %2689 = vrot.lane.b32.xlu0 %v7823_v45, %s7412_s20 }
 0x19f   :  { %2926 = vrot.lane.b32.xlu1 %v7806_v29, %s7413_s21 }
 0x1a0   :  { %2428 = vst.msk [vmem:[#allocation2 + $0x30] sm:$0xff] %vm2427_vm11, %v7841_v53 }
 0x1a2   :  { %3187 = vrot.lane.b32.xlu0 %v7806_v29, %s7414_s22 }
 0x1a3   :  { %2930 = vrot.lane.b32.xlu1 %v7823_v45, %s7413_s21 }
 0x1a6   :  { %3191 = vrot.lane.b32.xlu0 %v7823_v45, %s7414_s22 }
 0x1a7   :  { %3659 = vrot.lane.b32.xlu1 %v7806_v29, %s7415_s29  ;;  %v7885_v54 = vld [vmem:[#allocation2 + $0x30] sm:$0xff] }
 0x1aa   :  { %3663 = vrot.lane.b32.xlu0 %v7823_v45, %s7415_s29 }
 0x1ab   :  { %2448 = vrot.lane.b32.xlu1 %v7812_v36, %s7411_s17 }
 0x1ae   :  { %2452 = vrot.lane.b32.xlu0 %v7831_v50, %s7411_s17 }
 0x1af   :  { %2687 = vrot.lane.b32.xlu1 %v7812_v36, %s7412_s20 }
 0x1b2   :  { %2928 = vrot.lane.b32.xlu0 %v7812_v36, %s7413_s21 }
 0x1b3   :  { %2691 = vrot.lane.b32.xlu1 %v7831_v50, %s7412_s20 }
 0x1b6   :  { %2932 = vrot.lane.b32.xlu0 %v7831_v50, %s7413_s21 }
 0x1b7   :  { %3189 = vrot.lane.b32.xlu1 %v7812_v36, %s7414_s22 }
 0x1ba   :  { %3908 = vrot.lane.b32.xlu0 %v7812_v36, %s7416_s12 }
 0x1bb   :  { %3193 = vrot.lane.b32.xlu1 %v7831_v50, %s7414_s22 }
 0x1be   :  { %3912 = vrot.lane.b32.xlu0 %v7831_v50, %s7416_s12 }
 0x1bf   :  { %3661 = vrot.lane.b32.xlu1 %v7812_v36, %s7415_s29 }
 0x1c2   :  { %3667 = vrot.lane.b32.xlu0 %v7836_v51, %s7415_s29 }
 0x1c3   :  { %3665 = vrot.lane.b32.xlu1 %v7831_v50, %s7415_s29 }
 0x1c6   :  { %3197 = vrot.lane.b32.xlu0 %v7885_v54, %s7414_s22 }
 0x1c7   :  { %2454 = vrot.lane.b32.xlu1 %v7836_v51, %s7411_s17 }
 0x1ca   :  { %4157 = vrot.lane.b32.xlu0 %v7823_v45, %s7417_s0 }
 0x1cb   :  { %3910 = vrot.lane.b32.xlu1 %v7823_v45, %s7416_s12 }
 0x1ce   :  { %4161 = vrot.lane.b32.xlu0 %v7836_v51, %s7417_s0 }
 0x1cf   :  { %2693 = vrot.lane.b32.xlu1 %v7836_v51, %s7412_s20 }
 0x1d2   :  { %3669 = vrot.lane.b32.xlu0 %v7885_v54, %s7415_s29 }
 0x1d3   :  { %2934 = vrot.lane.b32.xlu1 %v7836_v51, %s7413_s21 }
 0x1d6   :  { %3916 = vrot.lane.b32.xlu0 %v7885_v54, %s7416_s12 }
 0x1d7   :  { %3906 = vrot.lane.b32.xlu1 %v7806_v29, %s7416_s12 }
 0x1da   :  { %4402 = vrot.lane.b32.xlu0 %v7812_v36, %s7418_s13 }
 0x1db   :  { %3195 = vrot.lane.b32.xlu1 %v7836_v51, %s7414_s22 }
 0x1de   :  { %4163 = vrot.lane.b32.xlu0 %v7885_v54, %s7417_s0 }
 0x1df   :  { %4155 = vrot.lane.b32.xlu1 %v7812_v36, %s7417_s0 }
 0x1e2   :  { %4406 = vrot.lane.b32.xlu0 %v7831_v50, %s7418_s13 }
 0x1e3   :  { %3914 = vrot.lane.b32.xlu1 %v7836_v51, %s7416_s12 }
 0x1e6   :  { %4410 = vrot.lane.b32.xlu0 %v7885_v54, %s7418_s13 }
 0x1e7   :  { %4159 = vrot.lane.b32.xlu1 %v7831_v50, %s7417_s0 }
 0x1eb   :  { %4153 = vrot.lane.b32.xlu1 %v7806_v29, %s7417_s0 }
 0x1ef   :  { %4404 = vrot.lane.b32.xlu1 %v7823_v45, %s7418_s13 }
 0x1f3   :  { %4400 = vrot.lane.b32.xlu1 %v7806_v29, %s7418_s13 }
 0x1f7   :  { %4408 = vrot.lane.b32.xlu1 %v7836_v51, %s7418_s13 }
 0x208   :  { %v2447_v59 = vpop.permute.xlu0 %2446 }
 0x209   :  { %v2456_v2 = vsel %vm60_vm0, %v2445_v55, %v2447_v59 }
 0x20c   :  { %v2686_v60 = vpop.permute.xlu0 %2685 }
 0x20d   :  { %v2451_v61 = vpop.permute.xlu1 %2450  ;;  %v2695_v23 = vsel %vm308_vm3, %v2684_v56, %v2686_v60 }
 0x210   :  { %v2690_v62 = vpop.permute.xlu0 %2689 }
 0x211   :  { %v2927_v63 = vpop.permute.xlu1 %2926 }
 0x212   :  { %v2936_v42 = vsel %vm565_vm4, %v7931_v57, %v2927_v63 }
 0x214   :  { %v7935_v0 = vpop.permute.xlu0 %3187 }
 0x215   :  { %v7937_v1 = vpop.permute.xlu1 %2930 }
 0x218   :  { %v7939_v3 = vpop.permute.xlu0 %3191 }
 0x219   :  { %v7941_v4 = vpop.permute.xlu1 %3659 }
 0x21c   :  { %v7943_v5 = vpop.permute.xlu0 %3663 }
 0x21d   :  { %v2449_v6 = vpop.permute.xlu1 %2448 }
 0x21e   :  { %v2457_v7 = vsel %vm60_vm0, %v2447_v59, %v2449_v6  ;;  %v2458_v14 = vsel %vm60_vm0, %v2449_v6, %v2451_v61  ;;  %v3199_v59 = vsel %vm832_vm5, %v7933_v58, %v7935_v0 }
 0x21f   :  { %2500 = vmatprep.subr.mxu1 %v2457_v7 }
 0x220   :  { %2501 = vmatpush1.msra.mxu1 %v2456_v2  ;;  %v2453_v8 = vpop.permute.xlu0 %2452 }
 0x221   :  { %v2688_v12 = vpop.permute.xlu1 %2687  ;;  %v2459_v13 = vsel %vm60_vm0, %v2451_v61, %v2453_v8  ;;  %7252 = vmatmul.mubr.msk.f32.vlgmr.msra.gmra.mxu1 %vm2427_vm11, %v7251_v11 }
 0x222   :  { %2571 = vmatprep.subr.mxu0 %v2459_v13  ;;  %v2696_v10 = vsel %vm308_vm3, %v2686_v60, %v2688_v12  ;;  %2676 = vmatprep.mubr.f32.mxu1 %v7954_v20  ;;  %v2697_v26 = vsel %vm308_vm3, %v2688_v12, %v2690_v62  ;;  %v7274_v13 = vld [vmem:[%s8534_s4 + $0x18] sm:$0xf] }
 0x223   :  { %2572 = vmatpush1.msra.mxu0 %v2458_v14 }
 0x224   :  { %2739 = vmatprep.subr.mxu0 %v2696_v10  ;;  %v2929_v16 = vpop.permute.xlu0 %2928  ;;  %7253 = vmatmul.mubr.msk.f32.vlgmr.msra.gmra.mxu0 %vm2427_vm11, %v7251_v11 }
 0x225   :  { %v2692_v19 = vpop.permute.xlu1 %2691  ;;  %2740 = vmatpush1.msra.mxu0 %v2695_v23  ;;  %2773 = vmatprep.mubr.f32.mxu0 %v7954_v20  ;;  %v2937_v40 = vsel %vm565_vm4, %v2927_v63, %v2929_v16  ;;  %v2938_v52 = vsel %vm565_vm4, %v2929_v16, %v7937_v1  ;;  %v7262_v63 = vld [vmem:[%s8534_s4 + $0xc] sm:$0xf] }
 0x226   :  { %v2698_v37 = vsel %vm308_vm3, %v2690_v62, %v2692_v19 }
 0x228   :  { %v2933_v25 = vpop.permute.xlu0 %2932  ;;  %7255 = vmatmul.mubr.msk.f32.vlgmr.msra.gmra.mxu0 %vm2427_vm11, %v2435_v24 }
 0x229   :  { %v3190_v15 = vpop.permute.xlu1 %3189  ;;  %2915 = vmatprep.mubr.f32.mxu0 %v7954_v20  ;;  %v2939_v48 = vsel %vm565_vm4, %v7937_v1, %v2933_v25 }
 0x22a   :  { %v3200_v57 = vsel %vm832_vm5, %v7935_v0, %v3190_v15  ;;  %v3201_v58 = vsel %vm832_vm5, %v3190_v15, %v7939_v3 }
 0x22c   :  { %v7965_v27 = vpop.permute.xlu0 %3908 }
 0x22d   :  { %v7967_v21 = vpop.permute.xlu1 %3193 }
 0x22e   :  { %v3202_v61 = vsel %vm832_vm5, %v7939_v3, %v7967_v21 }
 0x230   :  { %v7969_v28 = vpop.permute.xlu0 %3912 }
 0x231   :  { %v7971_v30 = vpop.permute.xlu1 %3661 }
 0x234   :  { %v7973_v31 = vpop.permute.xlu0 %3667 }
 0x235   :  { %v7975_v33 = vpop.permute.xlu1 %3665 }
 0x238   :  { %v3198_v34 = vpop.permute.xlu0 %3197 }
 0x239   :  { %v2455_v22 = vpop.permute.xlu1 %2454 }
 0x23a   :  { %v2460_v35 = vsel %vm60_vm0, %v2453_v8, %v2455_v22  ;;  %2642 = vmatprep.subr.mxu1 %v2455_v22 }
 0x23b   :  { %2643 = vmatpush1.msra.mxu1 %v2460_v35  ;;  %v7282_v35 = vld [vmem:[%s8534_s4 + $0x20] sm:$0xf] }
 0x23c   :  { %7254 = vmatmul.mubr.msk.f32.vlgmr.msra.gmra.mxu1 %vm2427_vm11, %v7251_v11  ;;  %2810 = vmatprep.subr.mxu1 %v2698_v37  ;;  %v7981_v32 = vpop.permute.xlu0 %4157 }
 0x23d   :  { %v7983_v38 = vpop.permute.xlu1 %3910  ;;  %2811 = vmatpush1.msra.mxu1 %v2697_v26  ;;  %2844 = vmatprep.mubr.f32.mxu1 %v7954_v20 }
 0x23e   :  { %2980 = vmatprep.subr.mxu1 %v2937_v40  ;;  %v3919_v8 = vsel %vm1604_vm7, %v7965_v27, %v7983_v38 }
 0x240   :  { %7256 = vmatmul.mubr.msk.f32.vlgmr.msra.gmra.mxu1 %vm2427_vm11, %v2435_v24  ;;  %v7995_v44 = vpop.permute.xlu0 %4161 }
 0x241   :  { %2981 = vmatpush1.msra.mxu1 %v2936_v42  ;;  %v2694_v41 = vpop.permute.xlu1 %2693  ;;  %3014 = vmatprep.mubr.f32.mxu1 %v7954_v20 }
 0x242   :  { %v2699_v47 = vsel %vm308_vm3, %v2692_v19, %v2694_v41  ;;  %2881 = vmatprep.subr.mxu0 %v2694_v41  ;;  %v3920_v19 = vsel %vm1604_vm7, %v7983_v38, %v7969_v28 }
 0x243   :  { %2882 = vmatpush1.msra.mxu0 %v2699_v47 }
 0x244   :  { %7257 = vmatmul.mubr.msk.f32.vlgmr.msra.gmra.mxu0 %vm2427_vm11, %v2435_v24  ;;  %7259 = vmatmul.mubr.msk.f32.vlgmr.msra.gmra.mxu1 %vm2427_vm11, %v7258_v46  ;;  %v3670_v60 = vpop.permute.xlu0 %3669 }
 0x245   :  { %3051 = vmatprep.subr.mxu0 %v2939_v48  ;;  %v2935_v55 = vpop.permute.xlu1 %2934  ;;  %3085 = vmatprep.mubr.f32.mxu0 %v7954_v20  ;;  %v3675_v12 = vsel %vm1341_vm6, %v7973_v31, %v3670_v60 }
 0x246   :  { %v2940_v56 = vsel %vm565_vm4, %v2933_v25, %v2935_v55  ;;  %3052 = vmatpush1.msra.mxu0 %v2938_v52  ;;  %3122 = vmatprep.subr.mxu1 %v2935_v55 }
 0x247   :  { %3244 = vmatprep.subr.mxu0 %v3200_v57  ;;  %3123 = vmatpush1.msra.mxu1 %v2940_v56 }
 0x248   :  { %3156 = vmatprep.mubr.f32.mxu1 %v7954_v20  ;;  %7260 = vmatmul.mubr.msk.f32.vlgmr.msra.gmra.mxu0 %vm2427_vm11, %v7258_v46  ;;  %v3917_v6 = vpop.permute.xlu0 %3916 }
 0x249   :  { %7261 = vmatmul.mubr.msk.f32.vlgmr.msra.gmra.mxu1 %vm2427_vm11, %v7258_v46  ;;  %3245 = vmatpush1.msra.mxu0 %v3199_v59  ;;  %v3907_v62 = vpop.permute.xlu1 %3906 }
 0x24a   :  { %3315 = vmatprep.subr.mxu1 %v3202_v61  ;;  %3278 = vmatprep.mubr.f32.mxu0 %v7954_v20  ;;  %v3918_v11 = vsel %vm1604_vm7, %v3907_v62, %v7965_v27 }
 0x24b   :  { %3316 = vmatpush1.msra.mxu1 %v3201_v58  ;;  %3349 = vmatprep.mubr.f32.mxu1 %v7954_v20 }
 0x24c   :  { %3468 = vmatprep.subr.mxu1 %v7812_v36  ;;  %7263 = vmatmul.mubr.msk.f32.vlgmr.msra.gmra.mxu0 %vm2427_vm11, %v7262_v63  ;;  %v7266_v36 = vld [vmem:[%s8534_s4 + $0x10] sm:$0xf]  ;;  %v4403_v2 = vpop.permute.xlu0 %4402 }
 0x24d   :  { %7264 = vmatmul.mubr.msk.f32.vlgmr.msra.gmra.mxu1 %vm2427_vm11, %v7262_v63  ;;  %v3196_v0 = vpop.permute.xlu1 %3195  ;;  %3420 = vmatprep.mubr.f32.mxu0 %v7954_v20 }
 0x24e   :  { %3469 = vmatpush1.msra.mxu1 %v7806_v29  ;;  %v3203_v1 = vsel %vm832_vm5, %v7967_v21, %v3196_v0  ;;  %v3204_v3 = vsel %vm832_vm5, %v3196_v0, %v3198_v34  ;;  %3502 = vmatprep.mubr.f32.mxu1 %v7954_v20  ;;  %v3674_v29 = vsel %vm1341_vm6, %v7975_v33, %v7973_v31  ;;  %v7278_v31 = vld [vmem:[%s8534_s4 + $0x1c] sm:$0xf] }
 0x24f   :  { %3610 = vmatprep.subr.mxu1 %v7885_v54  ;;  %3386 = vmatprep.subr.mxu0 %v3204_v3  ;;  %v3672_v54 = vsel %vm1341_vm6, %v7971_v30, %v7943_v5 }
 0x250   :  { %3387 = vmatpush1.msra.mxu0 %v3203_v1  ;;  %v4164_v14 = vpop.permute.xlu0 %4163 }
 0x251   :  { %7267 = vmatmul.mubr.msk.f32.vlgmr.msra.gmra.mxu1 %vm2427_vm11, %v7266_v36  ;;  %v4156_v7 = vpop.permute.xlu1 %4155  ;;  %7265 = vmatmul.mubr.msk.f32.vlgmr.msra.gmra.mxu0 %vm2427_vm11, %v7262_v63  ;;  %v4169_v34 = vsel %vm1867_vm8, %v7995_v44, %v4164_v14 }
 0x252   :  { %3611 = vmatpush1.msra.mxu1 %v7836_v51  ;;  %3539 = vmatprep.subr.mxu0 %v7831_v50  ;;  %v3673_v51 = vsel %vm1341_vm6, %v7943_v5, %v7975_v33  ;;  %v7270_v5 = vld [vmem:[%s8534_s4 + $0x14] sm:$0xf]  ;;  %v4166_v25 = vsel %vm1867_vm8, %v4156_v7, %v7981_v32 }
 0x253   :  { %3786 = vmatprep.subr.mxu1 %v3674_v29  ;;  %3540 = vmatpush1.msra.mxu0 %v7823_v45  ;;  %v3671_v45 = vsel %vm1341_vm6, %v7941_v4, %v7971_v30 }
 0x254   :  { %3644 = vmatprep.mubr.f32.mxu1 %v7954_v20  ;;  %3715 = vmatprep.subr.mxu0 %v3672_v54  ;;  %v4407_v15 = vpop.permute.xlu0 %4406 }
 0x255   :  { %3573 = vmatprep.mubr.f32.mxu0 %v7954_v20  ;;  %7269 = vmatmul.mubr.msk.f32.vlgmr.msra.gmra.mxu1 %vm2427_vm11, %v7266_v36  ;;  %v3915_v50 = vpop.permute.xlu1 %3914 }
 0x256   :  { %3787 = vmatpush1.msra.mxu1 %v3673_v51  ;;  %7268 = vmatmul.mubr.msk.f32.vlgmr.msra.gmra.mxu0 %vm2427_vm11, %v7266_v36  ;;  %v3921_v10 = vsel %vm1604_vm7, %v7969_v28, %v3915_v50  ;;  %v3922_v23 = vsel %vm1604_vm7, %v3915_v50, %v3917_v6 }
 0x257   :  { %3716 = vmatpush1.msra.mxu0 %v3671_v45  ;;  %3962 = vmatprep.subr.mxu1 %v3919_v8 }
 0x258   :  { %3857 = vmatprep.subr.mxu0 %v3670_v60  ;;  %3820 = vmatprep.mubr.f32.mxu1 %v7954_v20  ;;  %v4411_v37 = vpop.permute.xlu0 %4410 }
 0x259   :  { %3749 = vmatprep.mubr.f32.mxu0 %v7954_v20  ;;  %7272 = vmatmul.mubr.msk.f32.vlgmr.msra.gmra.mxu1 %vm2427_vm11, %v7270_v5  ;;  %v4160_v4 = vpop.permute.xlu1 %4159 }
 0x25a   :  { %3963 = vmatpush1.msra.mxu1 %v3918_v11  ;;  %7271 = vmatmul.mubr.msk.f32.vlgmr.msra.gmra.mxu0 %vm2427_vm11, %v7270_v5  ;;  %v4168_v24 = vsel %vm1867_vm8, %v4160_v4, %v7995_v44  ;;  %v4167_v27 = vsel %vm1867_vm8, %v7981_v32, %v4160_v4 }
 0x25b   :  { %3858 = vmatpush1.msra.mxu0 %v3675_v12  ;;  %4104 = vmatprep.subr.mxu1 %v3917_v6 }
 0x25c   :  { %4033 = vmatprep.subr.mxu0 %v3921_v10  ;;  %3996 = vmatprep.mubr.f32.mxu1 %v7954_v20 }
 0x25d   :  { %3891 = vmatprep.mubr.f32.mxu0 %v7954_v20  ;;  %7275 = vmatmul.mubr.msk.f32.vlgmr.msra.gmra.mxu1 %vm2427_vm11, %v7274_v13  ;;  %v4154_v16 = vpop.permute.xlu1 %4153 }
 0x25e   :  { %4105 = vmatpush1.msra.mxu1 %v3922_v23  ;;  %7273 = vmatmul.mubr.msk.f32.vlgmr.msra.gmra.mxu0 %vm2427_vm11, %v7270_v5  ;;  %v4165_v28 = vsel %vm1867_vm8, %v4154_v16, %v4156_v7 }
 0x25f   :  { %4034 = vmatpush1.msra.mxu0 %v3920_v19  ;;  %4280 = vmatprep.subr.mxu1 %v4168_v24 }
 0x260   :  { %4209 = vmatprep.subr.mxu0 %v4166_v25  ;;  %4138 = vmatprep.mubr.f32.mxu1 %v7954_v20 }
 0x261   :  { %4067 = vmatprep.mubr.f32.mxu0 %v7954_v20  ;;  %7277 = vmatmul.mubr.msk.f32.vlgmr.msra.gmra.mxu1 %vm2427_vm11, %v7274_v13  ;;  %v4405_v21 = vpop.permute.xlu1 %4404 }
 0x262   :  { %4281 = vmatpush1.msra.mxu1 %v4167_v27  ;;  %7276 = vmatmul.mubr.msk.f32.vlgmr.msra.gmra.mxu0 %vm2427_vm11, %v7274_v13  ;;  %v4413_v30 = vsel %vm2130_vm9, %v4403_v2, %v4405_v21  ;;  %v4414_v40 = vsel %vm2130_vm9, %v4405_v21, %v4407_v15 }
 0x263   :  { %4210 = vmatpush1.msra.mxu0 %v4165_v28  ;;  %4314 = vmatprep.mubr.f32.mxu1 %v7954_v20 }
 0x264   :  { %4351 = vmatprep.subr.mxu0 %v4164_v14  ;;  %4456 = vmatprep.subr.mxu1 %v4413_v30 }
 0x265   :  { %4243 = vmatprep.mubr.f32.mxu0 %v7954_v20  ;;  %7280 = vmatmul.mubr.msk.f32.vlgmr.msra.gmra.mxu1 %vm2427_vm11, %v7278_v31  ;;  %v4401_v33 = vpop.permute.xlu1 %4400 }
 0x266   :  { %v4412_v22 = vsel %vm2130_vm9, %v4401_v33, %v4403_v2  ;;  %7279 = vmatmul.mubr.msk.f32.vlgmr.msra.gmra.mxu0 %vm2427_vm11, %v7278_v31  ;;  %4490 = vmatprep.mubr.f32.mxu1 %v7954_v20 }
 0x267   :  { %4352 = vmatpush1.msra.mxu0 %v4169_v34  ;;  %4457 = vmatpush1.msra.mxu1 %v4412_v22 }
 0x268   :  { %4385 = vmatprep.mubr.f32.mxu0 %v7954_v20  ;;  %4598 = vmatprep.subr.mxu1 %v4411_v37 }
 0x269   :  { %7283 = vmatmul.mubr.msk.f32.vlgmr.msra.gmra.mxu1 %vm2427_vm11, %v7282_v35  ;;  %v4409_v26 = vpop.permute.xlu1 %4408 }
 0x26a   :  { %v4416_v32 = vsel %vm2130_vm9, %v4409_v26, %v4411_v37  ;;  %7281 = vmatmul.mubr.msk.f32.vlgmr.msra.gmra.mxu0 %vm2427_vm11, %v7278_v31  ;;  %v4415_v38 = vsel %vm2130_vm9, %v4407_v15, %v4409_v26  ;;  %4632 = vmatprep.mubr.f32.mxu1 %v7954_v20 }
 0x26b   :  { %4527 = vmatprep.subr.mxu0 %v4415_v38  ;;  %4599 = vmatpush1.msra.mxu1 %v4416_v32 }
 0x26c   :  { %4528 = vmatpush1.msra.mxu0 %v4414_v40  ;;  %4561 = vmatprep.mubr.f32.mxu0 %v7954_v20 }
 0x26d   :  { %7285 = vmatmul.mubr.msk.f32.vlgmr.msra.gmra.mxu1 %vm2427_vm11, %v7282_v35 }
 0x26e   :  { %7284 = vmatmul.mubr.msk.f32.vlgmr.msra.gmra.mxu0 %vm2427_vm11, %v7282_v35  ;;  %4928 = vmatprep.mubr.f32.mxu1 %v7954_v20 }
 0x26f   :  { %4857 = vmatprep.mubr.f32.mxu0 %v7954_v20 }
 0x2e1   :  { %v2536_v42 = vpop.f32.mrf.mxu1 }
 0x2e3   :  { %v2538_v46 = vpop.f32.mrf.mxu1 }
 0x2e4   :  { %v2607_v41 = vpop.f32.mrf.mxu0 }
 0x2e6   :  { %v2609_v47 = vpop.f32.mrf.mxu0 }
 0x2e8   :  { %v2775_v48 = vpop.f32.mrf.mxu0 }
 0x2e9   :  { %v2776_v11 = vadd.f32 %v2775_v48, %v2536_v42 }
 0x2ea   :  { %v2777_v56 = vpop.f32.mrf.mxu0 }
 0x2eb   :  { %v2778_v13 = vadd.f32 %v2777_v56, %v2538_v46 }
 0x2fc   :  { %v2678_v44 = vpop.f32.mrf.mxu1 }
 0x2fe   :  { %v2680_v52 = vpop.f32.mrf.mxu1 }
 0x300   :  { %v2846_v55 = vpop.f32.mrf.mxu1 }
 0x301   :  { %v2847_v16 = vadd.f32 %v2846_v55, %v2607_v41 }
 0x302   :  { %v2848_v57 = vpop.f32.mrf.mxu1 }
 0x303   :  { %v2849_v28 = vadd.f32 %v2848_v57, %v2609_v47 }
 0x304   :  { %v2917_v59 = vpop.f32.mrf.mxu0  ;;  %v3016_v60 = vpop.f32.mrf.mxu1 }
 0x305   :  { %v2918_v14 = vadd.f32 %v2917_v59, %v2678_v44  ;;  %v3163_v10 = vadd.f32 %v3016_v60, %v2776_v11 }
 0x306   :  { %v2919_v61 = vpop.f32.mrf.mxu0  ;;  %v3018_v62 = vpop.f32.mrf.mxu1 }
 0x307   :  { %v2920_v24 = vadd.f32 %v2919_v61, %v2680_v52  ;;  %v3164_v25 = vadd.f32 %v3018_v62, %v2778_v13 }
 0x308   :  { %v3087_v63 = vpop.f32.mrf.mxu0 }
 0x309   :  { %v3158_v58 = vpop.f32.mrf.mxu1  ;;  %v3165_v30 = vadd.f32 %v3087_v63, %v2847_v16 }
 0x30a   :  { %v3089_v0 = vpop.f32.mrf.mxu0  ;;  %v3167_v15 = vadd.f32 %v3158_v58, %v2918_v14 }
 0x30b   :  { %v3160_v1 = vpop.f32.mrf.mxu1  ;;  %v3166_v26 = vadd.f32 %v3089_v0, %v2849_v28 }
 0x30c   :  { %v3280_v3 = vpop.f32.mrf.mxu0  ;;  %v3168_v33 = vadd.f32 %v3160_v1, %v2920_v24 }
 0x30d   :  { %v3351_v36 = vpop.f32.mrf.mxu1  ;;  %v3427_v27 = vadd.f32 %v3280_v3, %v3163_v10 }
 0x30e   :  { %v3282_v6 = vpop.f32.mrf.mxu0  ;;  %v3429_v38 = vadd.f32 %v3351_v36, %v3165_v30 }
 0x30f   :  { %v3353_v7 = vpop.f32.mrf.mxu1  ;;  %v3428_v34 = vadd.f32 %v3282_v6, %v3164_v25 }
 0x310   :  { %v3430_v48 = vadd.f32 %v3353_v7, %v3166_v26 }
 0x311   :  { %v3504_v29 = vpop.f32.mrf.mxu1  ;;  %v3422_v54 = vpop.f32.mrf.mxu0 }
 0x312   :  { %v3651_v22 = vadd.f32 %v3504_v29, %v3427_v27  ;;  %v3431_v35 = vadd.f32 %v3422_v54, %v3167_v15 }
 0x313   :  { %v3506_v51 = vpop.f32.mrf.mxu1  ;;  %v3424_v2 = vpop.f32.mrf.mxu0 }
 0x314   :  { %v3652_v40 = vadd.f32 %v3506_v51, %v3428_v34  ;;  %v3432_v42 = vadd.f32 %v3424_v2, %v3168_v33 }
 0x315   :  { %v3646_v50 = vpop.f32.mrf.mxu1 }
 0x316   :  { %v3575_v45 = vpop.f32.mrf.mxu0  ;;  %v3655_v52 = vadd.f32 %v3646_v50, %v3431_v35 }
 0x317   :  { %v3648_v8 = vpop.f32.mrf.mxu1  ;;  %v3653_v55 = vadd.f32 %v3575_v45, %v3429_v38 }
 0x318   :  { %v3577_v5 = vpop.f32.mrf.mxu0  ;;  %v3656_v59 = vadd.f32 %v3648_v8, %v3432_v42 }
 0x319   :  { %v3822_v4 = vpop.f32.mrf.mxu1  ;;  %v3654_v60 = vadd.f32 %v3577_v5, %v3430_v48 }
 0x31a   :  { %v3751_v12 = vpop.f32.mrf.mxu0  ;;  %v3900_v0 = vadd.f32 %v3822_v4, %v3653_v55 }
 0x31b   :  { %v3824_v23 = vpop.f32.mrf.mxu1  ;;  %v3898_v41 = vadd.f32 %v3751_v12, %v3651_v22 }
 0x31c   :  { %v3753_v19 = vpop.f32.mrf.mxu0  ;;  %v3901_v54 = vadd.f32 %v3824_v23, %v3654_v60 }
 0x31d   :  { %v3998_v21 = vpop.f32.mrf.mxu1  ;;  %v3899_v56 = vadd.f32 %v3753_v19, %v3652_v40 }
 0x31e   :  { %v3893_v31 = vpop.f32.mrf.mxu0  ;;  %v4145_v61 = vadd.f32 %v3998_v21, %v3898_v41 }
 0x31f   :  { %v4000_v37 = vpop.f32.mrf.mxu1  ;;  %v3902_v62 = vadd.f32 %v3893_v31, %v3655_v52 }
 0x320   :  { %v3895_v32 = vpop.f32.mrf.mxu0  ;;  %v4146_v1 = vadd.f32 %v4000_v37, %v3899_v56 }
 0x321   :  { %v4140_v46 = vpop.f32.mrf.mxu1  ;;  %v3903_v3 = vadd.f32 %v3895_v32, %v3656_v59 }
 0x322   :  { %v4069_v44 = vpop.f32.mrf.mxu0  ;;  %v4149_v51 = vadd.f32 %v4140_v46, %v3902_v62 }
 0x323   :  { %v4142_v47 = vpop.f32.mrf.mxu1  ;;  %v4147_v7 = vadd.f32 %v4069_v44, %v3900_v0 }
 0x324   :  { %v4071_v57 = vpop.f32.mrf.mxu0  ;;  %v4150_v12 = vadd.f32 %v4142_v47, %v3903_v3 }
 0x325   :  { %v4316_v63 = vpop.f32.mrf.mxu1  ;;  %v4148_v8 = vadd.f32 %v4071_v57, %v3901_v54 }
 0x326   :  { %v4245_v58 = vpop.f32.mrf.mxu0  ;;  %v4394_v16 = vadd.f32 %v4316_v63, %v4147_v7 }
 0x327   :  { %v4392_v36 = vadd.f32 %v4245_v58, %v4145_v61  ;;  %v4318_v6 = vpop.f32.mrf.mxu1 }
 0x328   :  { %v4247_v29 = vpop.f32.mrf.mxu0  ;;  %v4395_v21 = vadd.f32 %v4318_v6, %v4148_v8 }
 0x329   :  { %v4393_v2 = vadd.f32 %v4247_v29, %v4146_v1  ;;  %v4492_v50 = vpop.f32.mrf.mxu1 }
 0x32a   :  { %v4639_v45 = vadd.f32 %v4492_v50, %v4392_v36  ;;  %v4387_v11 = vpop.f32.mrf.mxu0 }
 0x32b   :  { %v4396_v5 = vadd.f32 %v4387_v11, %v4149_v51  ;;  %v4494_v13 = vpop.f32.mrf.mxu1 }
 0x32c   :  { %v8123_v14 = vmul.f32 %v4639_v45, %v7796_v9  ;;  %v4640_v4 = vadd.f32 %v4494_v13, %v4393_v2  ;;  %v4389_v10 = vpop.f32.mrf.mxu0 }
 0x32d   :  { %v4397_v19 = vadd.f32 %v4389_v10, %v4150_v12  ;;  %v4634_v24 = vpop.f32.mrf.mxu1  ;;  %v4692_v10 = vld [vmem:[%s8536_s6] sm:$0xf] }
 0x32e   :  { %v4665_v23 = vmul.f32 %v8123_v14, %v8123_v14  ;;  %v8128_v25 = vmul.f32 %v4640_v4, %v7798_v18  ;;  %v4643_v15 = vadd.f32 %v4634_v24, %v4396_v5  ;;  %v4563_v27 = vpop.f32.mrf.mxu0  ;;  %v4651_v31 = vsel %vm70_vm1, %v8123_v14, 0.0  ;;  %v4688_v5 = vld [vmem:[%s8535_s5] sm:$0xf] }
 0x32f   :  { %v4641_v28 = vadd.f32 %v4563_v27, %v4394_v16  ;;  %v4636_v30 = vpop.f32.mrf.mxu1 }
 0x330   :  { %v4652_v33 = vsel %vm70_vm1, %v8128_v25, 0.0  ;;  %v4666_v34 = vmul.f32 %v8128_v25, %v8128_v25  ;;  %v4565_v22 = vpop.f32.mrf.mxu0  ;;  %v4644_v26 = vadd.f32 %v4636_v30, %v4397_v19  ;;  %v4671_v38 = vsel %vm70_vm1, %v4665_v23, 0.0 }
 0x331   :  { %v4653_v35 = vadd.f32 %v4652_v33, %v4651_v31  ;;  %v4647_v37 = vmul.f32 %v4641_v28, %v7808_v17  ;;  %v4642_v32 = vadd.f32 %v4565_v22, %v4395_v21  ;;  %v4649_v42 = vmul.f32 %v4643_v15, %v7820_v43 }
 0x332   :  { %v4672_v40 = vsel %vm70_vm1, %v4666_v34, 0.0  ;;  %v4650_v52 = vmul.f32 %v4644_v26, %v7825_v49 }
 0x333   :  { %v4673_v41 = vadd.f32 %v4672_v40, %v4671_v38  ;;  %v4654_v46 = vsel %vm70_vm1, %v4647_v37, 0.0  ;;  %v4667_v44 = vmul.f32 %v4647_v37, %v4647_v37  ;;  %v4648_v55 = vmul.f32 %v4642_v32, %v7817_v39 }
 0x334   :  { %v4655_v48 = vadd.f32 %v4654_v46, %v4653_v35  ;;  %v4669_v47 = vmul.f32 %v4649_v42, %v4649_v42  ;;  %v4658_v62 = vsel %vm70_vm1, %v4649_v42, 0.0  ;;  %v4670_v63 = vmul.f32 %v4650_v52, %v4650_v52 }
 0x335   :  { %v4674_v56 = vsel %vm70_vm1, %v4667_v44, 0.0  ;;  %v4656_v57 = vsel %vm70_vm1, %v4648_v55, 0.0  ;;  %v4668_v59 = vmul.f32 %v4648_v55, %v4648_v55  ;;  %v4661_v3 = vsel %vm4660_vm12, %v4650_v52, 0.0 }
 0x336   :  { %v4675_v60 = vadd.f32 %v4674_v56, %v4673_v41  ;;  %v4657_v61 = vadd.f32 %v4656_v57, %v4655_v48  ;;  %v4678_v36 = vsel %vm70_vm1, %v4669_v47, 0.0  ;;  %v4680_v54 = vsel %vm4660_vm12, %v4670_v63, 0.0 }
 0x337   :  { %v4676_v58 = vsel %vm70_vm1, %v4668_v59, 0.0 }
 0x338   :  { %v4659_v0 = vadd.f32 %v4658_v62, %v4657_v61  ;;  %v4677_v1 = vadd.f32 %v4676_v58, %v4675_v60 }
 0x33a   :  { %v4662_v6 = vadd.f32 %v4661_v3, %v4659_v0  ;;  %v4679_v29 = vadd.f32 %v4678_v36, %v4677_v1 }
 0x33c   :  { %4663 = vadd.xlane.f32.xlu1 %v4662_v6  ;;  %v4681_v51 = vadd.f32 %v4680_v54, %v4679_v29 }
 0x33e   :  { %4682 = vadd.xlane.f32.xlu0 %v4681_v51 }
 0x3c5   :  { %v4664_v7 = vpop.xlane.xlu1 %4663 }
 0x3c6   :  { %v4684_v2 = vmul.f32 0.001953125, %v4664_v7 }
 0x3c7   :  { %v4683_v50 = vpop.xlane.xlu0 %4682 }
 0x3c8   :  { %v4686_v45 = vmul.f32 %v4684_v2, %v4684_v2  ;;  %v4685_v11 = vmul.f32 0.001953125, %v4683_v50 }
 0x3ca   :  { %v4687_v12 = vsub.f32 %v4685_v11, %v4686_v45 }
 0x3cc   :  { %v4689_v8 = vadd.f32 1e-05, %v4687_v12 }
 0x3ce   :  { %7397 = vrsqrt.f32 %v4689_v8 }
 0x3db   :  { %v7398_v13 = vpop.eup %7397 }
 0x3dc   :  { %v4691_v4 = vmul.f32 %v7398_v13, %v4688_v5 }
 0x3de   :  { %4697 = vperm.xlu0 %7386, %v4691_v4   ;;  %v4693_v16 = vmul.f32 %v4691_v4, %v4684_v2 }
 0x3e0   :  { %v4694_v19 = vsub.f32 %v4692_v10, %v4693_v16 }
 0x3e2   :  { %4708 = vperm.xlu1 %7385, %v4694_v19  }
 0x459   :  { %v4698_v24 = vpop.permute.xlu0 %4697 }
 0x45a   :  { %v4700_v23 = vmul.f32 %v4698_v24, %v8123_v14  ;;  %v4701_v15 = vmul.f32 %v4698_v24, %v8128_v25  ;;  %v4702_v27 = vmul.f32 %v4698_v24, %v4647_v37  ;;  %v4703_v21 = vmul.f32 %v4698_v24, %v4648_v55 }
 0x45b   :  { %v4704_v28 = vmul.f32 %v4698_v24, %v4649_v42  ;;  %v4705_v30 = vmul.f32 %v4698_v24, %v4650_v52 }
 0x45d   :  { %v4709_v31 = vpop.permute.xlu1 %4708 }
 0x45e   :  { %v4711_v33 = vadd.f32 %v4709_v31, %v4700_v23  ;;  %v4712_v34 = vadd.f32 %v4709_v31, %v4701_v15  ;;  %v4713_v22 = vadd.f32 %v4709_v31, %v4702_v27  ;;  %v4714_v35 = vadd.f32 %v4709_v31, %v4703_v21 }
 0x45f   :  { %v4715_v26 = vadd.f32 %v4709_v31, %v4704_v28  ;;  %v4716_v32 = vadd.f32 %v4709_v31, %v4705_v30 }
 0x460   :  { %v4717_v38 = vmax.f32 %v4711_v33, 0.0  ;;  %v4718_v40 = vmax.f32 %v4712_v34, 0.0  ;;  %v4719_v41 = vmax.f32 %v4713_v22, 0.0  ;;  %v4720_v46 = vmax.f32 %v4714_v35, 0.0  ;;  %v7286_v34 = vld [vmem:[%s8537_s7 + $0x8] sm:$0xff] }
 0x461   :  { %v4721_v44 = vmax.f32 %v4715_v26, 0.0  ;;  %v4722_v14 = vmax.f32 %v4716_v32, 0.0 }
 0x462   :  { %v4723_v25 = vmul.f32 %v4717_v38, %v7796_v9  ;;  %v4724_v37 = vmul.f32 %v4718_v40, %v7798_v18  ;;  %v4725_v42 = vmul.f32 %v4719_v41, %v7808_v17  ;;  %v4726_v48 = vmul.f32 %v4720_v46, %v7817_v39 }
 0x463   :  { %v4727_v52 = vmul.f32 %v4721_v44, %v7820_v43  ;;  %v4728_v55 = vmul.f32 %v4722_v14, %v7825_v49 }
 0x464   :  { %v8164_v56 = vcombine.low %v4723_v25, %v4724_v37  ;;  %v8166_v47 = vcombine.low %v4725_v42, %v4726_v48  ;;  %v8207_v3 = vcombine.low %v4724_v37, %v4724_v37  ;;  %v8212_v36 = vcombine.low %v4726_v48, %v4726_v48  ;;  %v4752_v25 = vld [vmem:[%s8537_s7] sm:$0xff] }
 0x465   :  { %v4740_v57 = vcombine.low %v4727_v52, %v4728_v55 }
 0x466   :  { %4744 = vst [vmem:[#allocation3 + $0x4] sm:$0xff] %v8164_v56  ;;  %4745 = vst [vmem:[#allocation3 + $0xc] sm:$0xff] %v8166_v47 }
 0x467   :  { %4748 = vst.msk [vmem:[#allocation3 + $0x14] sm:$0xff] %vm4747_vm15, %v4740_v57 }
 0x46d   :  { %v4750_v59 = vld [vmem:[#allocation3 + $0x8] sm:$0xff]  ;;  %v4749_v61 = vld [vmem:[#allocation3] sm:$0xff] }
 0x46e   :  { %5010 = vrot.lane.b32.xlu0 %v4750_v59, %s7412_s20  ;;  %4765 = vrot.lane.b32.xlu1 %v4750_v59, %s7411_s17  ;;  %v4751_v60 = vld [vmem:[#allocation3 + $0x10] sm:$0xff]  ;;  %v4758_v63 = vcombine.high %v4749_v61, %v4749_v61  ;;  %v5516_v58 = vld [vmem:[#allocation3 + $0x18] sm:$0xf]  ;;  %v4759_v1 = vcombine.high %v4750_v59, %v4750_v59 }
 0x46f   :  { %v8187_v62 = vld [vmem:[#allocation3 + $0x14] sm:$0xff]  ;;  %v4760_v0 = vcombine.high %v4751_v60, %v4751_v60 }
 0x470   :  { %v8237_v6 = vcombine.high %v8187_v62, %v8187_v62 }
 0x472   :  { %5014 = vrot.lane.b32.xlu0 %v4751_v60, %s7412_s20  ;;  %4761 = vrot.lane.b32.xlu1 %v4749_v61, %s7411_s17 }
 0x476   :  { %5530 = vrot.lane.b32.xlu0 %v4750_v59, %s7414_s22  ;;  %4769 = vrot.lane.b32.xlu1 %v4751_v60, %s7411_s17 }
 0x47a   :  { %5534 = vrot.lane.b32.xlu0 %v4751_v60, %s7414_s22  ;;  %5006 = vrot.lane.b32.xlu1 %v4749_v61, %s7412_s20 }
 0x47e   :  { %6036 = vrot.lane.b32.xlu0 %v8164_v56, %s7415_s29  ;;  %5266 = vrot.lane.b32.xlu1 %v4750_v59, %s7413_s21 }
 0x482   :  { %6302 = vrot.lane.b32.xlu0 %v8166_v47, %s7416_s12  ;;  %5262 = vrot.lane.b32.xlu1 %v4749_v61, %s7413_s21 }
 0x486   :  { %6298 = vrot.lane.b32.xlu0 %v8164_v56, %s7416_s12  ;;  %5270 = vrot.lane.b32.xlu1 %v4751_v60, %s7413_s21 }
 0x48a   :  { %6306 = vrot.lane.b32.xlu0 %v8187_v62, %s7416_s12  ;;  %5526 = vrot.lane.b32.xlu1 %v4749_v61, %s7414_s22 }
 0x48e   :  { %5264 = vrot.lane.b32.xlu0 %v4758_v63, %s7413_s21  ;;  %5538 = vrot.lane.b32.xlu1 %v5516_v58, %s7414_s22  ;;  %v7305_v58 = vld [vmem:[%s8537_s7 + $0x10] sm:$0xff] }
 0x492   :  { %5016 = vrot.lane.b32.xlu0 %v4760_v0, %s7412_s20  ;;  %6040 = vrot.lane.b32.xlu1 %v8166_v47, %s7415_s29 }
 0x496   :  { %5268 = vrot.lane.b32.xlu0 %v4759_v1, %s7413_s21  ;;  %6044 = vrot.lane.b32.xlu1 %v8187_v62, %s7415_s29 }
 0x49a   :  { %5272 = vrot.lane.b32.xlu0 %v4760_v0, %s7413_s21  ;;  %4763 = vrot.lane.b32.xlu1 %v4758_v63, %s7411_s17 }
 0x49e   :  { %6560 = vrot.lane.b32.xlu0 %v8164_v56, %s7417_s0  ;;  %4767 = vrot.lane.b32.xlu1 %v4759_v1, %s7411_s17 }
 0x4a2   :  { %5536 = vrot.lane.b32.xlu0 %v4760_v0, %s7414_s22  ;;  %4771 = vrot.lane.b32.xlu1 %v4760_v0, %s7411_s17 }
 0x4a6   :  { %6038 = vrot.lane.b32.xlu0 %v8207_v3, %s7415_s29  ;;  %5008 = vrot.lane.b32.xlu1 %v4758_v63, %s7412_s20 }
 0x4aa   :  { %6042 = vrot.lane.b32.xlu0 %v8212_v36, %s7415_s29  ;;  %5012 = vrot.lane.b32.xlu1 %v4759_v1, %s7412_s20 }
 0x4ae   :  { %6826 = vrot.lane.b32.xlu0 %v8166_v47, %s7418_s13  ;;  %6564 = vrot.lane.b32.xlu1 %v8166_v47, %s7417_s0 }
 0x4b2   :  { %6562 = vrot.lane.b32.xlu0 %v8207_v3, %s7417_s0  ;;  %5528 = vrot.lane.b32.xlu1 %v4758_v63, %s7414_s22 }
 0x4b6   :  { %6566 = vrot.lane.b32.xlu0 %v8212_v36, %s7417_s0  ;;  %5532 = vrot.lane.b32.xlu1 %v4759_v1, %s7414_s22 }
 0x4ba   :  { %6822 = vrot.lane.b32.xlu0 %v8164_v56, %s7418_s13  ;;  %6568 = vrot.lane.b32.xlu1 %v8187_v62, %s7417_s0 }
 0x4be   :  { %6830 = vrot.lane.b32.xlu0 %v8187_v62, %s7418_s13  ;;  %6300 = vrot.lane.b32.xlu1 %v8207_v3, %s7416_s12 }
 0x4c2   :  { %6046 = vrot.lane.b32.xlu1 %v8237_v6, %s7415_s29 }
 0x4c6   :  { %6304 = vrot.lane.b32.xlu1 %v8212_v36, %s7416_s12 }
 0x4ca   :  { %6308 = vrot.lane.b32.xlu1 %v8237_v6, %s7416_s12 }
 0x4ce   :  { %6824 = vrot.lane.b32.xlu1 %v8207_v3, %s7418_s13 }
 0x4d2   :  { %6570 = vrot.lane.b32.xlu1 %v8237_v6, %s7417_s0 }
 0x4d6   :  { %6828 = vrot.lane.b32.xlu1 %v8212_v36, %s7418_s13 }
 0x4da   :  { %6832 = vrot.lane.b32.xlu1 %v8237_v6, %s7418_s13 }
 0x4e0   :  { %v5011_v29 = vpop.permute.xlu0 %5010  ;;  %v4766_v54 = vpop.permute.xlu1 %4765 }
 0x4e4   :  { %v5015_v51 = vpop.permute.xlu0 %5014  ;;  %v4762_v7 = vpop.permute.xlu1 %4761 }
 0x4e8   :  { %v8253_v2 = vpop.permute.xlu0 %5530  ;;  %v4770_v50 = vpop.permute.xlu1 %4769 }
 0x4ec   :  { %v8255_v45 = vpop.permute.xlu0 %5534  ;;  %v5007_v11 = vpop.permute.xlu1 %5006 }
 0x4f0   :  { %v8257_v12 = vpop.permute.xlu0 %6036  ;;  %v5267_v8 = vpop.permute.xlu1 %5266 }
 0x4f4   :  { %v8259_v5 = vpop.permute.xlu0 %6302  ;;  %v5263_v13 = vpop.permute.xlu1 %5262 }
 0x4f8   :  { %v8261_v4 = vpop.permute.xlu0 %6298  ;;  %v8263_v10 = vpop.permute.xlu1 %5270 }
 0x4fc   :  { %v8265_v16 = vpop.permute.xlu0 %6306  ;;  %v8267_v19 = vpop.permute.xlu1 %5526 }
 0x500   :  { %v5265_v24 = vpop.permute.xlu0 %5264  ;;  %v8269_v23 = vpop.permute.xlu1 %5538 }
 0x501   :  { %v5275_v59 = vsel %vm565_vm4, %v5265_v24, %v5267_v8  ;;  %v5274_v63 = vsel %vm565_vm4, %v5263_v13, %v5265_v24 }
 0x504   :  { %v8271_v15 = vpop.permute.xlu1 %6040  ;;  %v5017_v27 = vpop.permute.xlu0 %5016 }
 0x505   :  { %v5022_v37 = vsel %vm308_vm3, %v5015_v51, %v5017_v27 }
 0x508   :  { %v8273_v21 = vpop.permute.xlu1 %6044  ;;  %v5269_v28 = vpop.permute.xlu0 %5268 }
 0x509   :  { %v5277_v48 = vsel %vm565_vm4, %v5269_v28, %v8263_v10  ;;  %v5276_v60 = vsel %vm565_vm4, %v5267_v8, %v5269_v28 }
 0x50c   :  { %v4764_v30 = vpop.permute.xlu1 %4763  ;;  %v5273_v32 = vpop.permute.xlu0 %5272 }
 0x50d   :  { %v4773_v31 = vsel %vm60_vm0, %v4762_v7, %v4764_v30  ;;  %v4774_v33 = vsel %vm60_vm0, %v4764_v30, %v4766_v54  ;;  %v5278_v0 = vsel %vm565_vm4, %v8263_v10, %v5273_v32  ;;  %v8345_v7 = vld [vmem:[#allocation2] sm:$0xff] }
 0x50e   :  { %7287 = vmatprep.subr.msk.mxu0 %vm70_vm1, %v4774_v33  ;;  %v7345_v33 = vld [vmem:[%s8537_s7 + $0x30] sm:$0xff] }
 0x50f   :  { %7288 = vmatpush1.msk.msra.mxu0 %vm70_vm1, %v4773_v31 }
 0x510   :  { %v4768_v22 = vpop.permute.xlu1 %4767  ;;  %7289 = vmatmul.mubr.msk.f32.vlgmr.msra.gmra.mxu0 %vm66_vm2, %v7286_v34  ;;  %v8294_v41 = vpop.permute.xlu0 %6560 }
 0x511   :  { %v4775_v35 = vsel %vm60_vm0, %v4766_v54, %v4768_v22  ;;  %v4776_v26 = vsel %vm60_vm0, %v4768_v22, %v4770_v50  ;;  %4999 = vmatprep.mubr.f32.mxu0 %v7954_v20 }
 0x512   :  { %7290 = vmatprep.subr.msk.mxu1 %vm70_vm1, %v4776_v26  ;;  %v7355_v26 = vld [vmem:[%s8537_s7 + $0x38] sm:$0xff] }
 0x513   :  { %7291 = vmatpush1.msk.msra.mxu1 %vm70_vm1, %v4775_v35 }
 0x514   :  { %v4772_v38 = vpop.permute.xlu1 %4771  ;;  %7292 = vmatmul.mubr.msk.f32.vlgmr.msra.gmra.mxu1 %vm66_vm2, %v7286_v34  ;;  %v5537_v57 = vpop.permute.xlu0 %5536 }
 0x515   :  { %v4777_v40 = vsel %vm60_vm0, %v4770_v50, %v4772_v38  ;;  %7293 = vmatprep.subr.msk.mxu0 %vm70_vm1, %v4772_v38  ;;  %5102 = vmatprep.mubr.f32.mxu1 %v7954_v20  ;;  %v5545_v50 = vsel %vm832_vm5, %v5537_v57, %v8269_v23  ;;  %v5544_v8 = vsel %vm832_vm5, %v8255_v45, %v5537_v57 }
 0x516   :  { %7294 = vmatpush1.msk.msra.mxu0 %vm70_vm1, %v4777_v40 }
 0x517   :  { %7295 = vmatmul.mubr.msk.f32.vlgmr.msra.gmra.mxu0 %vm66_vm2, %v7286_v34 }
 0x518   :  { %v5009_v46 = vpop.permute.xlu1 %5008  ;;  %5173 = vmatprep.mubr.f32.mxu0 %v7954_v20  ;;  %v6039_v1 = vpop.permute.xlu0 %6038 }
 0x519   :  { %v5018_v44 = vsel %vm308_vm3, %v5007_v11, %v5009_v46  ;;  %v5019_v14 = vsel %vm308_vm3, %v5009_v46, %v5011_v29 }
 0x51a   :  { %7296 = vmatprep.subr.msk.mxu1 %vm70_vm1, %v5019_v14 }
 0x51b   :  { %7297 = vmatpush1.msk.msra.mxu1 %vm70_vm1, %v5018_v44 }
 0x51c   :  { %7298 = vmatmul.mubr.msk.f32.vlgmr.msra.gmra.mxu1 %vm66_vm2, %v4752_v25  ;;  %7302 = vmatprep.subr.msk.mxu1 %vm70_vm1, %v5017_v27  ;;  %v5013_v42 = vpop.permute.xlu1 %5012 }
 0x51d   :  { %v5020_v52 = vsel %vm308_vm3, %v5011_v29, %v5013_v42  ;;  %v5021_v55 = vsel %vm308_vm3, %v5013_v42, %v5015_v51  ;;  %7303 = vmatpush1.msk.msra.mxu1 %vm70_vm1, %v5022_v37  ;;  %5244 = vmatprep.mubr.f32.mxu1 %v7954_v20 }
 0x51e   :  { %7299 = vmatprep.subr.msk.mxu0 %vm70_vm1, %v5021_v55  ;;  %7309 = vmatprep.subr.msk.mxu1 %vm70_vm1, %v5277_v48 }
 0x51f   :  { %7300 = vmatpush1.msk.msra.mxu0 %vm70_vm1, %v5020_v52 }
 0x520   :  { %7301 = vmatmul.mubr.msk.f32.vlgmr.msra.gmra.mxu0 %vm66_vm2, %v4752_v25  ;;  %7304 = vmatmul.mubr.msk.f32.vlgmr.msra.gmra.mxu1 %vm66_vm2, %v4752_v25  ;;  %v8320_v61 = vpop.permute.xlu1 %6564  ;;  %v7365_v25 = vld [vmem:[%s8537_s7 + $0x40] sm:$0xff] }
 0x521   :  { %7306 = vmatprep.subr.msk.mxu0 %vm70_vm1, %v5275_v59  ;;  %7310 = vmatpush1.msk.msra.mxu1 %vm70_vm1, %v5276_v60 }
 0x522   :  { %7307 = vmatpush1.msk.msra.mxu0 %vm70_vm1, %v5274_v63  ;;  %5358 = vmatprep.mubr.f32.mxu0 %v7954_v20 }
 0x523   :  { %7312 = vmatprep.subr.msk.mxu0 %vm70_vm1, %v5273_v32  ;;  %5429 = vmatprep.mubr.f32.mxu1 %v7954_v20  ;;  %v7315_v20 = vld [vmem:[%s8537_s7 + $0x18] sm:$0xff] }
 0x524   :  { %7308 = vmatmul.mubr.msk.f32.vlgmr.msra.gmra.mxu0 %vm66_vm2, %v7305_v58  ;;  %7311 = vmatmul.mubr.msk.f32.vlgmr.msra.gmra.mxu1 %vm66_vm2, %v7305_v58  ;;  %v5529_v29 = vpop.permute.xlu1 %5528 }
 0x525   :  { %7313 = vmatpush1.msk.msra.mxu0 %vm70_vm1, %v5278_v0  ;;  %v5540_v54 = vsel %vm832_vm5, %v8267_v19, %v5529_v29  ;;  %v5541_v51 = vsel %vm832_vm5, %v5529_v29, %v8253_v2  ;;  %5500 = vmatprep.mubr.f32.mxu0 %v8345_v7  ;;  %v6043_v19 = vpop.permute.xlu0 %6042 }
 0x526   :  { %7316 = vmatprep.subr.msk.mxu1 %vm70_vm1, %v5541_v51  ;;  %5625 = vmatprep.mubr.f32.mxu1 %v8345_v7  ;;  %v6050_v23 = vsel %vm1341_vm6, %v8271_v15, %v6043_v19 }
 0x527   :  { %7317 = vmatpush1.msk.msra.mxu1 %vm70_vm1, %v5540_v54 }
 0x528   :  { %7314 = vmatmul.mubr.msk.f32.vlgmr.msra.gmra.mxu0 %vm66_vm2, %v7305_v58  ;;  %7318 = vmatmul.mubr.msk.f32.vlgmr.msra.gmra.mxu1 %vm66_vm2, %v7315_v20  ;;  %v5533_v11 = vpop.permute.xlu1 %5532 }
 0x529   :  { %7322 = vmatprep.subr.msk.mxu1 %vm70_vm1, %v5545_v50  ;;  %v5542_v13 = vsel %vm832_vm5, %v8253_v2, %v5533_v11  ;;  %v5543_v10 = vsel %vm832_vm5, %v5533_v11, %v8255_v45  ;;  %5696 = vmatprep.mubr.f32.mxu0 %v8345_v7  ;;  %v6049_v45 = vsel %vm1341_vm6, %v6039_v1, %v8271_v15  ;;  %v8386_v24 = vpop.permute.xlu0 %6826 }
 0x52a   :  { %7323 = vmatpush1.msk.msra.mxu1 %vm70_vm1, %v5544_v8  ;;  %7319 = vmatprep.subr.msk.mxu0 %vm70_vm1, %v5543_v10 }
 0x52b   :  { %7329 = vmatprep.subr.msk.mxu1 %vm70_vm1, %v8212_v36  ;;  %7320 = vmatpush1.msk.msra.mxu0 %vm70_vm1, %v5542_v13  ;;  %v7325_v36 = vld [vmem:[%s8537_s7 + $0x20] sm:$0xff] }
 0x52c   :  { %5767 = vmatprep.mubr.f32.mxu1 %v8345_v7  ;;  %7321 = vmatmul.mubr.msk.f32.vlgmr.msra.gmra.mxu0 %vm66_vm2, %v7315_v20  ;;  %v8369_v2 = vpop.permute.xlu1 %6568 }
 0x52d   :  { %7324 = vmatmul.mubr.msk.f32.vlgmr.msra.gmra.mxu1 %vm66_vm2, %v7315_v20  ;;  %7326 = vmatprep.subr.msk.mxu0 %vm70_vm1, %v8207_v3  ;;  %v6563_v27 = vpop.permute.xlu0 %6562 }
 0x52e   :  { %7330 = vmatpush1.msk.msra.mxu1 %vm70_vm1, %v8166_v47  ;;  %7327 = vmatpush1.msk.msra.mxu0 %vm70_vm1, %v8164_v56  ;;  %v6048_v47 = vsel %vm1341_vm6, %v8257_v12, %v6039_v1  ;;  %v6051_v56 = vsel %vm1341_vm6, %v6043_v19, %v8273_v21  ;;  %v6572_v22 = vsel %vm1867_vm8, %v8294_v41, %v6563_v27 }
 0x52f   :  { %7336 = vmatprep.subr.msk.mxu1 %vm70_vm1, %v6049_v45  ;;  %7332 = vmatprep.subr.msk.mxu0 %vm70_vm1, %v8237_v6  ;;  %v7335_v6 = vld [vmem:[%s8537_s7 + $0x28] sm:$0xff] }
 0x530   :  { %5870 = vmatprep.mubr.f32.mxu0 %v8345_v7  ;;  %5941 = vmatprep.mubr.f32.mxu1 %v8345_v7  ;;  %v6301_v3 = vpop.permute.xlu1 %6300 }
 0x531   :  { %7328 = vmatmul.mubr.msk.f32.vlgmr.msra.gmra.mxu0 %vm66_vm2, %v7325_v36  ;;  %7331 = vmatmul.mubr.msk.f32.vlgmr.msra.gmra.mxu1 %vm66_vm2, %v7325_v36  ;;  %v6311_v28 = vsel %vm1604_vm7, %v6301_v3, %v8259_v5  ;;  %v6567_v34 = vpop.permute.xlu0 %6566 }
 0x532   :  { %7333 = vmatpush1.msk.msra.mxu0 %vm70_vm1, %v8187_v62  ;;  %7337 = vmatpush1.msk.msra.mxu1 %vm70_vm1, %v6048_v47  ;;  %v6575_v32 = vsel %vm1867_vm8, %v6567_v34, %v8369_v2  ;;  %v6574_v38 = vsel %vm1867_vm8, %v8320_v61, %v6567_v34 }
 0x533   :  { %7339 = vmatprep.subr.msk.mxu0 %vm70_vm1, %v6051_v56  ;;  %6012 = vmatprep.mubr.f32.mxu0 %v8345_v7 }
 0x534   :  { %6132 = vmatprep.mubr.f32.mxu1 %v8345_v7  ;;  %v6047_v12 = vpop.permute.xlu1 %6046 }
 0x535   :  { %7334 = vmatmul.mubr.msk.f32.vlgmr.msra.gmra.mxu0 %vm66_vm2, %v7325_v36  ;;  %7338 = vmatmul.mubr.msk.f32.vlgmr.msra.gmra.mxu1 %vm66_vm2, %v7335_v6  ;;  %v6052_v62 = vsel %vm1341_vm6, %v8273_v21, %v6047_v12  ;;  %v6310_v21 = vsel %vm1604_vm7, %v8261_v4, %v6301_v3  ;;  %v6573_v4 = vsel %vm1867_vm8, %v6563_v27, %v8320_v61  ;;  %v6823_v41 = vpop.permute.xlu0 %6822 }
 0x536   :  { %7340 = vmatpush1.msk.msra.mxu0 %vm70_vm1, %v6050_v23  ;;  %7342 = vmatprep.subr.msk.mxu1 %vm70_vm1, %v6047_v12 }
 0x537   :  { %7346 = vmatprep.subr.msk.mxu0 %vm70_vm1, %v6311_v28  ;;  %7343 = vmatpush1.msk.msra.mxu1 %vm70_vm1, %v6052_v62 }
 0x538   :  { %6203 = vmatprep.mubr.f32.mxu0 %v8345_v7  ;;  %6274 = vmatprep.mubr.f32.mxu1 %v8345_v7  ;;  %v6305_v15 = vpop.permute.xlu1 %6304 }
 0x539   :  { %7341 = vmatmul.mubr.msk.f32.vlgmr.msra.gmra.mxu0 %vm66_vm2, %v7335_v6  ;;  %7344 = vmatmul.mubr.msk.f32.vlgmr.msra.gmra.mxu1 %vm66_vm2, %v7335_v6  ;;  %v6312_v30 = vsel %vm1604_vm7, %v8259_v5, %v6305_v15  ;;  %v6313_v31 = vsel %vm1604_vm7, %v6305_v15, %v8265_v16  ;;  %v6831_v37 = vpop.permute.xlu0 %6830 }
 0x53a   :  { %7347 = vmatpush1.msk.msra.mxu0 %vm70_vm1, %v6310_v21  ;;  %7349 = vmatprep.subr.msk.mxu1 %vm70_vm1, %v6313_v31 }
 0x53b   :  { %6394 = vmatprep.mubr.f32.mxu0 %v8345_v7  ;;  %7350 = vmatpush1.msk.msra.mxu1 %vm70_vm1, %v6312_v30 }
 0x53c   :  { %6465 = vmatprep.mubr.f32.mxu1 %v8345_v7  ;;  %7356 = vmatprep.subr.msk.mxu1 %vm70_vm1, %v6573_v4  ;;  %v6309_v5 = vpop.permute.xlu1 %6308 }
 0x53d   :  { %7348 = vmatmul.mubr.msk.f32.vlgmr.msra.gmra.mxu0 %vm66_vm2, %v7345_v33  ;;  %7351 = vmatmul.mubr.msk.f32.vlgmr.msra.gmra.mxu1 %vm66_vm2, %v7345_v33  ;;  %v6314_v35 = vsel %vm1604_vm7, %v8265_v16, %v6309_v5 }
 0x53e   :  { %7352 = vmatprep.subr.msk.mxu0 %vm70_vm1, %v6309_v5  ;;  %7357 = vmatpush1.msk.msra.mxu1 %vm70_vm1, %v6572_v22 }
 0x53f   :  { %7353 = vmatpush1.msk.msra.mxu0 %vm70_vm1, %v6314_v35  ;;  %6536 = vmatprep.mubr.f32.mxu0 %v8345_v7 }
 0x540   :  { %6656 = vmatprep.mubr.f32.mxu1 %v8345_v7  ;;  %7359 = vmatprep.subr.msk.mxu0 %vm70_vm1, %v6575_v32  ;;  %v6825_v16 = vpop.permute.xlu1 %6824 }
 0x541   :  { %7354 = vmatmul.mubr.msk.f32.vlgmr.msra.gmra.mxu0 %vm66_vm2, %v7345_v33  ;;  %7358 = vmatmul.mubr.msk.f32.vlgmr.msra.gmra.mxu1 %vm66_vm2, %v7355_v26  ;;  %v6835_v40 = vsel %vm2130_vm9, %v6825_v16, %v8386_v24  ;;  %v6834_v44 = vsel %vm2130_vm9, %v6823_v41, %v6825_v16 }
 0x542   :  { %7360 = vmatpush1.msk.msra.mxu0 %vm70_vm1, %v6574_v38  ;;  %6727 = vmatprep.mubr.f32.mxu0 %v8345_v7 }
 0x543   :  { %7366 = vmatprep.subr.msk.mxu0 %vm70_vm1, %v6835_v40  ;;  %6798 = vmatprep.mubr.f32.mxu1 %v8345_v7 }
 0x544   :  { %v6571_v46 = vpop.permute.xlu1 %6570 }
 0x545   :  { %7361 = vmatmul.mubr.msk.f32.vlgmr.msra.gmra.mxu0 %vm66_vm2, %v7355_v26  ;;  %v6576_v14 = vsel %vm1867_vm8, %v8369_v2, %v6571_v46  ;;  %7362 = vmatprep.subr.msk.mxu1 %vm70_vm1, %v6571_v46 }
 0x546   :  { %7367 = vmatpush1.msk.msra.mxu0 %vm70_vm1, %v6834_v44  ;;  %7363 = vmatpush1.msk.msra.mxu1 %vm70_vm1, %v6576_v14 }
 0x547   :  { %7364 = vmatmul.mubr.msk.f32.vlgmr.msra.gmra.mxu1 %vm66_vm2, %v7355_v26  ;;  %6918 = vmatprep.mubr.f32.mxu0 %v8345_v7 }
 0x548   :  { %v6829_v42 = vpop.permute.xlu1 %6828  ;;  %6989 = vmatprep.mubr.f32.mxu1 %v8345_v7 }
 0x549   :  { %7368 = vmatmul.mubr.msk.f32.vlgmr.msra.gmra.mxu0 %vm66_vm2, %v7365_v25  ;;  %v6836_v48 = vsel %vm2130_vm9, %v8386_v24, %v6829_v42  ;;  %v6837_v52 = vsel %vm2130_vm9, %v6829_v42, %v6831_v37 }
 0x54a   :  { %7369 = vmatprep.subr.msk.mxu1 %vm70_vm1, %v6837_v52  ;;  %7060 = vmatprep.mubr.f32.mxu0 %v8345_v7 }
 0x54b   :  { %7370 = vmatpush1.msk.msra.mxu1 %vm70_vm1, %v6836_v48 }
 0x54c   :  { %7371 = vmatmul.mubr.msk.f32.vlgmr.msra.gmra.mxu1 %vm66_vm2, %v7365_v25  ;;  %v6833_v55 = vpop.permute.xlu1 %6832 }
 0x54d   :  { %v6838_v57 = vsel %vm2130_vm9, %v6831_v37, %v6833_v55  ;;  %7372 = vmatprep.subr.msk.mxu0 %vm70_vm1, %v6833_v55 }
 0x54e   :  { %7373 = vmatpush1.msk.msra.mxu0 %vm70_vm1, %v6838_v57 }
 0x54f   :  { %7374 = vmatmul.mubr.msk.f32.vlgmr.msra.gmra.mxu0 %vm66_vm2, %v7365_v25 }
 0x5d0   :  { %v4859_v59 = vpop.f32.mrf.mxu0 }
 0x5d2   :  { %v4861_v61 = vpop.f32.mrf.mxu0 }
 0x5d4   :  { %v4930_v60 = vpop.f32.mrf.mxu1 }
 0x5d6   :  { %v4932_v63 = vpop.f32.mrf.mxu1 }
 0x5d7   :  { %v5001_v58 = vpop.f32.mrf.mxu0 }
 0x5d9   :  { %v5003_v1 = vpop.f32.mrf.mxu0 }
 0x5dc   :  { %v5104_v0 = vpop.f32.mrf.mxu1 }
 0x5dd   :  { %v5105_v4 = vadd.f32 %v5104_v0, %v4859_v59 }
 0x5de   :  { %v5106_v29 = vpop.f32.mrf.mxu1 }
 0x5df   :  { %v5107_v22 = vadd.f32 %v5106_v29, %v4861_v61 }
 0x5e0   :  { %v5175_v54 = vpop.f32.mrf.mxu0  ;;  %v5246_v51 = vpop.f32.mrf.mxu1 }
 0x5e1   :  { %v5176_v26 = vadd.f32 %v5175_v54, %v4930_v60  ;;  %v5247_v25 = vadd.f32 %v5246_v51, %v5001_v58 }
 0x5e2   :  { %v5177_v20 = vpop.f32.mrf.mxu0  ;;  %v5248_v7 = vpop.f32.mrf.mxu1 }
 0x5e3   :  { %v5178_v41 = vadd.f32 %v5177_v20, %v4932_v63  ;;  %v5249_v48 = vadd.f32 %v5248_v7, %v5003_v1 }
 0x5e4   :  { %v5360_v50 = vpop.f32.mrf.mxu0  ;;  %v5431_v11 = vpop.f32.mrf.mxu1 }
 0x5e5   :  { %v5507_v35 = vadd.f32 %v5360_v50, %v5105_v4  ;;  %v5509_v46 = vadd.f32 %v5431_v11, %v5176_v26 }
 0x5e6   :  { %v5362_v8 = vpop.f32.mrf.mxu0  ;;  %v5433_v13 = vpop.f32.mrf.mxu1 }
 0x5e7   :  { %v5508_v38 = vadd.f32 %v5362_v8, %v5107_v22  ;;  %v5510_v52 = vadd.f32 %v5433_v13, %v5178_v41 }
 0x5e8   :  { %v5502_v10 = vpop.f32.mrf.mxu0  ;;  %v5627_v19 = vpop.f32.mrf.mxu1 }
 0x5e9   :  { %v5774_v40 = vadd.f32 %v5627_v19, %v5507_v35  ;;  %v5511_v59 = vadd.f32 %v5502_v10, %v5247_v25 }
 0x5ea   :  { %v5504_v2 = vpop.f32.mrf.mxu0  ;;  %v5629_v45 = vpop.f32.mrf.mxu1 }
 0x5eb   :  { %v5775_v37 = vadd.f32 %v5629_v45, %v5508_v38  ;;  %v5512_v29 = vadd.f32 %v5504_v2, %v5249_v48 }
 0x5ec   :  { %v5698_v36 = vpop.f32.mrf.mxu0 }
 0x5ed   :  { %v5769_v24 = vpop.f32.mrf.mxu1  ;;  %v5776_v55 = vadd.f32 %v5698_v36, %v5509_v46 }
 0x5ee   :  { %v5700_v3 = vpop.f32.mrf.mxu0  ;;  %v5778_v19 = vadd.f32 %v5769_v24, %v5511_v59 }
 0x5ef   :  { %v5771_v47 = vpop.f32.mrf.mxu1  ;;  %v5777_v60 = vadd.f32 %v5700_v3, %v5510_v52 }
 0x5f0   :  { %v5779_v11 = vadd.f32 %v5771_v47, %v5512_v29 }
 0x5f1   :  { %v5872_v56 = vpop.f32.mrf.mxu0  ;;  %v5943_v6 = vpop.f32.mrf.mxu1 }
 0x5f2   :  { %v6019_v42 = vadd.f32 %v5872_v56, %v5774_v40  ;;  %v6021_v54 = vadd.f32 %v5943_v6, %v5776_v55 }
 0x5f3   :  { %v5874_v12 = vpop.f32.mrf.mxu0  ;;  %v5945_v23 = vpop.f32.mrf.mxu1 }
 0x5f4   :  { %v6020_v0 = vadd.f32 %v5874_v12, %v5775_v37  ;;  %v6022_v4 = vadd.f32 %v5945_v23, %v5777_v60 }
 0x5f5   :  { %v6014_v62 = vpop.f32.mrf.mxu0  ;;  %v6134_v27 = vpop.f32.mrf.mxu1 }
 0x5f6   :  { %v6281_v61 = vadd.f32 %v6134_v27, %v6019_v42  ;;  %v6023_v1 = vadd.f32 %v6014_v62, %v5778_v19 }
 0x5f7   :  { %v6016_v28 = vpop.f32.mrf.mxu0  ;;  %v6136_v15 = vpop.f32.mrf.mxu1 }
 0x5f8   :  { %v6282_v63 = vadd.f32 %v6136_v15, %v6020_v0  ;;  %v6024_v36 = vadd.f32 %v6016_v28, %v5779_v11 }
 0x5f9   :  { %v6205_v21 = vpop.f32.mrf.mxu0  ;;  %v6276_v30 = vpop.f32.mrf.mxu1 }
 0x5fa   :  { %v6283_v58 = vadd.f32 %v6205_v21, %v6021_v54  ;;  %v6285_v3 = vadd.f32 %v6276_v30, %v6023_v1 }
 0x5fb   :  { %v6207_v31 = vpop.f32.mrf.mxu0  ;;  %v6278_v33 = vpop.f32.mrf.mxu1 }
 0x5fc   :  { %v6284_v10 = vadd.f32 %v6207_v31, %v6022_v4  ;;  %v6286_v22 = vadd.f32 %v6278_v33, %v6024_v36  ;;  %v7105_v36 = vld [vmem:[%s8538_s8] sm:$0xff] }
 0x5fd   :  { %v6396_v34 = vpop.f32.mrf.mxu0  ;;  %v6467_v5 = vpop.f32.mrf.mxu1 }
 0x5fe   :  { %v6543_v20 = vadd.f32 %v6396_v34, %v6281_v61  ;;  %v6545_v56 = vadd.f32 %v6467_v5, %v6283_v58 }
 0x5ff   :  { %v6398_v32 = vpop.f32.mrf.mxu0  ;;  %v6469_v16 = vpop.f32.mrf.mxu1 }
 0x600   :  { %v6544_v7 = vadd.f32 %v6398_v32, %v6282_v63  ;;  %v6546_v24 = vadd.f32 %v6469_v16, %v6284_v10 }
 0x601   :  { %v6538_v44 = vpop.f32.mrf.mxu0  ;;  %v6658_v14 = vpop.f32.mrf.mxu1 }
 0x602   :  { %v6805_v13 = vadd.f32 %v6658_v14, %v6543_v20  ;;  %v6547_v47 = vadd.f32 %v6538_v44, %v6285_v3 }
 0x603   :  { %v6540_v57 = vpop.f32.mrf.mxu0  ;;  %v6660_v50 = vpop.f32.mrf.mxu1 }
 0x604   :  { %v6806_v6 = vadd.f32 %v6660_v50, %v6544_v7  ;;  %v6548_v62 = vadd.f32 %v6540_v57, %v6286_v22 }
 0x605   :  { %v6729_v8 = vpop.f32.mrf.mxu0 }
 0x606   :  { %v6807_v15 = vadd.f32 %v6729_v8, %v6545_v56 }
 0x607   :  { %v6731_v51 = vpop.f32.mrf.mxu0  ;;  %v6800_v45 = vpop.f32.mrf.mxu1 }
 0x608   :  { %v6808_v26 = vadd.f32 %v6731_v51, %v6546_v24  ;;  %v6809_v28 = vadd.f32 %v6800_v45, %v6547_v47 }
 0x609   :  { %v6920_v12 = vpop.f32.mrf.mxu0  ;;  %v6802_v2 = vpop.f32.mrf.mxu1 }
 0x60a   :  { %v7067_v27 = vadd.f32 %v6920_v12, %v6805_v13  ;;  %v6810_v38 = vadd.f32 %v6802_v2, %v6548_v62  ;;  %v7109_v12 = vld [vmem:[%s8539_s9] sm:$0xff] }
 0x60b   :  { %v6922_v34 = vpop.f32.mrf.mxu0 }
 0x60c   :  { %v7073_v23 = vmul.f32 %v7067_v27, %v7796_v9  ;;  %v7068_v21 = vadd.f32 %v6922_v34, %v6806_v6  ;;  %v6991_v35 = vpop.f32.mrf.mxu1 }
 0x60d   :  { %v7069_v32 = vadd.f32 %v6991_v35, %v6807_v15 }
 0x60e   :  { %v7074_v31 = vmul.f32 %v7068_v21, %v7798_v18  ;;  %v6993_v5 = vpop.f32.mrf.mxu1  ;;  %v7087_v16 = vmul.f32 %v7073_v23, %v7073_v23 }
 0x60f   :  { %v7075_v30 = vmul.f32 %v7069_v32, %v7808_v17  ;;  %v7070_v40 = vadd.f32 %v6993_v5, %v6808_v26  ;;  %v7062_v33 = vpop.f32.mrf.mxu0 }
 0x610   :  { %v7079_v41 = vadd.f32 %v7074_v31, %v7073_v23  ;;  %v7088_v46 = vmul.f32 %v7074_v31, %v7074_v31  ;;  %v7071_v44 = vadd.f32 %v7062_v33, %v6809_v28 }
 0x611   :  { %v7089_v14 = vmul.f32 %v7075_v30, %v7075_v30  ;;  %v7076_v25 = vmul.f32 %v7070_v40, %v7817_v39  ;;  %v7064_v37 = vpop.f32.mrf.mxu0 }
 0x612   :  { %v7093_v42 = vadd.f32 %v7088_v46, %v7087_v16  ;;  %v7080_v48 = vadd.f32 %v7079_v41, %v7075_v30  ;;  %v7077_v52 = vmul.f32 %v7071_v44, %v7820_v43  ;;  %v7072_v55 = vadd.f32 %v7064_v37, %v6810_v38  ;;  %v7403_v37 = vld [vmem:[#allocation2 + $0x8] sm:$0xff] }
 0x613   :  { %v7090_v57 = vmul.f32 %v7076_v25, %v7076_v25 }
 0x614   :  { %v7094_v59 = vadd.f32 %v7093_v42, %v7089_v14  ;;  %v7081_v0 = vadd.f32 %v7080_v48, %v7076_v25  ;;  %v7091_v61 = vmul.f32 %v7077_v52, %v7077_v52  ;;  %v7078_v29 = vmul.f32 %v7072_v55, %v7825_v49  ;;  %v7404_v48 = vld [vmem:[#allocation2 + $0x10] sm:$0xff]  ;;  %v7405_v55 = vld [vmem:[#allocation2 + $0x18] sm:$0xff] }
 0x616   :  { %v7082_v60 = vadd.f32 %v7081_v0, %v7077_v52  ;;  %v7083_v54 = vsel %vm2427_vm11, %v7078_v29, 0.0  ;;  %v7092_v50 = vmul.f32 %v7078_v29, %v7078_v29  ;;  %v7095_v8 = vadd.f32 %v7094_v59, %v7090_v57  ;;  %v7406_v59 = vld [vmem:[#allocation2 + $0x20] sm:$0xff] }
 0x618   :  { %v7084_v19 = vadd.f32 %v7083_v54, %v7082_v60  ;;  %v7096_v63 = vadd.f32 %v7095_v8, %v7091_v61  ;;  %v7097_v20 = vsel %vm2427_vm11, %v7092_v50, 0.0  ;;  %v7407_v61 = vld [vmem:[#allocation2 + $0x28] sm:$0xff] }
 0x61a   :  { %7085 = vadd.xlane.f32.xlu0 %v7084_v19  ;;  %v7098_v11 = vadd.f32 %v7097_v20, %v7096_v63 }
 0x61c   :  { %7099 = vadd.xlane.f32.xlu1 %v7098_v11 }
 0x6a3   :  { %v7086_v4 = vpop.xlane.xlu0 %7085 }
 0x6a4   :  { %v7101_v58 = vmul.f32 0.001953125, %v7086_v4 }
 0x6a5   :  { %v7100_v51 = vpop.xlane.xlu1 %7099 }
 0x6a6   :  { %v7103_v45 = vmul.f32 %v7101_v58, %v7101_v58  ;;  %v7102_v1 = vmul.f32 0.001953125, %v7100_v51 }
 0x6a8   :  { %v7104_v7 = vsub.f32 %v7102_v1, %v7103_v45 }
 0x6aa   :  { %v7106_v13 = vadd.f32 1e-05, %v7104_v7 }
 0x6ac   :  { %7399 = vrsqrt.f32 %v7106_v13 }
 0x6b9   :  { %v7400_v10 = vpop.eup %7399 }
 0x6ba   :  { %v7108_v56 = vmul.f32 %v7400_v10, %v7105_v36 }
 0x6bc   :  { %7114 = vperm.xlu0 %7386, %v7108_v56   ;;  %v7110_v2 = vmul.f32 %v7108_v56, %v7101_v58 }
 0x6be   :  { %v7111_v3 = vsub.f32 %v7109_v12, %v7110_v2 }
 0x6c0   :  { %7125 = vperm.xlu1 %7385, %v7111_v3  }
 0x737   :  { %v7115_v6 = vpop.permute.xlu0 %7114 }
 0x738   :  { %v7117_v27 = vmul.f32 %v7115_v6, %v7073_v23  ;;  %v7118_v22 = vmul.f32 %v7115_v6, %v7074_v31  ;;  %v7119_v24 = vmul.f32 %v7115_v6, %v7075_v30  ;;  %v7120_v15 = vmul.f32 %v7115_v6, %v7076_v25 }
 0x739   :  { %v7121_v34 = vmul.f32 %v7115_v6, %v7077_v52  ;;  %v7122_v47 = vmul.f32 %v7115_v6, %v7078_v29 }
 0x73b   :  { %v7126_v21 = vpop.permute.xlu1 %7125 }
 0x73c   :  { %v7128_v35 = vadd.f32 %v7126_v21, %v7117_v27  ;;  %v7129_v62 = vadd.f32 %v7126_v21, %v7118_v22  ;;  %v7130_v26 = vadd.f32 %v7126_v21, %v7119_v24  ;;  %v7131_v32 = vadd.f32 %v7126_v21, %v7120_v15 }
 0x73d   :  { %v7132_v28 = vadd.f32 %v7126_v21, %v7121_v34  ;;  %v7133_v5 = vadd.f32 %v7126_v21, %v7122_v47 }
 0x73e   :  { %v7134_v38 = vmax.f32 %v7128_v35, 0.0  ;;  %v7135_v40 = vmax.f32 %v7129_v62, 0.0  ;;  %v7136_v33 = vmax.f32 %v7130_v26, 0.0  ;;  %v7137_v16 = vmax.f32 %v7131_v32, 0.0 }
 0x73f   :  { %v7138_v41 = vmax.f32 %v7132_v28, 0.0  ;;  %v7139_v46 = vmax.f32 %v7133_v5, 0.0 }
 0x740   :  { %v7140_v23 = vmul.f32 %v7134_v38, %v7796_v9  ;;  %v7141_v31 = vmul.f32 %v7135_v40, %v7798_v18  ;;  %v7142_v30 = vmul.f32 %v7136_v33, %v7808_v17  ;;  %v7143_v44 = vmul.f32 %v7137_v16, %v7817_v39 }
 0x741   :  { %v7144_v14 = vmul.f32 %v7138_v41, %v7820_v43  ;;  %v7145_v25 = vmul.f32 %v7139_v46, %v7825_v49 }
 0x742   :  { %v7146_v42 = vadd.f32 %v7403_v37, %v7140_v23  ;;  %v7147_v52 = vadd.f32 %v7404_v48, %v7141_v31  ;;  %v7148_v57 = vadd.f32 %v7405_v55, %v7142_v30  ;;  %v7149_v0 = vadd.f32 %v7406_v59, %v7143_v44 }
 0x743   :  { %v7150_v9 = vadd.f32 %v7407_v61, %v7144_v14  ;;  %v7151_v18 = vadd.f32 %v7145_v25, %v7841_v53 }
 0x744   :  { %7152 = vst [vmem:[%s8540_s10] sm:$0xff] %v7146_v42  ;;  %7153 = vst [vmem:[%s8540_s10 + $0x8] sm:$0xff] %v7147_v52 }
 0x745   :  { %7154 = vst [vmem:[%s8540_s10 + $0x10] sm:$0xff] %v7148_v57  ;;  %7155 = vst [vmem:[%s8540_s10 + $0x18] sm:$0xff] %v7149_v0 }
 0x746   :  { %7156 = vst [vmem:[%s8540_s10 + $0x20] sm:$0xff] %v7150_v9  ;;  %7157 = vst.msk [vmem:[%s8540_s10 + $0x28] sm:$0xff] %vm2427_vm11, %v7151_v18 }

</bundles_post_ra>
